<compile_context>
chip_gen: v5e
topology: v5e:2x2
jax: 0.10.0
libtpu: 0.0.40
codegen_flags: <defaults>
</compile_context>

<pallas_src>
import functools
import math

import jax
import jax.numpy as jnp
from jax.experimental import pallas as pl
from jax.experimental.pallas import tpu as pltpu


# ----------------------------- fused kernel -----------------------------

def _make_fused_kernel(*, gat_layers, decoder_layers, heads, gat_dim):
    hc = heads * gat_dim
    head_dim = hc // heads                      # MHA head dim (== gat_dim here)
    mha_scale = 1.0 / math.sqrt(head_dim)
    att_slope = 0.2                             # GATConv leaky_relu on logits
    act_slope = 0.01                            # F.leaky_relu after each GAT
    neg = -1e30

    def leaky(x, slope):
        return jnp.where(x >= 0, x, slope * x)

    def masked_softmax_rows(e, on_mask):
        e = jnp.where(on_mask, e, neg)
        e = e - jnp.max(e, axis=1, keepdims=True)
        p = jnp.where(on_mask, jnp.exp(e), 0.0)
        inv = pl.reciprocal(jnp.sum(p, axis=1, keepdims=True), approx=True)
        return p * inv

    def kernel(*refs):
        (xin_ref, adj_ref, bmask_ref, hmask_ref,
         featw_ref, featb_ref,
         g0w_ref, grw_ref, gasrc_ref, gadst_ref, gb_ref, geb_ref) = refs[:12]
        pos = 12
        dec_refs = []
        for _ in range(decoder_layers):
            dec_refs.append(refs[pos:pos + 8])
            pos += 8
        (projw_ref, projb_ref, w2_ref, mmat_ref, cmat_ref, rb_ref,
         outb_ref, o_ref) = refs[pos:pos + 8]

        edge_on = adj_ref[...] > 0.0                 # [Nt, Nt] graph mask (+self loops)
        same_batch = bmask_ref[...] > 0.0            # [Nt, Nt] per-sub-batch MHA mask
        hmask = hmask_ref[...]                       # [H, HC] head-column selectors

        # ---- feature_fc (no activation in the reference module) ----
        x = jnp.dot(xin_ref[...], featw_ref[...],
                    preferred_element_type=jnp.float32) + featb_ref[...]

        # ---- GAT stack (PyG GATConv with edge attributes, concat heads) ----
        for l in range(gat_layers):
            w = g0w_ref[...] if l == 0 else grw_ref[l - 1]
            h = jnp.dot(x, w, preferred_element_type=jnp.float32)              # [Nt, HC]
            a_dst = jnp.dot(h, gadst_ref[l], preferred_element_type=jnp.float32)   # [Nt, H]
            # block-diag att matrices are kept (negligible at HC=64) because they
            # avoid any in-kernel [Nt,HC]->[Nt,H,C] reshape.
            a_src_t = jnp.transpose(
                jnp.dot(h, gasrc_ref[l], preferred_element_type=jnp.float32))      # [H, Nt]
            y = jnp.zeros_like(h)
            for hd in range(heads):
                # e[i, j] = a_dst[i] + a_src[j] + <lin_edge(edge_attr[j->i]), att_edge>
                e = a_dst[:, hd:hd + 1] + a_src_t[hd:hd + 1, :] + geb_ref[l * heads + hd]
                alpha = masked_softmax_rows(leaky(e, att_slope), edge_on)       # [Nt, Nt]
                # lane-dense aggregation: (alpha @ h) columns of head `hd` are its
                # output; select with a 0/1 column mask (no concat, no narrow store).
                y = y + hmask[hd:hd + 1, :] * jnp.dot(
                    alpha, h, preferred_element_type=jnp.float32)
            y = y + gb_ref[l]                                                   # GATConv bias
            x = leaky(y, act_slope)                                             # F.leaky_relu

        # ---- transformer decoder: MHA self-attention, batch folded into rows ----
        for (wq_ref, wk_ref, wv_ref, bq_ref, bk_ref, bv_ref,
             wo_ref, bo_ref) in dec_refs:
            q = jnp.dot(x, wq_ref[...], preferred_element_type=jnp.float32) + bq_ref[...]
            k = jnp.dot(x, wk_ref[...], preferred_element_type=jnp.float32) + bk_ref[...]
            v = jnp.dot(x, wv_ref[...], preferred_element_type=jnp.float32) + bv_ref[...]
            attn = jnp.zeros_like(x)
            for hd in range(heads):
                qh = q[:, hd * head_dim:(hd + 1) * head_dim]
                kh = k[:, hd * head_dim:(hd + 1) * head_dim]
                s = jax.lax.dot_general(qh, kh, (((1,), (1,)), ((), ())),
                                        preferred_element_type=jnp.float32) * mha_scale
                p = masked_softmax_rows(s, same_batch)
                attn = attn + hmask[hd:hd + 1, :] * jnp.dot(
                    p, v, preferred_element_type=jnp.float32)
            x = jnp.dot(attn, wo_ref[...],
                        preferred_element_type=jnp.float32) + bo_ref[...]

        # ---- node_proj_FC ----
        pr = jnp.dot(x, projw_ref[...],
                     preferred_element_type=jnp.float32) + projb_ref[...]       # [Nt, P]

        # ---- reshape(B, num_nodes*P) @ W_out, expressed as matmuls (no reshape) ----
        # out[b, o] = sum_{s,p} pr[b*S+s, p] * W_out[s*P+p, o]
        t = jnp.dot(pr, w2_ref[...], preferred_element_type=jnp.float32)        # [Nt, S*O]
        u = t * mmat_ref[...]                                                   # keep s'==s blocks
        vv = jnp.dot(u, cmat_ref[...], preferred_element_type=jnp.float32)      # [Nt, O]
        out = jnp.dot(rb_ref[...], vv,
                      preferred_element_type=jnp.float32) + outb_ref[...]       # [B, O]
        o_ref[...] = out.astype(o_ref.dtype)

    return kernel


# ----------------------------- parameters -----------------------------

def _block_diag_att(att):
    """att: [H, C] -> [H*C, H] so (h @ M)[n, hd] = <h[n, hd*C:(hd+1)*C], att[hd]>."""
    H, C = att.shape
    m = jnp.zeros((H * C, H), dtype=jnp.float32)
    for hd in range(H):
        m = m.at[hd * C:(hd + 1) * C, hd].set(att[hd])
    return m


def init_params(key, *, num_nodes, num_features, output_dim, proj_dim, embedding_dim,
                heads, num_decoder_layers, edge_attr_dim, gat_layers, gat_dim):
    hc = heads * gat_dim
    d3 = 3 * embedding_dim
    keys = iter(jax.random.split(key, 256))

    def nrm(shape, scale=0.1):
        return (scale * jax.random.normal(next(keys), shape)).astype(jnp.float32)

    params = {
        "embed": nrm((num_nodes, embedding_dim)),
        "feat_w": nrm((num_features + embedding_dim, d3)),
        "feat_b": nrm((1, d3)),
        "gat": [],
        "decoders": [],
        "proj_w": nrm((hc, proj_dim)),
        "proj_b": nrm((1, proj_dim)),
        "out_w": nrm((proj_dim * num_nodes, output_dim)),
        "out_b": nrm((1, output_dim)),
    }
    in_dim = d3
    for _ in range(gat_layers):
        params["gat"].append({
            "w": nrm((in_dim, hc)),                 # lin (no bias), stored [in, out]
            "att_src": nrm((heads, gat_dim)),
            "att_dst": nrm((heads, gat_dim)),
            "att_edge": nrm((heads, gat_dim)),
            "w_edge": nrm((edge_attr_dim, hc)),     # lin_edge (no bias)
            "b": nrm((1, hc)),
        })
        in_dim = hc
    for _ in range(num_decoder_layers):
        params["decoders"].append({
            "wq": nrm((hc, hc)), "wk": nrm((hc, hc)), "wv": nrm((hc, hc)),
            "bq": nrm((1, hc)), "bk": nrm((1, hc)), "bv": nrm((1, hc)),
            "wo": nrm((hc, hc)), "bo": nrm((1, hc)),
        })
    return params


# ----------------------------- forward pass -----------------------------

def ti_tegnn_forward(params, x, edge_index, edge_attr, *, batch_size, num_nodes,
                     num_features, output_dim, proj_dim, embedding_dim, heads,
                     num_decoder_layers, edge_attr_dim, gat_layers, gat_dim):
    f32 = jnp.float32
    hc = heads * gat_dim
    n_total = batch_size * num_nodes
    S, P, O, H, C, L = num_nodes, proj_dim, output_dim, heads, gat_dim, gat_layers

    # ---- graph preprocessing (dense adjacency + dense edge features, PyG style) ----
    src, dst = edge_index[0], edge_index[1]
    diag = jnp.arange(n_total)
    adj = jnp.zeros((n_total, n_total), f32).at[dst, src].set(1.0)
    adj = adj.at[diag, diag].set(1.0)                                       # add_self_loops

    dense_ea = jnp.zeros((n_total, n_total, edge_attr_dim), f32).at[dst, src].set(edge_attr)
    deg = jnp.zeros((n_total,), f32).at[dst].add(1.0)
    loop_attr = (jnp.zeros((n_total, edge_attr_dim), f32).at[dst].add(edge_attr)
                 / jnp.maximum(deg, 1.0)[:, None])                          # fill_value='mean'
    dense_ea = dense_ea.at[diag, diag].set(loop_attr)

    # ---- node features + index embedding (torch.cat([x, index_embeds])) ----
    xin = jnp.concatenate([x, jnp.tile(params["embed"], (batch_size, 1))], axis=1)

    # ---- kernel-ready GAT weights ----
    g0w = params["gat"][0]["w"]
    if L > 1:
        grw = jnp.stack([params["gat"][l]["w"] for l in range(1, L)])       # [L-1, HC, HC]
    else:
        grw = jnp.zeros((1, hc, hc), f32)                                   # dummy, never read
    gasrc = jnp.stack([_block_diag_att(params["gat"][l]["att_src"]) for l in range(L)])
    gadst = jnp.stack([_block_diag_att(params["gat"][l]["att_dst"]) for l in range(L)])
    gb = jnp.stack([params["gat"][l]["b"] for l in range(L)])               # [L, 1, HC]
    # per-layer dense edge-attention bias: eb[l*H+h, i, j] = <lin_edge(ea[i,j]), att_edge[h]>
    geb = jnp.stack([
        jnp.einsum("ijd,dh->hij", dense_ea,
                   params["gat"][l]["w_edge"] @ _block_diag_att(params["gat"][l]["att_edge"]))
        for l in range(L)
    ]).reshape(L * H, n_total, n_total)

    dec_inputs = []
    for d in params["decoders"]:
        dec_inputs += [d["wq"], d["wk"], d["wv"], d["bq"], d["bk"], d["bv"],
                       d["wo"], d["bo"]]

    # ---- structural constant matrices (all tiny) ----
    headmask = (jnp.arange(hc)[None, :] // C == jnp.arange(H)[:, None]).astype(f32)   # [H, HC]
    bmask = (jnp.arange(n_total)[:, None] // S
             == jnp.arange(n_total)[None, :] // S).astype(f32)                         # [Nt, Nt]
    w2 = params["out_w"].reshape(S, P, O).transpose(1, 0, 2).reshape(P, S * O)         # [P, S*O]
    mmat = (jnp.arange(n_total)[:, None] % S
            == jnp.arange(S * O)[None, :] // O).astype(f32)                            # [Nt, S*O]
    cmat = (jnp.arange(S * O)[:, None] % O == jnp.arange(O)[None, :]).astype(f32)      # [S*O, O]
    rbsel = (jnp.arange(n_total)[None, :] // S
             == jnp.arange(batch_size)[:, None]).astype(f32)                           # [B, Nt]

    inputs = [xin, adj, bmask, headmask, params["feat_w"], params["feat_b"],
              g0w, grw, gasrc, gadst, gb, geb] + dec_inputs + [
              params["proj_w"], params["proj_b"], w2, mmat, cmat, rbsel,
              params["out_b"]]

    kernel = _make_fused_kernel(gat_layers=L, decoder_layers=num_decoder_layers,
                                heads=H, gat_dim=C)

    def full_spec(a):
        r = a.ndim
        return pl.BlockSpec(a.shape, lambda i, _r=r: (0,) * _r)

    # TODO(synk): for larger N_total, tile the GAT over target-row blocks and use a
    # parallel leading grid axis (v7x dual-TC); at this size a single step is optimal.
    return pl.pallas_call(
        kernel,
        out_shape=jax.ShapeDtypeStruct((batch_size, output_dim), jnp.float32),
        grid=(1,),
        in_specs=[full_spec(a) for a in inputs],
        out_specs=pl.BlockSpec((batch_size, output_dim), lambda i: (0, 0)),
        compiler_params=pltpu.CompilerParams(dimension_semantics=("arbitrary",)),
    )(*inputs)


# ----------------------------- graph construction -----------------------------

def build_ring_graph(batch_size, num_nodes):
    """Bidirectional ring inside each sub-graph of the batch (data.edge_index)."""
    edges = []
    for b in range(batch_size):
        off = b * num_nodes
        for i in range(num_nodes):
            j = (i + 1) % num_nodes
            edges.append((off + i, off + j))
            edges.append((off + j, off + i))
    return jnp.asarray(edges, dtype=jnp.int32).T      # [2, E]


# ----------------------------- main -----------------------------

if __name__ == "__main__":
    NUM_NODES = 8
    NUM_FEATURES = 6
    OUTPUT_DIM = 8
    PROJ_DIM = 4
    EMBEDDING_DIM = 4
    HEADS = 4
    NUM_DECODER_LAYERS = 1
    EDGE_ATTR_DIM = 2
    GAT_LAYERS = 4
    GAT_DIM = 16
    BATCH = 2

    key = jax.random.PRNGKey(0)
    k_params, k_x, k_ea = jax.random.split(key, 3)

    params = init_params(
        k_params, num_nodes=NUM_NODES, num_features=NUM_FEATURES,
        output_dim=OUTPUT_DIM, proj_dim=PROJ_DIM, embedding_dim=EMBEDDING_DIM,
        heads=HEADS, num_decoder_layers=NUM_DECODER_LAYERS,
        edge_attr_dim=EDGE_ATTR_DIM, gat_layers=GAT_LAYERS, gat_dim=GAT_DIM)

    n_total = BATCH * NUM_NODES
    x = jax.random.normal(k_x, (n_total, NUM_FEATURES), dtype=jnp.float32)
    edge_index = build_ring_graph(BATCH, NUM_NODES)                      # data.edge_index [2, 32]
    edge_attr = jax.random.normal(k_ea, (edge_index.shape[1], EDGE_ATTR_DIM),
                                  dtype=jnp.float32)                     # data.edge_attr [32, 2]

    fwd = jax.jit(functools.partial(
        ti_tegnn_forward, batch_size=BATCH, num_nodes=NUM_NODES,
        num_features=NUM_FEATURES, output_dim=OUTPUT_DIM, proj_dim=PROJ_DIM,
        embedding_dim=EMBEDDING_DIM, heads=HEADS,
        num_decoder_layers=NUM_DECODER_LAYERS, edge_attr_dim=EDGE_ATTR_DIM,
        gat_layers=GAT_LAYERS, gat_dim=GAT_DIM))

    out = fwd(params, x, edge_index, edge_attr)
    jax.block_until_ready(out)
    assert out.shape == (BATCH, OUTPUT_DIM)
    print("KERNEL_OK")
</pallas_src>

<mosaic_0001>
module attributes {stable_mosaic.version = 11 : i64} {
  func.func @kernel(%arg0: i32, %arg1: memref<16x10xf32, #tpu.memory_space<vmem>>, %arg2: memref<16x16xf32, #tpu.memory_space<vmem>>, %arg3: memref<16x16xf32, #tpu.memory_space<vmem>>, %arg4: memref<4x64xf32, #tpu.memory_space<vmem>>, %arg5: memref<10x12xf32, #tpu.memory_space<vmem>>, %arg6: memref<1x12xf32, #tpu.memory_space<vmem>>, %arg7: memref<12x64xf32, #tpu.memory_space<vmem>>, %arg8: memref<3x64x64xf32, #tpu.memory_space<vmem>>, %arg9: memref<4x64x4xf32, #tpu.memory_space<vmem>>, %arg10: memref<4x64x4xf32, #tpu.memory_space<vmem>>, %arg11: memref<4x1x64xf32, #tpu.memory_space<vmem>>, %arg12: memref<16x16x16xf32, #tpu.memory_space<vmem>>, %arg13: memref<64x64xf32, #tpu.memory_space<vmem>>, %arg14: memref<64x64xf32, #tpu.memory_space<vmem>>, %arg15: memref<64x64xf32, #tpu.memory_space<vmem>>, %arg16: memref<1x64xf32, #tpu.memory_space<vmem>>, %arg17: memref<1x64xf32, #tpu.memory_space<vmem>>, %arg18: memref<1x64xf32, #tpu.memory_space<vmem>>, %arg19: memref<64x64xf32, #tpu.memory_space<vmem>>, %arg20: memref<1x64xf32, #tpu.memory_space<vmem>>, %arg21: memref<64x4xf32, #tpu.memory_space<vmem>>, %arg22: memref<1x4xf32, #tpu.memory_space<vmem>>, %arg23: memref<4x64xf32, #tpu.memory_space<vmem>>, %arg24: memref<16x64xf32, #tpu.memory_space<vmem>>, %arg25: memref<64x8xf32, #tpu.memory_space<vmem>>, %arg26: memref<2x16xf32, #tpu.memory_space<vmem>>, %arg27: memref<1x8xf32, #tpu.memory_space<vmem>>, %arg28: memref<2x8xf32, #tpu.memory_space<vmem>>) attributes {dimension_semantics = [#tpu.dimension_semantics<arbitrary>], iteration_bounds = array<i64: 1>, scalar_prefetch = 0 : i64, scratch_operands = 0 : i64, tpu.core_type = #tpu.core_type<tc>, window_params = [{pipeline_mode = #tpu.pipeline_mode<synchronous>, transform_indices = @transform_0, window_bounds = array<i64: 16, 10>}, {pipeline_mode = #tpu.pipeline_mode<synchronous>, transform_indices = @transform_1, window_bounds = array<i64: 16, 16>}, {pipeline_mode = #tpu.pipeline_mode<synchronous>, transform_indices = @transform_2, window_bounds = array<i64: 16, 16>}, {pipeline_mode = #tpu.pipeline_mode<synchronous>, transform_indices = @transform_3, window_bounds = array<i64: 4, 64>}, {pipeline_mode = #tpu.pipeline_mode<synchronous>, transform_indices = @transform_4, window_bounds = array<i64: 10, 12>}, {pipeline_mode = #tpu.pipeline_mode<synchronous>, transform_indices = @transform_5, window_bounds = array<i64: 1, 12>}, {pipeline_mode = #tpu.pipeline_mode<synchronous>, transform_indices = @transform_6, window_bounds = array<i64: 12, 64>}, {pipeline_mode = #tpu.pipeline_mode<synchronous>, transform_indices = @transform_7, window_bounds = array<i64: 3, 64, 64>}, {pipeline_mode = #tpu.pipeline_mode<synchronous>, transform_indices = @transform_8, window_bounds = array<i64: 4, 64, 4>}, {pipeline_mode = #tpu.pipeline_mode<synchronous>, transform_indices = @transform_9, window_bounds = array<i64: 4, 64, 4>}, {pipeline_mode = #tpu.pipeline_mode<synchronous>, transform_indices = @transform_10, window_bounds = array<i64: 4, 1, 64>}, {pipeline_mode = #tpu.pipeline_mode<synchronous>, transform_indices = @transform_11, window_bounds = array<i64: 16, 16, 16>}, {pipeline_mode = #tpu.pipeline_mode<synchronous>, transform_indices = @transform_12, window_bounds = array<i64: 64, 64>}, {pipeline_mode = #tpu.pipeline_mode<synchronous>, transform_indices = @transform_13, window_bounds = array<i64: 64, 64>}, {pipeline_mode = #tpu.pipeline_mode<synchronous>, transform_indices = @transform_14, window_bounds = array<i64: 64, 64>}, {pipeline_mode = #tpu.pipeline_mode<synchronous>, transform_indices = @transform_15, window_bounds = array<i64: 1, 64>}, {pipeline_mode = #tpu.pipeline_mode<synchronous>, transform_indices = @transform_16, window_bounds = array<i64: 1, 64>}, {pipeline_mode = #tpu.pipeline_mode<synchronous>, transform_indices = @transform_17, window_bounds = array<i64: 1, 64>}, {pipeline_mode = #tpu.pipeline_mode<synchronous>, transform_indices = @transform_18, window_bounds = array<i64: 64, 64>}, {pipeline_mode = #tpu.pipeline_mode<synchronous>, transform_indices = @transform_19, window_bounds = array<i64: 1, 64>}, {pipeline_mode = #tpu.pipeline_mode<synchronous>, transform_indices = @transform_20, window_bounds = array<i64: 64, 4>}, {pipeline_mode = #tpu.pipeline_mode<synchronous>, transform_indices = @transform_21, window_bounds = array<i64: 1, 4>}, {pipeline_mode = #tpu.pipeline_mode<synchronous>, transform_indices = @transform_22, window_bounds = array<i64: 4, 64>}, {pipeline_mode = #tpu.pipeline_mode<synchronous>, transform_indices = @transform_23, window_bounds = array<i64: 16, 64>}, {pipeline_mode = #tpu.pipeline_mode<synchronous>, transform_indices = @transform_24, window_bounds = array<i64: 64, 8>}, {pipeline_mode = #tpu.pipeline_mode<synchronous>, transform_indices = @transform_25, window_bounds = array<i64: 2, 16>}, {pipeline_mode = #tpu.pipeline_mode<synchronous>, transform_indices = @transform_26, window_bounds = array<i64: 1, 8>}, {pipeline_mode = #tpu.pipeline_mode<synchronous>, transform_indices = @transform_27, window_bounds = array<i64: 2, 8>}]} {
    %c0 = arith.constant 0 : index
    %c0_0 = arith.constant 0 : index
    %0 = vector.load %arg2[%c0, %c0_0] : memref<16x16xf32, #tpu.memory_space<vmem>>, vector<16x16xf32>
    %cst = arith.constant 0.000000e+00 : f32
    %1 = vector.broadcast %cst : f32 to vector<16x16xf32>
    %2 = arith.cmpf ogt, %0, %1 : vector<16x16xf32>
    %c0_1 = arith.constant 0 : index
    %c0_2 = arith.constant 0 : index
    %3 = vector.load %arg3[%c0_1, %c0_2] : memref<16x16xf32, #tpu.memory_space<vmem>>, vector<16x16xf32>
    %cst_3 = arith.constant 0.000000e+00 : f32
    %4 = vector.broadcast %cst_3 : f32 to vector<16x16xf32>
    %5 = arith.cmpf ogt, %3, %4 : vector<16x16xf32>
    %c0_4 = arith.constant 0 : index
    %c0_5 = arith.constant 0 : index
    %6 = vector.load %arg4[%c0_4, %c0_5] : memref<4x64xf32, #tpu.memory_space<vmem>>, vector<4x64xf32>
    %c0_6 = arith.constant 0 : index
    %c0_7 = arith.constant 0 : index
    %7 = vector.load %arg1[%c0_6, %c0_7] : memref<16x10xf32, #tpu.memory_space<vmem>>, vector<16x10xf32>
    %c0_8 = arith.constant 0 : index
    %c0_9 = arith.constant 0 : index
    %8 = vector.load %arg5[%c0_8, %c0_9] : memref<10x12xf32, #tpu.memory_space<vmem>>, vector<10x12xf32>
    %cst_10 = arith.constant dense<0.000000e+00> : vector<16x12xf32>
    %9 = tpu.matmul %7, %8, %cst_10 {dimension_numbers = #tpu.dot_dimension_numbers<[1], [0], [0], [1], [0, 0, 1, 1], [], []>} : vector<16x10xf32>, vector<10x12xf32>, vector<16x12xf32> -> vector<16x12xf32>
    %c0_11 = arith.constant 0 : index
    %c0_12 = arith.constant 0 : index
    %10 = vector.load %arg6[%c0_11, %c0_12] : memref<1x12xf32, #tpu.memory_space<vmem>>, vector<1x12xf32>
    %11 = vector.broadcast %10 : vector<1x12xf32> to vector<16x12xf32>
    %12 = arith.addf %9, %11 : vector<16x12xf32>
    %c0_13 = arith.constant 0 : index
    %c0_14 = arith.constant 0 : index
    %13 = vector.load %arg7[%c0_13, %c0_14] : memref<12x64xf32, #tpu.memory_space<vmem>>, vector<12x64xf32>
    %cst_15 = arith.constant dense<0.000000e+00> : vector<16x64xf32>
    %14 = tpu.matmul %12, %13, %cst_15 {dimension_numbers = #tpu.dot_dimension_numbers<[1], [0], [0], [1], [0, 0, 1, 1], [], []>} : vector<16x12xf32>, vector<12x64xf32>, vector<16x64xf32> -> vector<16x64xf32>
    %c0_16 = arith.constant 0 : index
    %c0_17 = arith.constant 0 : index
    %c0_18 = arith.constant 0 : index
    %15 = vector.load %arg10[%c0_16, %c0_17, %c0_18] : memref<4x64x4xf32, #tpu.memory_space<vmem>>, vector<1x64x4xf32>
    %16 = vector.shape_cast %15 : vector<1x64x4xf32> to vector<64x4xf32>
    %cst_19 = arith.constant dense<0.000000e+00> : vector<16x4xf32>
    %17 = tpu.matmul %14, %16, %cst_19 {dimension_numbers = #tpu.dot_dimension_numbers<[1], [0], [0], [1], [0, 0, 1, 1], [], []>} : vector<16x64xf32>, vector<64x4xf32>, vector<16x4xf32> -> vector<16x4xf32>
    %c0_20 = arith.constant 0 : index
    %c0_21 = arith.constant 0 : index
    %c0_22 = arith.constant 0 : index
    %18 = vector.load %arg9[%c0_20, %c0_21, %c0_22] : memref<4x64x4xf32, #tpu.memory_space<vmem>>, vector<1x64x4xf32>
    %19 = vector.shape_cast %18 : vector<1x64x4xf32> to vector<64x4xf32>
    %cst_23 = arith.constant dense<0.000000e+00> : vector<16x4xf32>
    %20 = tpu.matmul %14, %19, %cst_23 {dimension_numbers = #tpu.dot_dimension_numbers<[1], [0], [0], [1], [0, 0, 1, 1], [], []>} : vector<16x64xf32>, vector<64x4xf32>, vector<16x4xf32> -> vector<16x4xf32>
    %21 = tpu.transpose %20, [1, 0] : vector<16x4xf32> -> vector<4x16xf32>
    %cst_24 = arith.constant 0.000000e+00 : f32
    %22 = vector.broadcast %cst_24 : f32 to vector<16x64xf32>
    %23 = vector.extract_strided_slice %17 {offsets = [0, 0], sizes = [16, 1], strides = [1, 1]} : vector<16x4xf32> to vector<16x1xf32>
    %24 = vector.extract_strided_slice %21 {offsets = [0, 0], sizes = [1, 16], strides = [1, 1]} : vector<4x16xf32> to vector<1x16xf32>
    %25 = vector.broadcast %23 : vector<16x1xf32> to vector<16x16xf32>
    %26 = vector.broadcast %24 : vector<1x16xf32> to vector<16x16xf32>
    %27 = arith.addf %25, %26 : vector<16x16xf32>
    %c0_25 = arith.constant 0 : index
    %c0_26 = arith.constant 0 : index
    %c0_27 = arith.constant 0 : index
    %28 = vector.load %arg12[%c0_25, %c0_26, %c0_27] : memref<16x16x16xf32, #tpu.memory_space<vmem>>, vector<1x16x16xf32>
    %29 = vector.shape_cast %28 : vector<1x16x16xf32> to vector<16x16xf32>
    %30 = arith.addf %27, %29 : vector<16x16xf32>
    %cst_28 = arith.constant 0.000000e+00 : f32
    %31 = vector.broadcast %cst_28 : f32 to vector<16x16xf32>
    %32 = arith.cmpf oge, %30, %31 : vector<16x16xf32>
    %cst_29 = arith.constant 2.000000e-01 : f32
    %33 = vector.broadcast %cst_29 : f32 to vector<16x16xf32>
    %34 = arith.mulf %33, %30 : vector<16x16xf32>
    %35 = arith.select %32, %30, %34 : vector<16x16xi1>, vector<16x16xf32>
    %cst_30 = arith.constant -1.000000e+30 : f32
    %36 = vector.broadcast %cst_30 : f32 to vector<16x16xf32>
    %37 = arith.select %2, %35, %36 : vector<16x16xi1>, vector<16x16xf32>
    %cst_31 = arith.constant dense<0xFF800000> : vector<16xf32>
    %38 = vector.multi_reduction <maximumf>, %37, %cst_31 [1] : vector<16x16xf32> to vector<16xf32>
    %39 = vector.shape_cast %38 : vector<16xf32> to vector<16x1xf32>
    %40 = vector.broadcast %39 : vector<16x1xf32> to vector<16x16xf32>
    %41 = arith.subf %37, %40 : vector<16x16xf32>
    %42 = math.exp %41 : vector<16x16xf32>
    %cst_32 = arith.constant 0.000000e+00 : f32
    %43 = vector.broadcast %cst_32 : f32 to vector<16x16xf32>
    %44 = arith.select %2, %42, %43 : vector<16x16xi1>, vector<16x16xf32>
    %cst_33 = arith.constant dense<0.000000e+00> : vector<16xf32>
    %45 = vector.multi_reduction <add>, %44, %cst_33 [1] : vector<16x16xf32> to vector<16xf32>
    %46 = vector.shape_cast %45 : vector<16xf32> to vector<16x1xf32>
    %47 = tpu.reciprocal %46 {approx = true} : vector<16x1xf32> -> vector<16x1xf32>
    %48 = vector.broadcast %47 : vector<16x1xf32> to vector<16x16xf32>
    %49 = arith.mulf %44, %48 : vector<16x16xf32>
    %50 = vector.extract_strided_slice %6 {offsets = [0, 0], sizes = [1, 64], strides = [1, 1]} : vector<4x64xf32> to vector<1x64xf32>
    %cst_34 = arith.constant dense<0.000000e+00> : vector<16x64xf32>
    %51 = tpu.matmul %49, %14, %cst_34 {dimension_numbers = #tpu.dot_dimension_numbers<[1], [0], [0], [1], [0, 0, 1, 1], [], []>} : vector<16x16xf32>, vector<16x64xf32>, vector<16x64xf32> -> vector<16x64xf32>
    %52 = vector.broadcast %50 : vector<1x64xf32> to vector<16x64xf32>
    %53 = arith.mulf %52, %51 : vector<16x64xf32>
    %54 = arith.addf %22, %53 : vector<16x64xf32>
    %55 = vector.extract_strided_slice %17 {offsets = [0, 1], sizes = [16, 1], strides = [1, 1]} : vector<16x4xf32> to vector<16x1xf32>
    %56 = vector.extract_strided_slice %21 {offsets = [1, 0], sizes = [1, 16], strides = [1, 1]} : vector<4x16xf32> to vector<1x16xf32>
    %57 = vector.broadcast %55 : vector<16x1xf32> to vector<16x16xf32>
    %58 = vector.broadcast %56 : vector<1x16xf32> to vector<16x16xf32>
    %59 = arith.addf %57, %58 : vector<16x16xf32>
    %c1 = arith.constant 1 : index
    %c0_35 = arith.constant 0 : index
    %c0_36 = arith.constant 0 : index
    %60 = vector.load %arg12[%c1, %c0_35, %c0_36] : memref<16x16x16xf32, #tpu.memory_space<vmem>>, vector<1x16x16xf32>
    %61 = vector.shape_cast %60 : vector<1x16x16xf32> to vector<16x16xf32>
    %62 = arith.addf %59, %61 : vector<16x16xf32>
    %cst_37 = arith.constant 0.000000e+00 : f32
    %63 = vector.broadcast %cst_37 : f32 to vector<16x16xf32>
    %64 = arith.cmpf oge, %62, %63 : vector<16x16xf32>
    %cst_38 = arith.constant 2.000000e-01 : f32
    %65 = vector.broadcast %cst_38 : f32 to vector<16x16xf32>
    %66 = arith.mulf %65, %62 : vector<16x16xf32>
    %67 = arith.select %64, %62, %66 : vector<16x16xi1>, vector<16x16xf32>
    %cst_39 = arith.constant -1.000000e+30 : f32
    %68 = vector.broadcast %cst_39 : f32 to vector<16x16xf32>
    %69 = arith.select %2, %67, %68 : vector<16x16xi1>, vector<16x16xf32>
    %cst_40 = arith.constant dense<0xFF800000> : vector<16xf32>
    %70 = vector.multi_reduction <maximumf>, %69, %cst_40 [1] : vector<16x16xf32> to vector<16xf32>
    %71 = vector.shape_cast %70 : vector<16xf32> to vector<16x1xf32>
    %72 = vector.broadcast %71 : vector<16x1xf32> to vector<16x16xf32>
    %73 = arith.subf %69, %72 : vector<16x16xf32>
    %74 = math.exp %73 : vector<16x16xf32>
    %cst_41 = arith.constant 0.000000e+00 : f32
    %75 = vector.broadcast %cst_41 : f32 to vector<16x16xf32>
    %76 = arith.select %2, %74, %75 : vector<16x16xi1>, vector<16x16xf32>
    %cst_42 = arith.constant dense<0.000000e+00> : vector<16xf32>
    %77 = vector.multi_reduction <add>, %76, %cst_42 [1] : vector<16x16xf32> to vector<16xf32>
    %78 = vector.shape_cast %77 : vector<16xf32> to vector<16x1xf32>
    %79 = tpu.reciprocal %78 {approx = true} : vector<16x1xf32> -> vector<16x1xf32>
    %80 = vector.broadcast %79 : vector<16x1xf32> to vector<16x16xf32>
    %81 = arith.mulf %76, %80 : vector<16x16xf32>
    %82 = vector.extract_strided_slice %6 {offsets = [1, 0], sizes = [1, 64], strides = [1, 1]} : vector<4x64xf32> to vector<1x64xf32>
    %cst_43 = arith.constant dense<0.000000e+00> : vector<16x64xf32>
    %83 = tpu.matmul %81, %14, %cst_43 {dimension_numbers = #tpu.dot_dimension_numbers<[1], [0], [0], [1], [0, 0, 1, 1], [], []>} : vector<16x16xf32>, vector<16x64xf32>, vector<16x64xf32> -> vector<16x64xf32>
    %84 = vector.broadcast %82 : vector<1x64xf32> to vector<16x64xf32>
    %85 = arith.mulf %84, %83 : vector<16x64xf32>
    %86 = arith.addf %54, %85 : vector<16x64xf32>
    %87 = vector.extract_strided_slice %17 {offsets = [0, 2], sizes = [16, 1], strides = [1, 1]} : vector<16x4xf32> to vector<16x1xf32>
    %88 = vector.extract_strided_slice %21 {offsets = [2, 0], sizes = [1, 16], strides = [1, 1]} : vector<4x16xf32> to vector<1x16xf32>
    %89 = vector.broadcast %87 : vector<16x1xf32> to vector<16x16xf32>
    %90 = vector.broadcast %88 : vector<1x16xf32> to vector<16x16xf32>
    %91 = arith.addf %89, %90 : vector<16x16xf32>
    %c2 = arith.constant 2 : index
    %c0_44 = arith.constant 0 : index
    %c0_45 = arith.constant 0 : index
    %92 = vector.load %arg12[%c2, %c0_44, %c0_45] : memref<16x16x16xf32, #tpu.memory_space<vmem>>, vector<1x16x16xf32>
    %93 = vector.shape_cast %92 : vector<1x16x16xf32> to vector<16x16xf32>
    %94 = arith.addf %91, %93 : vector<16x16xf32>
    %cst_46 = arith.constant 0.000000e+00 : f32
    %95 = vector.broadcast %cst_46 : f32 to vector<16x16xf32>
    %96 = arith.cmpf oge, %94, %95 : vector<16x16xf32>
    %cst_47 = arith.constant 2.000000e-01 : f32
    %97 = vector.broadcast %cst_47 : f32 to vector<16x16xf32>
    %98 = arith.mulf %97, %94 : vector<16x16xf32>
    %99 = arith.select %96, %94, %98 : vector<16x16xi1>, vector<16x16xf32>
    %cst_48 = arith.constant -1.000000e+30 : f32
    %100 = vector.broadcast %cst_48 : f32 to vector<16x16xf32>
    %101 = arith.select %2, %99, %100 : vector<16x16xi1>, vector<16x16xf32>
    %cst_49 = arith.constant dense<0xFF800000> : vector<16xf32>
    %102 = vector.multi_reduction <maximumf>, %101, %cst_49 [1] : vector<16x16xf32> to vector<16xf32>
    %103 = vector.shape_cast %102 : vector<16xf32> to vector<16x1xf32>
    %104 = vector.broadcast %103 : vector<16x1xf32> to vector<16x16xf32>
    %105 = arith.subf %101, %104 : vector<16x16xf32>
    %106 = math.exp %105 : vector<16x16xf32>
    %cst_50 = arith.constant 0.000000e+00 : f32
    %107 = vector.broadcast %cst_50 : f32 to vector<16x16xf32>
    %108 = arith.select %2, %106, %107 : vector<16x16xi1>, vector<16x16xf32>
    %cst_51 = arith.constant dense<0.000000e+00> : vector<16xf32>
    %109 = vector.multi_reduction <add>, %108, %cst_51 [1] : vector<16x16xf32> to vector<16xf32>
    %110 = vector.shape_cast %109 : vector<16xf32> to vector<16x1xf32>
    %111 = tpu.reciprocal %110 {approx = true} : vector<16x1xf32> -> vector<16x1xf32>
    %112 = vector.broadcast %111 : vector<16x1xf32> to vector<16x16xf32>
    %113 = arith.mulf %108, %112 : vector<16x16xf32>
    %114 = vector.extract_strided_slice %6 {offsets = [2, 0], sizes = [1, 64], strides = [1, 1]} : vector<4x64xf32> to vector<1x64xf32>
    %cst_52 = arith.constant dense<0.000000e+00> : vector<16x64xf32>
    %115 = tpu.matmul %113, %14, %cst_52 {dimension_numbers = #tpu.dot_dimension_numbers<[1], [0], [0], [1], [0, 0, 1, 1], [], []>} : vector<16x16xf32>, vector<16x64xf32>, vector<16x64xf32> -> vector<16x64xf32>
    %116 = vector.broadcast %114 : vector<1x64xf32> to vector<16x64xf32>
    %117 = arith.mulf %116, %115 : vector<16x64xf32>
    %118 = arith.addf %86, %117 : vector<16x64xf32>
    %119 = vector.extract_strided_slice %17 {offsets = [0, 3], sizes = [16, 1], strides = [1, 1]} : vector<16x4xf32> to vector<16x1xf32>
    %120 = vector.extract_strided_slice %21 {offsets = [3, 0], sizes = [1, 16], strides = [1, 1]} : vector<4x16xf32> to vector<1x16xf32>
    %121 = vector.broadcast %119 : vector<16x1xf32> to vector<16x16xf32>
    %122 = vector.broadcast %120 : vector<1x16xf32> to vector<16x16xf32>
    %123 = arith.addf %121, %122 : vector<16x16xf32>
    %c3 = arith.constant 3 : index
    %c0_53 = arith.constant 0 : index
    %c0_54 = arith.constant 0 : index
    %124 = vector.load %arg12[%c3, %c0_53, %c0_54] : memref<16x16x16xf32, #tpu.memory_space<vmem>>, vector<1x16x16xf32>
    %125 = vector.shape_cast %124 : vector<1x16x16xf32> to vector<16x16xf32>
    %126 = arith.addf %123, %125 : vector<16x16xf32>
    %cst_55 = arith.constant 0.000000e+00 : f32
    %127 = vector.broadcast %cst_55 : f32 to vector<16x16xf32>
    %128 = arith.cmpf oge, %126, %127 : vector<16x16xf32>
    %cst_56 = arith.constant 2.000000e-01 : f32
    %129 = vector.broadcast %cst_56 : f32 to vector<16x16xf32>
    %130 = arith.mulf %129, %126 : vector<16x16xf32>
    %131 = arith.select %128, %126, %130 : vector<16x16xi1>, vector<16x16xf32>
    %cst_57 = arith.constant -1.000000e+30 : f32
    %132 = vector.broadcast %cst_57 : f32 to vector<16x16xf32>
    %133 = arith.select %2, %131, %132 : vector<16x16xi1>, vector<16x16xf32>
    %cst_58 = arith.constant dense<0xFF800000> : vector<16xf32>
    %134 = vector.multi_reduction <maximumf>, %133, %cst_58 [1] : vector<16x16xf32> to vector<16xf32>
    %135 = vector.shape_cast %134 : vector<16xf32> to vector<16x1xf32>
    %136 = vector.broadcast %135 : vector<16x1xf32> to vector<16x16xf32>
    %137 = arith.subf %133, %136 : vector<16x16xf32>
    %138 = math.exp %137 : vector<16x16xf32>
    %cst_59 = arith.constant 0.000000e+00 : f32
    %139 = vector.broadcast %cst_59 : f32 to vector<16x16xf32>
    %140 = arith.select %2, %138, %139 : vector<16x16xi1>, vector<16x16xf32>
    %cst_60 = arith.constant dense<0.000000e+00> : vector<16xf32>
    %141 = vector.multi_reduction <add>, %140, %cst_60 [1] : vector<16x16xf32> to vector<16xf32>
    %142 = vector.shape_cast %141 : vector<16xf32> to vector<16x1xf32>
    %143 = tpu.reciprocal %142 {approx = true} : vector<16x1xf32> -> vector<16x1xf32>
    %144 = vector.broadcast %143 : vector<16x1xf32> to vector<16x16xf32>
    %145 = arith.mulf %140, %144 : vector<16x16xf32>
    %146 = vector.extract_strided_slice %6 {offsets = [3, 0], sizes = [1, 64], strides = [1, 1]} : vector<4x64xf32> to vector<1x64xf32>
    %cst_61 = arith.constant dense<0.000000e+00> : vector<16x64xf32>
    %147 = tpu.matmul %145, %14, %cst_61 {dimension_numbers = #tpu.dot_dimension_numbers<[1], [0], [0], [1], [0, 0, 1, 1], [], []>} : vector<16x16xf32>, vector<16x64xf32>, vector<16x64xf32> -> vector<16x64xf32>
    %148 = vector.broadcast %146 : vector<1x64xf32> to vector<16x64xf32>
    %149 = arith.mulf %148, %147 : vector<16x64xf32>
    %150 = arith.addf %118, %149 : vector<16x64xf32>
    %c0_62 = arith.constant 0 : index
    %c0_63 = arith.constant 0 : index
    %c0_64 = arith.constant 0 : index
    %151 = vector.load %arg11[%c0_62, %c0_63, %c0_64] : memref<4x1x64xf32, #tpu.memory_space<vmem>>, vector<1x1x64xf32>
    %152 = vector.shape_cast %151 : vector<1x1x64xf32> to vector<1x64xf32>
    %153 = vector.broadcast %152 : vector<1x64xf32> to vector<16x64xf32>
    %154 = arith.addf %150, %153 : vector<16x64xf32>
    %cst_65 = arith.constant 0.000000e+00 : f32
    %155 = vector.broadcast %cst_65 : f32 to vector<16x64xf32>
    %156 = arith.cmpf oge, %154, %155 : vector<16x64xf32>
    %cst_66 = arith.constant 0.00999999977 : f32
    %157 = vector.broadcast %cst_66 : f32 to vector<16x64xf32>
    %158 = arith.mulf %157, %154 : vector<16x64xf32>
    %159 = arith.select %156, %154, %158 : vector<16x64xi1>, vector<16x64xf32>
    %c0_67 = arith.constant 0 : index
    %c0_68 = arith.constant 0 : index
    %c0_69 = arith.constant 0 : index
    %160 = vector.load %arg8[%c0_67, %c0_68, %c0_69] : memref<3x64x64xf32, #tpu.memory_space<vmem>>, vector<1x64x64xf32>
    %161 = vector.shape_cast %160 : vector<1x64x64xf32> to vector<64x64xf32>
    %cst_70 = arith.constant dense<0.000000e+00> : vector<16x64xf32>
    %162 = tpu.matmul %159, %161, %cst_70 {dimension_numbers = #tpu.dot_dimension_numbers<[1], [0], [0], [1], [0, 0, 1, 1], [], []>} : vector<16x64xf32>, vector<64x64xf32>, vector<16x64xf32> -> vector<16x64xf32>
    %c1_71 = arith.constant 1 : index
    %c0_72 = arith.constant 0 : index
    %c0_73 = arith.constant 0 : index
    %163 = vector.load %arg10[%c1_71, %c0_72, %c0_73] : memref<4x64x4xf32, #tpu.memory_space<vmem>>, vector<1x64x4xf32>
    %164 = vector.shape_cast %163 : vector<1x64x4xf32> to vector<64x4xf32>
    %cst_74 = arith.constant dense<0.000000e+00> : vector<16x4xf32>
    %165 = tpu.matmul %162, %164, %cst_74 {dimension_numbers = #tpu.dot_dimension_numbers<[1], [0], [0], [1], [0, 0, 1, 1], [], []>} : vector<16x64xf32>, vector<64x4xf32>, vector<16x4xf32> -> vector<16x4xf32>
    %c1_75 = arith.constant 1 : index
    %c0_76 = arith.constant 0 : index
    %c0_77 = arith.constant 0 : index
    %166 = vector.load %arg9[%c1_75, %c0_76, %c0_77] : memref<4x64x4xf32, #tpu.memory_space<vmem>>, vector<1x64x4xf32>
    %167 = vector.shape_cast %166 : vector<1x64x4xf32> to vector<64x4xf32>
    %cst_78 = arith.constant dense<0.000000e+00> : vector<16x4xf32>
    %168 = tpu.matmul %162, %167, %cst_78 {dimension_numbers = #tpu.dot_dimension_numbers<[1], [0], [0], [1], [0, 0, 1, 1], [], []>} : vector<16x64xf32>, vector<64x4xf32>, vector<16x4xf32> -> vector<16x4xf32>
    %169 = tpu.transpose %168, [1, 0] : vector<16x4xf32> -> vector<4x16xf32>
    %cst_79 = arith.constant 0.000000e+00 : f32
    %170 = vector.broadcast %cst_79 : f32 to vector<16x64xf32>
    %171 = vector.extract_strided_slice %165 {offsets = [0, 0], sizes = [16, 1], strides = [1, 1]} : vector<16x4xf32> to vector<16x1xf32>
    %172 = vector.extract_strided_slice %169 {offsets = [0, 0], sizes = [1, 16], strides = [1, 1]} : vector<4x16xf32> to vector<1x16xf32>
    %173 = vector.broadcast %171 : vector<16x1xf32> to vector<16x16xf32>
    %174 = vector.broadcast %172 : vector<1x16xf32> to vector<16x16xf32>
    %175 = arith.addf %173, %174 : vector<16x16xf32>
    %c4 = arith.constant 4 : index
    %c0_80 = arith.constant 0 : index
    %c0_81 = arith.constant 0 : index
    %176 = vector.load %arg12[%c4, %c0_80, %c0_81] : memref<16x16x16xf32, #tpu.memory_space<vmem>>, vector<1x16x16xf32>
    %177 = vector.shape_cast %176 : vector<1x16x16xf32> to vector<16x16xf32>
    %178 = arith.addf %175, %177 : vector<16x16xf32>
    %cst_82 = arith.constant 0.000000e+00 : f32
    %179 = vector.broadcast %cst_82 : f32 to vector<16x16xf32>
    %180 = arith.cmpf oge, %178, %179 : vector<16x16xf32>
    %cst_83 = arith.constant 2.000000e-01 : f32
    %181 = vector.broadcast %cst_83 : f32 to vector<16x16xf32>
    %182 = arith.mulf %181, %178 : vector<16x16xf32>
    %183 = arith.select %180, %178, %182 : vector<16x16xi1>, vector<16x16xf32>
    %cst_84 = arith.constant -1.000000e+30 : f32
    %184 = vector.broadcast %cst_84 : f32 to vector<16x16xf32>
    %185 = arith.select %2, %183, %184 : vector<16x16xi1>, vector<16x16xf32>
    %cst_85 = arith.constant dense<0xFF800000> : vector<16xf32>
    %186 = vector.multi_reduction <maximumf>, %185, %cst_85 [1] : vector<16x16xf32> to vector<16xf32>
    %187 = vector.shape_cast %186 : vector<16xf32> to vector<16x1xf32>
    %188 = vector.broadcast %187 : vector<16x1xf32> to vector<16x16xf32>
    %189 = arith.subf %185, %188 : vector<16x16xf32>
    %190 = math.exp %189 : vector<16x16xf32>
    %cst_86 = arith.constant 0.000000e+00 : f32
    %191 = vector.broadcast %cst_86 : f32 to vector<16x16xf32>
    %192 = arith.select %2, %190, %191 : vector<16x16xi1>, vector<16x16xf32>
    %cst_87 = arith.constant dense<0.000000e+00> : vector<16xf32>
    %193 = vector.multi_reduction <add>, %192, %cst_87 [1] : vector<16x16xf32> to vector<16xf32>
    %194 = vector.shape_cast %193 : vector<16xf32> to vector<16x1xf32>
    %195 = tpu.reciprocal %194 {approx = true} : vector<16x1xf32> -> vector<16x1xf32>
    %196 = vector.broadcast %195 : vector<16x1xf32> to vector<16x16xf32>
    %197 = arith.mulf %192, %196 : vector<16x16xf32>
    %198 = vector.extract_strided_slice %6 {offsets = [0, 0], sizes = [1, 64], strides = [1, 1]} : vector<4x64xf32> to vector<1x64xf32>
    %cst_88 = arith.constant dense<0.000000e+00> : vector<16x64xf32>
    %199 = tpu.matmul %197, %162, %cst_88 {dimension_numbers = #tpu.dot_dimension_numbers<[1], [0], [0], [1], [0, 0, 1, 1], [], []>} : vector<16x16xf32>, vector<16x64xf32>, vector<16x64xf32> -> vector<16x64xf32>
    %200 = vector.broadcast %198 : vector<1x64xf32> to vector<16x64xf32>
    %201 = arith.mulf %200, %199 : vector<16x64xf32>
    %202 = arith.addf %170, %201 : vector<16x64xf32>
    %203 = vector.extract_strided_slice %165 {offsets = [0, 1], sizes = [16, 1], strides = [1, 1]} : vector<16x4xf32> to vector<16x1xf32>
    %204 = vector.extract_strided_slice %169 {offsets = [1, 0], sizes = [1, 16], strides = [1, 1]} : vector<4x16xf32> to vector<1x16xf32>
    %205 = vector.broadcast %203 : vector<16x1xf32> to vector<16x16xf32>
    %206 = vector.broadcast %204 : vector<1x16xf32> to vector<16x16xf32>
    %207 = arith.addf %205, %206 : vector<16x16xf32>
    %c5 = arith.constant 5 : index
    %c0_89 = arith.constant 0 : index
    %c0_90 = arith.constant 0 : index
    %208 = vector.load %arg12[%c5, %c0_89, %c0_90] : memref<16x16x16xf32, #tpu.memory_space<vmem>>, vector<1x16x16xf32>
    %209 = vector.shape_cast %208 : vector<1x16x16xf32> to vector<16x16xf32>
    %210 = arith.addf %207, %209 : vector<16x16xf32>
    %cst_91 = arith.constant 0.000000e+00 : f32
    %211 = vector.broadcast %cst_91 : f32 to vector<16x16xf32>
    %212 = arith.cmpf oge, %210, %211 : vector<16x16xf32>
    %cst_92 = arith.constant 2.000000e-01 : f32
    %213 = vector.broadcast %cst_92 : f32 to vector<16x16xf32>
    %214 = arith.mulf %213, %210 : vector<16x16xf32>
    %215 = arith.select %212, %210, %214 : vector<16x16xi1>, vector<16x16xf32>
    %cst_93 = arith.constant -1.000000e+30 : f32
    %216 = vector.broadcast %cst_93 : f32 to vector<16x16xf32>
    %217 = arith.select %2, %215, %216 : vector<16x16xi1>, vector<16x16xf32>
    %cst_94 = arith.constant dense<0xFF800000> : vector<16xf32>
    %218 = vector.multi_reduction <maximumf>, %217, %cst_94 [1] : vector<16x16xf32> to vector<16xf32>
    %219 = vector.shape_cast %218 : vector<16xf32> to vector<16x1xf32>
    %220 = vector.broadcast %219 : vector<16x1xf32> to vector<16x16xf32>
    %221 = arith.subf %217, %220 : vector<16x16xf32>
    %222 = math.exp %221 : vector<16x16xf32>
    %cst_95 = arith.constant 0.000000e+00 : f32
    %223 = vector.broadcast %cst_95 : f32 to vector<16x16xf32>
    %224 = arith.select %2, %222, %223 : vector<16x16xi1>, vector<16x16xf32>
    %cst_96 = arith.constant dense<0.000000e+00> : vector<16xf32>
    %225 = vector.multi_reduction <add>, %224, %cst_96 [1] : vector<16x16xf32> to vector<16xf32>
    %226 = vector.shape_cast %225 : vector<16xf32> to vector<16x1xf32>
    %227 = tpu.reciprocal %226 {approx = true} : vector<16x1xf32> -> vector<16x1xf32>
    %228 = vector.broadcast %227 : vector<16x1xf32> to vector<16x16xf32>
    %229 = arith.mulf %224, %228 : vector<16x16xf32>
    %230 = vector.extract_strided_slice %6 {offsets = [1, 0], sizes = [1, 64], strides = [1, 1]} : vector<4x64xf32> to vector<1x64xf32>
    %cst_97 = arith.constant dense<0.000000e+00> : vector<16x64xf32>
    %231 = tpu.matmul %229, %162, %cst_97 {dimension_numbers = #tpu.dot_dimension_numbers<[1], [0], [0], [1], [0, 0, 1, 1], [], []>} : vector<16x16xf32>, vector<16x64xf32>, vector<16x64xf32> -> vector<16x64xf32>
    %232 = vector.broadcast %230 : vector<1x64xf32> to vector<16x64xf32>
    %233 = arith.mulf %232, %231 : vector<16x64xf32>
    %234 = arith.addf %202, %233 : vector<16x64xf32>
    %235 = vector.extract_strided_slice %165 {offsets = [0, 2], sizes = [16, 1], strides = [1, 1]} : vector<16x4xf32> to vector<16x1xf32>
    %236 = vector.extract_strided_slice %169 {offsets = [2, 0], sizes = [1, 16], strides = [1, 1]} : vector<4x16xf32> to vector<1x16xf32>
    %237 = vector.broadcast %235 : vector<16x1xf32> to vector<16x16xf32>
    %238 = vector.broadcast %236 : vector<1x16xf32> to vector<16x16xf32>
    %239 = arith.addf %237, %238 : vector<16x16xf32>
    %c6 = arith.constant 6 : index
    %c0_98 = arith.constant 0 : index
    %c0_99 = arith.constant 0 : index
    %240 = vector.load %arg12[%c6, %c0_98, %c0_99] : memref<16x16x16xf32, #tpu.memory_space<vmem>>, vector<1x16x16xf32>
    %241 = vector.shape_cast %240 : vector<1x16x16xf32> to vector<16x16xf32>
    %242 = arith.addf %239, %241 : vector<16x16xf32>
    %cst_100 = arith.constant 0.000000e+00 : f32
    %243 = vector.broadcast %cst_100 : f32 to vector<16x16xf32>
    %244 = arith.cmpf oge, %242, %243 : vector<16x16xf32>
    %cst_101 = arith.constant 2.000000e-01 : f32
    %245 = vector.broadcast %cst_101 : f32 to vector<16x16xf32>
    %246 = arith.mulf %245, %242 : vector<16x16xf32>
    %247 = arith.select %244, %242, %246 : vector<16x16xi1>, vector<16x16xf32>
    %cst_102 = arith.constant -1.000000e+30 : f32
    %248 = vector.broadcast %cst_102 : f32 to vector<16x16xf32>
    %249 = arith.select %2, %247, %248 : vector<16x16xi1>, vector<16x16xf32>
    %cst_103 = arith.constant dense<0xFF800000> : vector<16xf32>
    %250 = vector.multi_reduction <maximumf>, %249, %cst_103 [1] : vector<16x16xf32> to vector<16xf32>
    %251 = vector.shape_cast %250 : vector<16xf32> to vector<16x1xf32>
    %252 = vector.broadcast %251 : vector<16x1xf32> to vector<16x16xf32>
    %253 = arith.subf %249, %252 : vector<16x16xf32>
    %254 = math.exp %253 : vector<16x16xf32>
    %cst_104 = arith.constant 0.000000e+00 : f32
    %255 = vector.broadcast %cst_104 : f32 to vector<16x16xf32>
    %256 = arith.select %2, %254, %255 : vector<16x16xi1>, vector<16x16xf32>
    %cst_105 = arith.constant dense<0.000000e+00> : vector<16xf32>
    %257 = vector.multi_reduction <add>, %256, %cst_105 [1] : vector<16x16xf32> to vector<16xf32>
    %258 = vector.shape_cast %257 : vector<16xf32> to vector<16x1xf32>
    %259 = tpu.reciprocal %258 {approx = true} : vector<16x1xf32> -> vector<16x1xf32>
    %260 = vector.broadcast %259 : vector<16x1xf32> to vector<16x16xf32>
    %261 = arith.mulf %256, %260 : vector<16x16xf32>
    %262 = vector.extract_strided_slice %6 {offsets = [2, 0], sizes = [1, 64], strides = [1, 1]} : vector<4x64xf32> to vector<1x64xf32>
    %cst_106 = arith.constant dense<0.000000e+00> : vector<16x64xf32>
    %263 = tpu.matmul %261, %162, %cst_106 {dimension_numbers = #tpu.dot_dimension_numbers<[1], [0], [0], [1], [0, 0, 1, 1], [], []>} : vector<16x16xf32>, vector<16x64xf32>, vector<16x64xf32> -> vector<16x64xf32>
    %264 = vector.broadcast %262 : vector<1x64xf32> to vector<16x64xf32>
    %265 = arith.mulf %264, %263 : vector<16x64xf32>
    %266 = arith.addf %234, %265 : vector<16x64xf32>
    %267 = vector.extract_strided_slice %165 {offsets = [0, 3], sizes = [16, 1], strides = [1, 1]} : vector<16x4xf32> to vector<16x1xf32>
    %268 = vector.extract_strided_slice %169 {offsets = [3, 0], sizes = [1, 16], strides = [1, 1]} : vector<4x16xf32> to vector<1x16xf32>
    %269 = vector.broadcast %267 : vector<16x1xf32> to vector<16x16xf32>
    %270 = vector.broadcast %268 : vector<1x16xf32> to vector<16x16xf32>
    %271 = arith.addf %269, %270 : vector<16x16xf32>
    %c7 = arith.constant 7 : index
    %c0_107 = arith.constant 0 : index
    %c0_108 = arith.constant 0 : index
    %272 = vector.load %arg12[%c7, %c0_107, %c0_108] : memref<16x16x16xf32, #tpu.memory_space<vmem>>, vector<1x16x16xf32>
    %273 = vector.shape_cast %272 : vector<1x16x16xf32> to vector<16x16xf32>
    %274 = arith.addf %271, %273 : vector<16x16xf32>
    %cst_109 = arith.constant 0.000000e+00 : f32
    %275 = vector.broadcast %cst_109 : f32 to vector<16x16xf32>
    %276 = arith.cmpf oge, %274, %275 : vector<16x16xf32>
    %cst_110 = arith.constant 2.000000e-01 : f32
    %277 = vector.broadcast %cst_110 : f32 to vector<16x16xf32>
    %278 = arith.mulf %277, %274 : vector<16x16xf32>
    %279 = arith.select %276, %274, %278 : vector<16x16xi1>, vector<16x16xf32>
    %cst_111 = arith.constant -1.000000e+30 : f32
    %280 = vector.broadcast %cst_111 : f32 to vector<16x16xf32>
    %281 = arith.select %2, %279, %280 : vector<16x16xi1>, vector<16x16xf32>
    %cst_112 = arith.constant dense<0xFF800000> : vector<16xf32>
    %282 = vector.multi_reduction <maximumf>, %281, %cst_112 [1] : vector<16x16xf32> to vector<16xf32>
    %283 = vector.shape_cast %282 : vector<16xf32> to vector<16x1xf32>
    %284 = vector.broadcast %283 : vector<16x1xf32> to vector<16x16xf32>
    %285 = arith.subf %281, %284 : vector<16x16xf32>
    %286 = math.exp %285 : vector<16x16xf32>
    %cst_113 = arith.constant 0.000000e+00 : f32
    %287 = vector.broadcast %cst_113 : f32 to vector<16x16xf32>
    %288 = arith.select %2, %286, %287 : vector<16x16xi1>, vector<16x16xf32>
    %cst_114 = arith.constant dense<0.000000e+00> : vector<16xf32>
    %289 = vector.multi_reduction <add>, %288, %cst_114 [1] : vector<16x16xf32> to vector<16xf32>
    %290 = vector.shape_cast %289 : vector<16xf32> to vector<16x1xf32>
    %291 = tpu.reciprocal %290 {approx = true} : vector<16x1xf32> -> vector<16x1xf32>
    %292 = vector.broadcast %291 : vector<16x1xf32> to vector<16x16xf32>
    %293 = arith.mulf %288, %292 : vector<16x16xf32>
    %294 = vector.extract_strided_slice %6 {offsets = [3, 0], sizes = [1, 64], strides = [1, 1]} : vector<4x64xf32> to vector<1x64xf32>
    %cst_115 = arith.constant dense<0.000000e+00> : vector<16x64xf32>
    %295 = tpu.matmul %293, %162, %cst_115 {dimension_numbers = #tpu.dot_dimension_numbers<[1], [0], [0], [1], [0, 0, 1, 1], [], []>} : vector<16x16xf32>, vector<16x64xf32>, vector<16x64xf32> -> vector<16x64xf32>
    %296 = vector.broadcast %294 : vector<1x64xf32> to vector<16x64xf32>
    %297 = arith.mulf %296, %295 : vector<16x64xf32>
    %298 = arith.addf %266, %297 : vector<16x64xf32>
    %c1_116 = arith.constant 1 : index
    %c0_117 = arith.constant 0 : index
    %c0_118 = arith.constant 0 : index
    %299 = vector.load %arg11[%c1_116, %c0_117, %c0_118] : memref<4x1x64xf32, #tpu.memory_space<vmem>>, vector<1x1x64xf32>
    %300 = vector.shape_cast %299 : vector<1x1x64xf32> to vector<1x64xf32>
    %301 = vector.broadcast %300 : vector<1x64xf32> to vector<16x64xf32>
    %302 = arith.addf %298, %301 : vector<16x64xf32>
    %cst_119 = arith.constant 0.000000e+00 : f32
    %303 = vector.broadcast %cst_119 : f32 to vector<16x64xf32>
    %304 = arith.cmpf oge, %302, %303 : vector<16x64xf32>
    %cst_120 = arith.constant 0.00999999977 : f32
    %305 = vector.broadcast %cst_120 : f32 to vector<16x64xf32>
    %306 = arith.mulf %305, %302 : vector<16x64xf32>
    %307 = arith.select %304, %302, %306 : vector<16x64xi1>, vector<16x64xf32>
    %c1_121 = arith.constant 1 : index
    %c0_122 = arith.constant 0 : index
    %c0_123 = arith.constant 0 : index
    %308 = vector.load %arg8[%c1_121, %c0_122, %c0_123] : memref<3x64x64xf32, #tpu.memory_space<vmem>>, vector<1x64x64xf32>
    %309 = vector.shape_cast %308 : vector<1x64x64xf32> to vector<64x64xf32>
    %cst_124 = arith.constant dense<0.000000e+00> : vector<16x64xf32>
    %310 = tpu.matmul %307, %309, %cst_124 {dimension_numbers = #tpu.dot_dimension_numbers<[1], [0], [0], [1], [0, 0, 1, 1], [], []>} : vector<16x64xf32>, vector<64x64xf32>, vector<16x64xf32> -> vector<16x64xf32>
    %c2_125 = arith.constant 2 : index
    %c0_126 = arith.constant 0 : index
    %c0_127 = arith.constant 0 : index
    %311 = vector.load %arg10[%c2_125, %c0_126, %c0_127] : memref<4x64x4xf32, #tpu.memory_space<vmem>>, vector<1x64x4xf32>
    %312 = vector.shape_cast %311 : vector<1x64x4xf32> to vector<64x4xf32>
    %cst_128 = arith.constant dense<0.000000e+00> : vector<16x4xf32>
    %313 = tpu.matmul %310, %312, %cst_128 {dimension_numbers = #tpu.dot_dimension_numbers<[1], [0], [0], [1], [0, 0, 1, 1], [], []>} : vector<16x64xf32>, vector<64x4xf32>, vector<16x4xf32> -> vector<16x4xf32>
    %c2_129 = arith.constant 2 : index
    %c0_130 = arith.constant 0 : index
    %c0_131 = arith.constant 0 : index
    %314 = vector.load %arg9[%c2_129, %c0_130, %c0_131] : memref<4x64x4xf32, #tpu.memory_space<vmem>>, vector<1x64x4xf32>
    %315 = vector.shape_cast %314 : vector<1x64x4xf32> to vector<64x4xf32>
    %cst_132 = arith.constant dense<0.000000e+00> : vector<16x4xf32>
    %316 = tpu.matmul %310, %315, %cst_132 {dimension_numbers = #tpu.dot_dimension_numbers<[1], [0], [0], [1], [0, 0, 1, 1], [], []>} : vector<16x64xf32>, vector<64x4xf32>, vector<16x4xf32> -> vector<16x4xf32>
    %317 = tpu.transpose %316, [1, 0] : vector<16x4xf32> -> vector<4x16xf32>
    %cst_133 = arith.constant 0.000000e+00 : f32
    %318 = vector.broadcast %cst_133 : f32 to vector<16x64xf32>
    %319 = vector.extract_strided_slice %313 {offsets = [0, 0], sizes = [16, 1], strides = [1, 1]} : vector<16x4xf32> to vector<16x1xf32>
    %320 = vector.extract_strided_slice %317 {offsets = [0, 0], sizes = [1, 16], strides = [1, 1]} : vector<4x16xf32> to vector<1x16xf32>
    %321 = vector.broadcast %319 : vector<16x1xf32> to vector<16x16xf32>
    %322 = vector.broadcast %320 : vector<1x16xf32> to vector<16x16xf32>
    %323 = arith.addf %321, %322 : vector<16x16xf32>
    %c8 = arith.constant 8 : index
    %c0_134 = arith.constant 0 : index
    %c0_135 = arith.constant 0 : index
    %324 = vector.load %arg12[%c8, %c0_134, %c0_135] : memref<16x16x16xf32, #tpu.memory_space<vmem>>, vector<1x16x16xf32>
    %325 = vector.shape_cast %324 : vector<1x16x16xf32> to vector<16x16xf32>
    %326 = arith.addf %323, %325 : vector<16x16xf32>
    %cst_136 = arith.constant 0.000000e+00 : f32
    %327 = vector.broadcast %cst_136 : f32 to vector<16x16xf32>
    %328 = arith.cmpf oge, %326, %327 : vector<16x16xf32>
    %cst_137 = arith.constant 2.000000e-01 : f32
    %329 = vector.broadcast %cst_137 : f32 to vector<16x16xf32>
    %330 = arith.mulf %329, %326 : vector<16x16xf32>
    %331 = arith.select %328, %326, %330 : vector<16x16xi1>, vector<16x16xf32>
    %cst_138 = arith.constant -1.000000e+30 : f32
    %332 = vector.broadcast %cst_138 : f32 to vector<16x16xf32>
    %333 = arith.select %2, %331, %332 : vector<16x16xi1>, vector<16x16xf32>
    %cst_139 = arith.constant dense<0xFF800000> : vector<16xf32>
    %334 = vector.multi_reduction <maximumf>, %333, %cst_139 [1] : vector<16x16xf32> to vector<16xf32>
    %335 = vector.shape_cast %334 : vector<16xf32> to vector<16x1xf32>
    %336 = vector.broadcast %335 : vector<16x1xf32> to vector<16x16xf32>
    %337 = arith.subf %333, %336 : vector<16x16xf32>
    %338 = math.exp %337 : vector<16x16xf32>
    %cst_140 = arith.constant 0.000000e+00 : f32
    %339 = vector.broadcast %cst_140 : f32 to vector<16x16xf32>
    %340 = arith.select %2, %338, %339 : vector<16x16xi1>, vector<16x16xf32>
    %cst_141 = arith.constant dense<0.000000e+00> : vector<16xf32>
    %341 = vector.multi_reduction <add>, %340, %cst_141 [1] : vector<16x16xf32> to vector<16xf32>
    %342 = vector.shape_cast %341 : vector<16xf32> to vector<16x1xf32>
    %343 = tpu.reciprocal %342 {approx = true} : vector<16x1xf32> -> vector<16x1xf32>
    %344 = vector.broadcast %343 : vector<16x1xf32> to vector<16x16xf32>
    %345 = arith.mulf %340, %344 : vector<16x16xf32>
    %346 = vector.extract_strided_slice %6 {offsets = [0, 0], sizes = [1, 64], strides = [1, 1]} : vector<4x64xf32> to vector<1x64xf32>
    %cst_142 = arith.constant dense<0.000000e+00> : vector<16x64xf32>
    %347 = tpu.matmul %345, %310, %cst_142 {dimension_numbers = #tpu.dot_dimension_numbers<[1], [0], [0], [1], [0, 0, 1, 1], [], []>} : vector<16x16xf32>, vector<16x64xf32>, vector<16x64xf32> -> vector<16x64xf32>
    %348 = vector.broadcast %346 : vector<1x64xf32> to vector<16x64xf32>
    %349 = arith.mulf %348, %347 : vector<16x64xf32>
    %350 = arith.addf %318, %349 : vector<16x64xf32>
    %351 = vector.extract_strided_slice %313 {offsets = [0, 1], sizes = [16, 1], strides = [1, 1]} : vector<16x4xf32> to vector<16x1xf32>
    %352 = vector.extract_strided_slice %317 {offsets = [1, 0], sizes = [1, 16], strides = [1, 1]} : vector<4x16xf32> to vector<1x16xf32>
    %353 = vector.broadcast %351 : vector<16x1xf32> to vector<16x16xf32>
    %354 = vector.broadcast %352 : vector<1x16xf32> to vector<16x16xf32>
    %355 = arith.addf %353, %354 : vector<16x16xf32>
    %c9 = arith.constant 9 : index
    %c0_143 = arith.constant 0 : index
    %c0_144 = arith.constant 0 : index
    %356 = vector.load %arg12[%c9, %c0_143, %c0_144] : memref<16x16x16xf32, #tpu.memory_space<vmem>>, vector<1x16x16xf32>
    %357 = vector.shape_cast %356 : vector<1x16x16xf32> to vector<16x16xf32>
    %358 = arith.addf %355, %357 : vector<16x16xf32>
    %cst_145 = arith.constant 0.000000e+00 : f32
    %359 = vector.broadcast %cst_145 : f32 to vector<16x16xf32>
    %360 = arith.cmpf oge, %358, %359 : vector<16x16xf32>
    %cst_146 = arith.constant 2.000000e-01 : f32
    %361 = vector.broadcast %cst_146 : f32 to vector<16x16xf32>
    %362 = arith.mulf %361, %358 : vector<16x16xf32>
    %363 = arith.select %360, %358, %362 : vector<16x16xi1>, vector<16x16xf32>
    %cst_147 = arith.constant -1.000000e+30 : f32
    %364 = vector.broadcast %cst_147 : f32 to vector<16x16xf32>
    %365 = arith.select %2, %363, %364 : vector<16x16xi1>, vector<16x16xf32>
    %cst_148 = arith.constant dense<0xFF800000> : vector<16xf32>
    %366 = vector.multi_reduction <maximumf>, %365, %cst_148 [1] : vector<16x16xf32> to vector<16xf32>
    %367 = vector.shape_cast %366 : vector<16xf32> to vector<16x1xf32>
    %368 = vector.broadcast %367 : vector<16x1xf32> to vector<16x16xf32>
    %369 = arith.subf %365, %368 : vector<16x16xf32>
    %370 = math.exp %369 : vector<16x16xf32>
    %cst_149 = arith.constant 0.000000e+00 : f32
    %371 = vector.broadcast %cst_149 : f32 to vector<16x16xf32>
    %372 = arith.select %2, %370, %371 : vector<16x16xi1>, vector<16x16xf32>
    %cst_150 = arith.constant dense<0.000000e+00> : vector<16xf32>
    %373 = vector.multi_reduction <add>, %372, %cst_150 [1] : vector<16x16xf32> to vector<16xf32>
    %374 = vector.shape_cast %373 : vector<16xf32> to vector<16x1xf32>
    %375 = tpu.reciprocal %374 {approx = true} : vector<16x1xf32> -> vector<16x1xf32>
    %376 = vector.broadcast %375 : vector<16x1xf32> to vector<16x16xf32>
    %377 = arith.mulf %372, %376 : vector<16x16xf32>
    %378 = vector.extract_strided_slice %6 {offsets = [1, 0], sizes = [1, 64], strides = [1, 1]} : vector<4x64xf32> to vector<1x64xf32>
    %cst_151 = arith.constant dense<0.000000e+00> : vector<16x64xf32>
    %379 = tpu.matmul %377, %310, %cst_151 {dimension_numbers = #tpu.dot_dimension_numbers<[1], [0], [0], [1], [0, 0, 1, 1], [], []>} : vector<16x16xf32>, vector<16x64xf32>, vector<16x64xf32> -> vector<16x64xf32>
    %380 = vector.broadcast %378 : vector<1x64xf32> to vector<16x64xf32>
    %381 = arith.mulf %380, %379 : vector<16x64xf32>
    %382 = arith.addf %350, %381 : vector<16x64xf32>
    %383 = vector.extract_strided_slice %313 {offsets = [0, 2], sizes = [16, 1], strides = [1, 1]} : vector<16x4xf32> to vector<16x1xf32>
    %384 = vector.extract_strided_slice %317 {offsets = [2, 0], sizes = [1, 16], strides = [1, 1]} : vector<4x16xf32> to vector<1x16xf32>
    %385 = vector.broadcast %383 : vector<16x1xf32> to vector<16x16xf32>
    %386 = vector.broadcast %384 : vector<1x16xf32> to vector<16x16xf32>
    %387 = arith.addf %385, %386 : vector<16x16xf32>
    %c10 = arith.constant 10 : index
    %c0_152 = arith.constant 0 : index
    %c0_153 = arith.constant 0 : index
    %388 = vector.load %arg12[%c10, %c0_152, %c0_153] : memref<16x16x16xf32, #tpu.memory_space<vmem>>, vector<1x16x16xf32>
    %389 = vector.shape_cast %388 : vector<1x16x16xf32> to vector<16x16xf32>
    %390 = arith.addf %387, %389 : vector<16x16xf32>
    %cst_154 = arith.constant 0.000000e+00 : f32
    %391 = vector.broadcast %cst_154 : f32 to vector<16x16xf32>
    %392 = arith.cmpf oge, %390, %391 : vector<16x16xf32>
    %cst_155 = arith.constant 2.000000e-01 : f32
    %393 = vector.broadcast %cst_155 : f32 to vector<16x16xf32>
    %394 = arith.mulf %393, %390 : vector<16x16xf32>
    %395 = arith.select %392, %390, %394 : vector<16x16xi1>, vector<16x16xf32>
    %cst_156 = arith.constant -1.000000e+30 : f32
    %396 = vector.broadcast %cst_156 : f32 to vector<16x16xf32>
    %397 = arith.select %2, %395, %396 : vector<16x16xi1>, vector<16x16xf32>
    %cst_157 = arith.constant dense<0xFF800000> : vector<16xf32>
    %398 = vector.multi_reduction <maximumf>, %397, %cst_157 [1] : vector<16x16xf32> to vector<16xf32>
    %399 = vector.shape_cast %398 : vector<16xf32> to vector<16x1xf32>
    %400 = vector.broadcast %399 : vector<16x1xf32> to vector<16x16xf32>
    %401 = arith.subf %397, %400 : vector<16x16xf32>
    %402 = math.exp %401 : vector<16x16xf32>
    %cst_158 = arith.constant 0.000000e+00 : f32
    %403 = vector.broadcast %cst_158 : f32 to vector<16x16xf32>
    %404 = arith.select %2, %402, %403 : vector<16x16xi1>, vector<16x16xf32>
    %cst_159 = arith.constant dense<0.000000e+00> : vector<16xf32>
    %405 = vector.multi_reduction <add>, %404, %cst_159 [1] : vector<16x16xf32> to vector<16xf32>
    %406 = vector.shape_cast %405 : vector<16xf32> to vector<16x1xf32>
    %407 = tpu.reciprocal %406 {approx = true} : vector<16x1xf32> -> vector<16x1xf32>
    %408 = vector.broadcast %407 : vector<16x1xf32> to vector<16x16xf32>
    %409 = arith.mulf %404, %408 : vector<16x16xf32>
    %410 = vector.extract_strided_slice %6 {offsets = [2, 0], sizes = [1, 64], strides = [1, 1]} : vector<4x64xf32> to vector<1x64xf32>
    %cst_160 = arith.constant dense<0.000000e+00> : vector<16x64xf32>
    %411 = tpu.matmul %409, %310, %cst_160 {dimension_numbers = #tpu.dot_dimension_numbers<[1], [0], [0], [1], [0, 0, 1, 1], [], []>} : vector<16x16xf32>, vector<16x64xf32>, vector<16x64xf32> -> vector<16x64xf32>
    %412 = vector.broadcast %410 : vector<1x64xf32> to vector<16x64xf32>
    %413 = arith.mulf %412, %411 : vector<16x64xf32>
    %414 = arith.addf %382, %413 : vector<16x64xf32>
    %415 = vector.extract_strided_slice %313 {offsets = [0, 3], sizes = [16, 1], strides = [1, 1]} : vector<16x4xf32> to vector<16x1xf32>
    %416 = vector.extract_strided_slice %317 {offsets = [3, 0], sizes = [1, 16], strides = [1, 1]} : vector<4x16xf32> to vector<1x16xf32>
    %417 = vector.broadcast %415 : vector<16x1xf32> to vector<16x16xf32>
    %418 = vector.broadcast %416 : vector<1x16xf32> to vector<16x16xf32>
    %419 = arith.addf %417, %418 : vector<16x16xf32>
    %c11 = arith.constant 11 : index
    %c0_161 = arith.constant 0 : index
    %c0_162 = arith.constant 0 : index
    %420 = vector.load %arg12[%c11, %c0_161, %c0_162] : memref<16x16x16xf32, #tpu.memory_space<vmem>>, vector<1x16x16xf32>
    %421 = vector.shape_cast %420 : vector<1x16x16xf32> to vector<16x16xf32>
    %422 = arith.addf %419, %421 : vector<16x16xf32>
    %cst_163 = arith.constant 0.000000e+00 : f32
    %423 = vector.broadcast %cst_163 : f32 to vector<16x16xf32>
    %424 = arith.cmpf oge, %422, %423 : vector<16x16xf32>
    %cst_164 = arith.constant 2.000000e-01 : f32
    %425 = vector.broadcast %cst_164 : f32 to vector<16x16xf32>
    %426 = arith.mulf %425, %422 : vector<16x16xf32>
    %427 = arith.select %424, %422, %426 : vector<16x16xi1>, vector<16x16xf32>
    %cst_165 = arith.constant -1.000000e+30 : f32
    %428 = vector.broadcast %cst_165 : f32 to vector<16x16xf32>
    %429 = arith.select %2, %427, %428 : vector<16x16xi1>, vector<16x16xf32>
    %cst_166 = arith.constant dense<0xFF800000> : vector<16xf32>
    %430 = vector.multi_reduction <maximumf>, %429, %cst_166 [1] : vector<16x16xf32> to vector<16xf32>
    %431 = vector.shape_cast %430 : vector<16xf32> to vector<16x1xf32>
    %432 = vector.broadcast %431 : vector<16x1xf32> to vector<16x16xf32>
    %433 = arith.subf %429, %432 : vector<16x16xf32>
    %434 = math.exp %433 : vector<16x16xf32>
    %cst_167 = arith.constant 0.000000e+00 : f32
    %435 = vector.broadcast %cst_167 : f32 to vector<16x16xf32>
    %436 = arith.select %2, %434, %435 : vector<16x16xi1>, vector<16x16xf32>
    %cst_168 = arith.constant dense<0.000000e+00> : vector<16xf32>
    %437 = vector.multi_reduction <add>, %436, %cst_168 [1] : vector<16x16xf32> to vector<16xf32>
    %438 = vector.shape_cast %437 : vector<16xf32> to vector<16x1xf32>
    %439 = tpu.reciprocal %438 {approx = true} : vector<16x1xf32> -> vector<16x1xf32>
    %440 = vector.broadcast %439 : vector<16x1xf32> to vector<16x16xf32>
    %441 = arith.mulf %436, %440 : vector<16x16xf32>
    %442 = vector.extract_strided_slice %6 {offsets = [3, 0], sizes = [1, 64], strides = [1, 1]} : vector<4x64xf32> to vector<1x64xf32>
    %cst_169 = arith.constant dense<0.000000e+00> : vector<16x64xf32>
    %443 = tpu.matmul %441, %310, %cst_169 {dimension_numbers = #tpu.dot_dimension_numbers<[1], [0], [0], [1], [0, 0, 1, 1], [], []>} : vector<16x16xf32>, vector<16x64xf32>, vector<16x64xf32> -> vector<16x64xf32>
    %444 = vector.broadcast %442 : vector<1x64xf32> to vector<16x64xf32>
    %445 = arith.mulf %444, %443 : vector<16x64xf32>
    %446 = arith.addf %414, %445 : vector<16x64xf32>
    %c2_170 = arith.constant 2 : index
    %c0_171 = arith.constant 0 : index
    %c0_172 = arith.constant 0 : index
    %447 = vector.load %arg11[%c2_170, %c0_171, %c0_172] : memref<4x1x64xf32, #tpu.memory_space<vmem>>, vector<1x1x64xf32>
    %448 = vector.shape_cast %447 : vector<1x1x64xf32> to vector<1x64xf32>
    %449 = vector.broadcast %448 : vector<1x64xf32> to vector<16x64xf32>
    %450 = arith.addf %446, %449 : vector<16x64xf32>
    %cst_173 = arith.constant 0.000000e+00 : f32
    %451 = vector.broadcast %cst_173 : f32 to vector<16x64xf32>
    %452 = arith.cmpf oge, %450, %451 : vector<16x64xf32>
    %cst_174 = arith.constant 0.00999999977 : f32
    %453 = vector.broadcast %cst_174 : f32 to vector<16x64xf32>
    %454 = arith.mulf %453, %450 : vector<16x64xf32>
    %455 = arith.select %452, %450, %454 : vector<16x64xi1>, vector<16x64xf32>
    %c2_175 = arith.constant 2 : index
    %c0_176 = arith.constant 0 : index
    %c0_177 = arith.constant 0 : index
    %456 = vector.load %arg8[%c2_175, %c0_176, %c0_177] : memref<3x64x64xf32, #tpu.memory_space<vmem>>, vector<1x64x64xf32>
    %457 = vector.shape_cast %456 : vector<1x64x64xf32> to vector<64x64xf32>
    %cst_178 = arith.constant dense<0.000000e+00> : vector<16x64xf32>
    %458 = tpu.matmul %455, %457, %cst_178 {dimension_numbers = #tpu.dot_dimension_numbers<[1], [0], [0], [1], [0, 0, 1, 1], [], []>} : vector<16x64xf32>, vector<64x64xf32>, vector<16x64xf32> -> vector<16x64xf32>
    %c3_179 = arith.constant 3 : index
    %c0_180 = arith.constant 0 : index
    %c0_181 = arith.constant 0 : index
    %459 = vector.load %arg10[%c3_179, %c0_180, %c0_181] : memref<4x64x4xf32, #tpu.memory_space<vmem>>, vector<1x64x4xf32>
    %460 = vector.shape_cast %459 : vector<1x64x4xf32> to vector<64x4xf32>
    %cst_182 = arith.constant dense<0.000000e+00> : vector<16x4xf32>
    %461 = tpu.matmul %458, %460, %cst_182 {dimension_numbers = #tpu.dot_dimension_numbers<[1], [0], [0], [1], [0, 0, 1, 1], [], []>} : vector<16x64xf32>, vector<64x4xf32>, vector<16x4xf32> -> vector<16x4xf32>
    %c3_183 = arith.constant 3 : index
    %c0_184 = arith.constant 0 : index
    %c0_185 = arith.constant 0 : index
    %462 = vector.load %arg9[%c3_183, %c0_184, %c0_185] : memref<4x64x4xf32, #tpu.memory_space<vmem>>, vector<1x64x4xf32>
    %463 = vector.shape_cast %462 : vector<1x64x4xf32> to vector<64x4xf32>
    %cst_186 = arith.constant dense<0.000000e+00> : vector<16x4xf32>
    %464 = tpu.matmul %458, %463, %cst_186 {dimension_numbers = #tpu.dot_dimension_numbers<[1], [0], [0], [1], [0, 0, 1, 1], [], []>} : vector<16x64xf32>, vector<64x4xf32>, vector<16x4xf32> -> vector<16x4xf32>
    %465 = tpu.transpose %464, [1, 0] : vector<16x4xf32> -> vector<4x16xf32>
    %cst_187 = arith.constant 0.000000e+00 : f32
    %466 = vector.broadcast %cst_187 : f32 to vector<16x64xf32>
    %467 = vector.extract_strided_slice %461 {offsets = [0, 0], sizes = [16, 1], strides = [1, 1]} : vector<16x4xf32> to vector<16x1xf32>
    %468 = vector.extract_strided_slice %465 {offsets = [0, 0], sizes = [1, 16], strides = [1, 1]} : vector<4x16xf32> to vector<1x16xf32>
    %469 = vector.broadcast %467 : vector<16x1xf32> to vector<16x16xf32>
    %470 = vector.broadcast %468 : vector<1x16xf32> to vector<16x16xf32>
    %471 = arith.addf %469, %470 : vector<16x16xf32>
    %c12 = arith.constant 12 : index
    %c0_188 = arith.constant 0 : index
    %c0_189 = arith.constant 0 : index
    %472 = vector.load %arg12[%c12, %c0_188, %c0_189] : memref<16x16x16xf32, #tpu.memory_space<vmem>>, vector<1x16x16xf32>
    %473 = vector.shape_cast %472 : vector<1x16x16xf32> to vector<16x16xf32>
    %474 = arith.addf %471, %473 : vector<16x16xf32>
    %cst_190 = arith.constant 0.000000e+00 : f32
    %475 = vector.broadcast %cst_190 : f32 to vector<16x16xf32>
    %476 = arith.cmpf oge, %474, %475 : vector<16x16xf32>
    %cst_191 = arith.constant 2.000000e-01 : f32
    %477 = vector.broadcast %cst_191 : f32 to vector<16x16xf32>
    %478 = arith.mulf %477, %474 : vector<16x16xf32>
    %479 = arith.select %476, %474, %478 : vector<16x16xi1>, vector<16x16xf32>
    %cst_192 = arith.constant -1.000000e+30 : f32
    %480 = vector.broadcast %cst_192 : f32 to vector<16x16xf32>
    %481 = arith.select %2, %479, %480 : vector<16x16xi1>, vector<16x16xf32>
    %cst_193 = arith.constant dense<0xFF800000> : vector<16xf32>
    %482 = vector.multi_reduction <maximumf>, %481, %cst_193 [1] : vector<16x16xf32> to vector<16xf32>
    %483 = vector.shape_cast %482 : vector<16xf32> to vector<16x1xf32>
    %484 = vector.broadcast %483 : vector<16x1xf32> to vector<16x16xf32>
    %485 = arith.subf %481, %484 : vector<16x16xf32>
    %486 = math.exp %485 : vector<16x16xf32>
    %cst_194 = arith.constant 0.000000e+00 : f32
    %487 = vector.broadcast %cst_194 : f32 to vector<16x16xf32>
    %488 = arith.select %2, %486, %487 : vector<16x16xi1>, vector<16x16xf32>
    %cst_195 = arith.constant dense<0.000000e+00> : vector<16xf32>
    %489 = vector.multi_reduction <add>, %488, %cst_195 [1] : vector<16x16xf32> to vector<16xf32>
    %490 = vector.shape_cast %489 : vector<16xf32> to vector<16x1xf32>
    %491 = tpu.reciprocal %490 {approx = true} : vector<16x1xf32> -> vector<16x1xf32>
    %492 = vector.broadcast %491 : vector<16x1xf32> to vector<16x16xf32>
    %493 = arith.mulf %488, %492 : vector<16x16xf32>
    %494 = vector.extract_strided_slice %6 {offsets = [0, 0], sizes = [1, 64], strides = [1, 1]} : vector<4x64xf32> to vector<1x64xf32>
    %cst_196 = arith.constant dense<0.000000e+00> : vector<16x64xf32>
    %495 = tpu.matmul %493, %458, %cst_196 {dimension_numbers = #tpu.dot_dimension_numbers<[1], [0], [0], [1], [0, 0, 1, 1], [], []>} : vector<16x16xf32>, vector<16x64xf32>, vector<16x64xf32> -> vector<16x64xf32>
    %496 = vector.broadcast %494 : vector<1x64xf32> to vector<16x64xf32>
    %497 = arith.mulf %496, %495 : vector<16x64xf32>
    %498 = arith.addf %466, %497 : vector<16x64xf32>
    %499 = vector.extract_strided_slice %461 {offsets = [0, 1], sizes = [16, 1], strides = [1, 1]} : vector<16x4xf32> to vector<16x1xf32>
    %500 = vector.extract_strided_slice %465 {offsets = [1, 0], sizes = [1, 16], strides = [1, 1]} : vector<4x16xf32> to vector<1x16xf32>
    %501 = vector.broadcast %499 : vector<16x1xf32> to vector<16x16xf32>
    %502 = vector.broadcast %500 : vector<1x16xf32> to vector<16x16xf32>
    %503 = arith.addf %501, %502 : vector<16x16xf32>
    %c13 = arith.constant 13 : index
    %c0_197 = arith.constant 0 : index
    %c0_198 = arith.constant 0 : index
    %504 = vector.load %arg12[%c13, %c0_197, %c0_198] : memref<16x16x16xf32, #tpu.memory_space<vmem>>, vector<1x16x16xf32>
    %505 = vector.shape_cast %504 : vector<1x16x16xf32> to vector<16x16xf32>
    %506 = arith.addf %503, %505 : vector<16x16xf32>
    %cst_199 = arith.constant 0.000000e+00 : f32
    %507 = vector.broadcast %cst_199 : f32 to vector<16x16xf32>
    %508 = arith.cmpf oge, %506, %507 : vector<16x16xf32>
    %cst_200 = arith.constant 2.000000e-01 : f32
    %509 = vector.broadcast %cst_200 : f32 to vector<16x16xf32>
    %510 = arith.mulf %509, %506 : vector<16x16xf32>
    %511 = arith.select %508, %506, %510 : vector<16x16xi1>, vector<16x16xf32>
    %cst_201 = arith.constant -1.000000e+30 : f32
    %512 = vector.broadcast %cst_201 : f32 to vector<16x16xf32>
    %513 = arith.select %2, %511, %512 : vector<16x16xi1>, vector<16x16xf32>
    %cst_202 = arith.constant dense<0xFF800000> : vector<16xf32>
    %514 = vector.multi_reduction <maximumf>, %513, %cst_202 [1] : vector<16x16xf32> to vector<16xf32>
    %515 = vector.shape_cast %514 : vector<16xf32> to vector<16x1xf32>
    %516 = vector.broadcast %515 : vector<16x1xf32> to vector<16x16xf32>
    %517 = arith.subf %513, %516 : vector<16x16xf32>
    %518 = math.exp %517 : vector<16x16xf32>
    %cst_203 = arith.constant 0.000000e+00 : f32
    %519 = vector.broadcast %cst_203 : f32 to vector<16x16xf32>
    %520 = arith.select %2, %518, %519 : vector<16x16xi1>, vector<16x16xf32>
    %cst_204 = arith.constant dense<0.000000e+00> : vector<16xf32>
    %521 = vector.multi_reduction <add>, %520, %cst_204 [1] : vector<16x16xf32> to vector<16xf32>
    %522 = vector.shape_cast %521 : vector<16xf32> to vector<16x1xf32>
    %523 = tpu.reciprocal %522 {approx = true} : vector<16x1xf32> -> vector<16x1xf32>
    %524 = vector.broadcast %523 : vector<16x1xf32> to vector<16x16xf32>
    %525 = arith.mulf %520, %524 : vector<16x16xf32>
    %526 = vector.extract_strided_slice %6 {offsets = [1, 0], sizes = [1, 64], strides = [1, 1]} : vector<4x64xf32> to vector<1x64xf32>
    %cst_205 = arith.constant dense<0.000000e+00> : vector<16x64xf32>
    %527 = tpu.matmul %525, %458, %cst_205 {dimension_numbers = #tpu.dot_dimension_numbers<[1], [0], [0], [1], [0, 0, 1, 1], [], []>} : vector<16x16xf32>, vector<16x64xf32>, vector<16x64xf32> -> vector<16x64xf32>
    %528 = vector.broadcast %526 : vector<1x64xf32> to vector<16x64xf32>
    %529 = arith.mulf %528, %527 : vector<16x64xf32>
    %530 = arith.addf %498, %529 : vector<16x64xf32>
    %531 = vector.extract_strided_slice %461 {offsets = [0, 2], sizes = [16, 1], strides = [1, 1]} : vector<16x4xf32> to vector<16x1xf32>
    %532 = vector.extract_strided_slice %465 {offsets = [2, 0], sizes = [1, 16], strides = [1, 1]} : vector<4x16xf32> to vector<1x16xf32>
    %533 = vector.broadcast %531 : vector<16x1xf32> to vector<16x16xf32>
    %534 = vector.broadcast %532 : vector<1x16xf32> to vector<16x16xf32>
    %535 = arith.addf %533, %534 : vector<16x16xf32>
    %c14 = arith.constant 14 : index
    %c0_206 = arith.constant 0 : index
    %c0_207 = arith.constant 0 : index
    %536 = vector.load %arg12[%c14, %c0_206, %c0_207] : memref<16x16x16xf32, #tpu.memory_space<vmem>>, vector<1x16x16xf32>
    %537 = vector.shape_cast %536 : vector<1x16x16xf32> to vector<16x16xf32>
    %538 = arith.addf %535, %537 : vector<16x16xf32>
    %cst_208 = arith.constant 0.000000e+00 : f32
    %539 = vector.broadcast %cst_208 : f32 to vector<16x16xf32>
    %540 = arith.cmpf oge, %538, %539 : vector<16x16xf32>
    %cst_209 = arith.constant 2.000000e-01 : f32
    %541 = vector.broadcast %cst_209 : f32 to vector<16x16xf32>
    %542 = arith.mulf %541, %538 : vector<16x16xf32>
    %543 = arith.select %540, %538, %542 : vector<16x16xi1>, vector<16x16xf32>
    %cst_210 = arith.constant -1.000000e+30 : f32
    %544 = vector.broadcast %cst_210 : f32 to vector<16x16xf32>
    %545 = arith.select %2, %543, %544 : vector<16x16xi1>, vector<16x16xf32>
    %cst_211 = arith.constant dense<0xFF800000> : vector<16xf32>
    %546 = vector.multi_reduction <maximumf>, %545, %cst_211 [1] : vector<16x16xf32> to vector<16xf32>
    %547 = vector.shape_cast %546 : vector<16xf32> to vector<16x1xf32>
    %548 = vector.broadcast %547 : vector<16x1xf32> to vector<16x16xf32>
    %549 = arith.subf %545, %548 : vector<16x16xf32>
    %550 = math.exp %549 : vector<16x16xf32>
    %cst_212 = arith.constant 0.000000e+00 : f32
    %551 = vector.broadcast %cst_212 : f32 to vector<16x16xf32>
    %552 = arith.select %2, %550, %551 : vector<16x16xi1>, vector<16x16xf32>
    %cst_213 = arith.constant dense<0.000000e+00> : vector<16xf32>
    %553 = vector.multi_reduction <add>, %552, %cst_213 [1] : vector<16x16xf32> to vector<16xf32>
    %554 = vector.shape_cast %553 : vector<16xf32> to vector<16x1xf32>
    %555 = tpu.reciprocal %554 {approx = true} : vector<16x1xf32> -> vector<16x1xf32>
    %556 = vector.broadcast %555 : vector<16x1xf32> to vector<16x16xf32>
    %557 = arith.mulf %552, %556 : vector<16x16xf32>
    %558 = vector.extract_strided_slice %6 {offsets = [2, 0], sizes = [1, 64], strides = [1, 1]} : vector<4x64xf32> to vector<1x64xf32>
    %cst_214 = arith.constant dense<0.000000e+00> : vector<16x64xf32>
    %559 = tpu.matmul %557, %458, %cst_214 {dimension_numbers = #tpu.dot_dimension_numbers<[1], [0], [0], [1], [0, 0, 1, 1], [], []>} : vector<16x16xf32>, vector<16x64xf32>, vector<16x64xf32> -> vector<16x64xf32>
    %560 = vector.broadcast %558 : vector<1x64xf32> to vector<16x64xf32>
    %561 = arith.mulf %560, %559 : vector<16x64xf32>
    %562 = arith.addf %530, %561 : vector<16x64xf32>
    %563 = vector.extract_strided_slice %461 {offsets = [0, 3], sizes = [16, 1], strides = [1, 1]} : vector<16x4xf32> to vector<16x1xf32>
    %564 = vector.extract_strided_slice %465 {offsets = [3, 0], sizes = [1, 16], strides = [1, 1]} : vector<4x16xf32> to vector<1x16xf32>
    %565 = vector.broadcast %563 : vector<16x1xf32> to vector<16x16xf32>
    %566 = vector.broadcast %564 : vector<1x16xf32> to vector<16x16xf32>
    %567 = arith.addf %565, %566 : vector<16x16xf32>
    %c15 = arith.constant 15 : index
    %c0_215 = arith.constant 0 : index
    %c0_216 = arith.constant 0 : index
    %568 = vector.load %arg12[%c15, %c0_215, %c0_216] : memref<16x16x16xf32, #tpu.memory_space<vmem>>, vector<1x16x16xf32>
    %569 = vector.shape_cast %568 : vector<1x16x16xf32> to vector<16x16xf32>
    %570 = arith.addf %567, %569 : vector<16x16xf32>
    %cst_217 = arith.constant 0.000000e+00 : f32
    %571 = vector.broadcast %cst_217 : f32 to vector<16x16xf32>
    %572 = arith.cmpf oge, %570, %571 : vector<16x16xf32>
    %cst_218 = arith.constant 2.000000e-01 : f32
    %573 = vector.broadcast %cst_218 : f32 to vector<16x16xf32>
    %574 = arith.mulf %573, %570 : vector<16x16xf32>
    %575 = arith.select %572, %570, %574 : vector<16x16xi1>, vector<16x16xf32>
    %cst_219 = arith.constant -1.000000e+30 : f32
    %576 = vector.broadcast %cst_219 : f32 to vector<16x16xf32>
    %577 = arith.select %2, %575, %576 : vector<16x16xi1>, vector<16x16xf32>
    %cst_220 = arith.constant dense<0xFF800000> : vector<16xf32>
    %578 = vector.multi_reduction <maximumf>, %577, %cst_220 [1] : vector<16x16xf32> to vector<16xf32>
    %579 = vector.shape_cast %578 : vector<16xf32> to vector<16x1xf32>
    %580 = vector.broadcast %579 : vector<16x1xf32> to vector<16x16xf32>
    %581 = arith.subf %577, %580 : vector<16x16xf32>
    %582 = math.exp %581 : vector<16x16xf32>
    %cst_221 = arith.constant 0.000000e+00 : f32
    %583 = vector.broadcast %cst_221 : f32 to vector<16x16xf32>
    %584 = arith.select %2, %582, %583 : vector<16x16xi1>, vector<16x16xf32>
    %cst_222 = arith.constant dense<0.000000e+00> : vector<16xf32>
    %585 = vector.multi_reduction <add>, %584, %cst_222 [1] : vector<16x16xf32> to vector<16xf32>
    %586 = vector.shape_cast %585 : vector<16xf32> to vector<16x1xf32>
    %587 = tpu.reciprocal %586 {approx = true} : vector<16x1xf32> -> vector<16x1xf32>
    %588 = vector.broadcast %587 : vector<16x1xf32> to vector<16x16xf32>
    %589 = arith.mulf %584, %588 : vector<16x16xf32>
    %590 = vector.extract_strided_slice %6 {offsets = [3, 0], sizes = [1, 64], strides = [1, 1]} : vector<4x64xf32> to vector<1x64xf32>
    %cst_223 = arith.constant dense<0.000000e+00> : vector<16x64xf32>
    %591 = tpu.matmul %589, %458, %cst_223 {dimension_numbers = #tpu.dot_dimension_numbers<[1], [0], [0], [1], [0, 0, 1, 1], [], []>} : vector<16x16xf32>, vector<16x64xf32>, vector<16x64xf32> -> vector<16x64xf32>
    %592 = vector.broadcast %590 : vector<1x64xf32> to vector<16x64xf32>
    %593 = arith.mulf %592, %591 : vector<16x64xf32>
    %594 = arith.addf %562, %593 : vector<16x64xf32>
    %c3_224 = arith.constant 3 : index
    %c0_225 = arith.constant 0 : index
    %c0_226 = arith.constant 0 : index
    %595 = vector.load %arg11[%c3_224, %c0_225, %c0_226] : memref<4x1x64xf32, #tpu.memory_space<vmem>>, vector<1x1x64xf32>
    %596 = vector.shape_cast %595 : vector<1x1x64xf32> to vector<1x64xf32>
    %597 = vector.broadcast %596 : vector<1x64xf32> to vector<16x64xf32>
    %598 = arith.addf %594, %597 : vector<16x64xf32>
    %cst_227 = arith.constant 0.000000e+00 : f32
    %599 = vector.broadcast %cst_227 : f32 to vector<16x64xf32>
    %600 = arith.cmpf oge, %598, %599 : vector<16x64xf32>
    %cst_228 = arith.constant 0.00999999977 : f32
    %601 = vector.broadcast %cst_228 : f32 to vector<16x64xf32>
    %602 = arith.mulf %601, %598 : vector<16x64xf32>
    %603 = arith.select %600, %598, %602 : vector<16x64xi1>, vector<16x64xf32>
    %c0_229 = arith.constant 0 : index
    %c0_230 = arith.constant 0 : index
    %604 = vector.load %arg13[%c0_229, %c0_230] : memref<64x64xf32, #tpu.memory_space<vmem>>, vector<64x64xf32>
    %cst_231 = arith.constant dense<0.000000e+00> : vector<16x64xf32>
    %605 = tpu.matmul %603, %604, %cst_231 {dimension_numbers = #tpu.dot_dimension_numbers<[1], [0], [0], [1], [0, 0, 1, 1], [], []>} : vector<16x64xf32>, vector<64x64xf32>, vector<16x64xf32> -> vector<16x64xf32>
    %c0_232 = arith.constant 0 : index
    %c0_233 = arith.constant 0 : index
    %606 = vector.load %arg16[%c0_232, %c0_233] : memref<1x64xf32, #tpu.memory_space<vmem>>, vector<1x64xf32>
    %607 = vector.broadcast %606 : vector<1x64xf32> to vector<16x64xf32>
    %608 = arith.addf %605, %607 : vector<16x64xf32>
    %c0_234 = arith.constant 0 : index
    %c0_235 = arith.constant 0 : index
    %609 = vector.load %arg14[%c0_234, %c0_235] : memref<64x64xf32, #tpu.memory_space<vmem>>, vector<64x64xf32>
    %cst_236 = arith.constant dense<0.000000e+00> : vector<16x64xf32>
    %610 = tpu.matmul %603, %609, %cst_236 {dimension_numbers = #tpu.dot_dimension_numbers<[1], [0], [0], [1], [0, 0, 1, 1], [], []>} : vector<16x64xf32>, vector<64x64xf32>, vector<16x64xf32> -> vector<16x64xf32>
    %c0_237 = arith.constant 0 : index
    %c0_238 = arith.constant 0 : index
    %611 = vector.load %arg17[%c0_237, %c0_238] : memref<1x64xf32, #tpu.memory_space<vmem>>, vector<1x64xf32>
    %612 = vector.broadcast %611 : vector<1x64xf32> to vector<16x64xf32>
    %613 = arith.addf %610, %612 : vector<16x64xf32>
    %c0_239 = arith.constant 0 : index
    %c0_240 = arith.constant 0 : index
    %614 = vector.load %arg15[%c0_239, %c0_240] : memref<64x64xf32, #tpu.memory_space<vmem>>, vector<64x64xf32>
    %cst_241 = arith.constant dense<0.000000e+00> : vector<16x64xf32>
    %615 = tpu.matmul %603, %614, %cst_241 {dimension_numbers = #tpu.dot_dimension_numbers<[1], [0], [0], [1], [0, 0, 1, 1], [], []>} : vector<16x64xf32>, vector<64x64xf32>, vector<16x64xf32> -> vector<16x64xf32>
    %c0_242 = arith.constant 0 : index
    %c0_243 = arith.constant 0 : index
    %616 = vector.load %arg18[%c0_242, %c0_243] : memref<1x64xf32, #tpu.memory_space<vmem>>, vector<1x64xf32>
    %617 = vector.broadcast %616 : vector<1x64xf32> to vector<16x64xf32>
    %618 = arith.addf %615, %617 : vector<16x64xf32>
    %cst_244 = arith.constant 0.000000e+00 : f32
    %619 = vector.broadcast %cst_244 : f32 to vector<16x64xf32>
    %620 = vector.extract_strided_slice %608 {offsets = [0, 0], sizes = [16, 16], strides = [1, 1]} : vector<16x64xf32> to vector<16x16xf32>
    %621 = vector.extract_strided_slice %613 {offsets = [0, 0], sizes = [16, 16], strides = [1, 1]} : vector<16x64xf32> to vector<16x16xf32>
    %cst_245 = arith.constant dense<0.000000e+00> : vector<16x16xf32>
    %622 = tpu.matmul %620, %621, %cst_245 {dimension_numbers = #tpu.dot_dimension_numbers<[1], [1], [0], [0], [0, 0, 1, 0], [], []>} : vector<16x16xf32>, vector<16x16xf32>, vector<16x16xf32> -> vector<16x16xf32>
    %cst_246 = arith.constant 2.500000e-01 : f32
    %623 = vector.broadcast %cst_246 : f32 to vector<16x16xf32>
    %624 = arith.mulf %622, %623 : vector<16x16xf32>
    %cst_247 = arith.constant -1.000000e+30 : f32
    %625 = vector.broadcast %cst_247 : f32 to vector<16x16xf32>
    %626 = arith.select %5, %624, %625 : vector<16x16xi1>, vector<16x16xf32>
    %cst_248 = arith.constant dense<0xFF800000> : vector<16xf32>
    %627 = vector.multi_reduction <maximumf>, %626, %cst_248 [1] : vector<16x16xf32> to vector<16xf32>
    %628 = vector.shape_cast %627 : vector<16xf32> to vector<16x1xf32>
    %629 = vector.broadcast %628 : vector<16x1xf32> to vector<16x16xf32>
    %630 = arith.subf %626, %629 : vector<16x16xf32>
    %631 = math.exp %630 : vector<16x16xf32>
    %cst_249 = arith.constant 0.000000e+00 : f32
    %632 = vector.broadcast %cst_249 : f32 to vector<16x16xf32>
    %633 = arith.select %5, %631, %632 : vector<16x16xi1>, vector<16x16xf32>
    %cst_250 = arith.constant dense<0.000000e+00> : vector<16xf32>
    %634 = vector.multi_reduction <add>, %633, %cst_250 [1] : vector<16x16xf32> to vector<16xf32>
    %635 = vector.shape_cast %634 : vector<16xf32> to vector<16x1xf32>
    %636 = tpu.reciprocal %635 {approx = true} : vector<16x1xf32> -> vector<16x1xf32>
    %637 = vector.broadcast %636 : vector<16x1xf32> to vector<16x16xf32>
    %638 = arith.mulf %633, %637 : vector<16x16xf32>
    %639 = vector.extract_strided_slice %6 {offsets = [0, 0], sizes = [1, 64], strides = [1, 1]} : vector<4x64xf32> to vector<1x64xf32>
    %cst_251 = arith.constant dense<0.000000e+00> : vector<16x64xf32>
    %640 = tpu.matmul %638, %618, %cst_251 {dimension_numbers = #tpu.dot_dimension_numbers<[1], [0], [0], [1], [0, 0, 1, 1], [], []>} : vector<16x16xf32>, vector<16x64xf32>, vector<16x64xf32> -> vector<16x64xf32>
    %641 = vector.broadcast %639 : vector<1x64xf32> to vector<16x64xf32>
    %642 = arith.mulf %641, %640 : vector<16x64xf32>
    %643 = arith.addf %619, %642 : vector<16x64xf32>
    %644 = vector.extract_strided_slice %608 {offsets = [0, 16], sizes = [16, 16], strides = [1, 1]} : vector<16x64xf32> to vector<16x16xf32>
    %645 = vector.extract_strided_slice %613 {offsets = [0, 16], sizes = [16, 16], strides = [1, 1]} : vector<16x64xf32> to vector<16x16xf32>
    %cst_252 = arith.constant dense<0.000000e+00> : vector<16x16xf32>
    %646 = tpu.matmul %644, %645, %cst_252 {dimension_numbers = #tpu.dot_dimension_numbers<[1], [1], [0], [0], [0, 0, 1, 0], [], []>} : vector<16x16xf32>, vector<16x16xf32>, vector<16x16xf32> -> vector<16x16xf32>
    %cst_253 = arith.constant 2.500000e-01 : f32
    %647 = vector.broadcast %cst_253 : f32 to vector<16x16xf32>
    %648 = arith.mulf %646, %647 : vector<16x16xf32>
    %cst_254 = arith.constant -1.000000e+30 : f32
    %649 = vector.broadcast %cst_254 : f32 to vector<16x16xf32>
    %650 = arith.select %5, %648, %649 : vector<16x16xi1>, vector<16x16xf32>
    %cst_255 = arith.constant dense<0xFF800000> : vector<16xf32>
    %651 = vector.multi_reduction <maximumf>, %650, %cst_255 [1] : vector<16x16xf32> to vector<16xf32>
    %652 = vector.shape_cast %651 : vector<16xf32> to vector<16x1xf32>
    %653 = vector.broadcast %652 : vector<16x1xf32> to vector<16x16xf32>
    %654 = arith.subf %650, %653 : vector<16x16xf32>
    %655 = math.exp %654 : vector<16x16xf32>
    %cst_256 = arith.constant 0.000000e+00 : f32
    %656 = vector.broadcast %cst_256 : f32 to vector<16x16xf32>
    %657 = arith.select %5, %655, %656 : vector<16x16xi1>, vector<16x16xf32>
    %cst_257 = arith.constant dense<0.000000e+00> : vector<16xf32>
    %658 = vector.multi_reduction <add>, %657, %cst_257 [1] : vector<16x16xf32> to vector<16xf32>
    %659 = vector.shape_cast %658 : vector<16xf32> to vector<16x1xf32>
    %660 = tpu.reciprocal %659 {approx = true} : vector<16x1xf32> -> vector<16x1xf32>
    %661 = vector.broadcast %660 : vector<16x1xf32> to vector<16x16xf32>
    %662 = arith.mulf %657, %661 : vector<16x16xf32>
    %663 = vector.extract_strided_slice %6 {offsets = [1, 0], sizes = [1, 64], strides = [1, 1]} : vector<4x64xf32> to vector<1x64xf32>
    %cst_258 = arith.constant dense<0.000000e+00> : vector<16x64xf32>
    %664 = tpu.matmul %662, %618, %cst_258 {dimension_numbers = #tpu.dot_dimension_numbers<[1], [0], [0], [1], [0, 0, 1, 1], [], []>} : vector<16x16xf32>, vector<16x64xf32>, vector<16x64xf32> -> vector<16x64xf32>
    %665 = vector.broadcast %663 : vector<1x64xf32> to vector<16x64xf32>
    %666 = arith.mulf %665, %664 : vector<16x64xf32>
    %667 = arith.addf %643, %666 : vector<16x64xf32>
    %668 = vector.extract_strided_slice %608 {offsets = [0, 32], sizes = [16, 16], strides = [1, 1]} : vector<16x64xf32> to vector<16x16xf32>
    %669 = vector.extract_strided_slice %613 {offsets = [0, 32], sizes = [16, 16], strides = [1, 1]} : vector<16x64xf32> to vector<16x16xf32>
    %cst_259 = arith.constant dense<0.000000e+00> : vector<16x16xf32>
    %670 = tpu.matmul %668, %669, %cst_259 {dimension_numbers = #tpu.dot_dimension_numbers<[1], [1], [0], [0], [0, 0, 1, 0], [], []>} : vector<16x16xf32>, vector<16x16xf32>, vector<16x16xf32> -> vector<16x16xf32>
    %cst_260 = arith.constant 2.500000e-01 : f32
    %671 = vector.broadcast %cst_260 : f32 to vector<16x16xf32>
    %672 = arith.mulf %670, %671 : vector<16x16xf32>
    %cst_261 = arith.constant -1.000000e+30 : f32
    %673 = vector.broadcast %cst_261 : f32 to vector<16x16xf32>
    %674 = arith.select %5, %672, %673 : vector<16x16xi1>, vector<16x16xf32>
    %cst_262 = arith.constant dense<0xFF800000> : vector<16xf32>
    %675 = vector.multi_reduction <maximumf>, %674, %cst_262 [1] : vector<16x16xf32> to vector<16xf32>
    %676 = vector.shape_cast %675 : vector<16xf32> to vector<16x1xf32>
    %677 = vector.broadcast %676 : vector<16x1xf32> to vector<16x16xf32>
    %678 = arith.subf %674, %677 : vector<16x16xf32>
    %679 = math.exp %678 : vector<16x16xf32>
    %cst_263 = arith.constant 0.000000e+00 : f32
    %680 = vector.broadcast %cst_263 : f32 to vector<16x16xf32>
    %681 = arith.select %5, %679, %680 : vector<16x16xi1>, vector<16x16xf32>
    %cst_264 = arith.constant dense<0.000000e+00> : vector<16xf32>
    %682 = vector.multi_reduction <add>, %681, %cst_264 [1] : vector<16x16xf32> to vector<16xf32>
    %683 = vector.shape_cast %682 : vector<16xf32> to vector<16x1xf32>
    %684 = tpu.reciprocal %683 {approx = true} : vector<16x1xf32> -> vector<16x1xf32>
    %685 = vector.broadcast %684 : vector<16x1xf32> to vector<16x16xf32>
    %686 = arith.mulf %681, %685 : vector<16x16xf32>
    %687 = vector.extract_strided_slice %6 {offsets = [2, 0], sizes = [1, 64], strides = [1, 1]} : vector<4x64xf32> to vector<1x64xf32>
    %cst_265 = arith.constant dense<0.000000e+00> : vector<16x64xf32>
    %688 = tpu.matmul %686, %618, %cst_265 {dimension_numbers = #tpu.dot_dimension_numbers<[1], [0], [0], [1], [0, 0, 1, 1], [], []>} : vector<16x16xf32>, vector<16x64xf32>, vector<16x64xf32> -> vector<16x64xf32>
    %689 = vector.broadcast %687 : vector<1x64xf32> to vector<16x64xf32>
    %690 = arith.mulf %689, %688 : vector<16x64xf32>
    %691 = arith.addf %667, %690 : vector<16x64xf32>
    %692 = vector.extract_strided_slice %608 {offsets = [0, 48], sizes = [16, 16], strides = [1, 1]} : vector<16x64xf32> to vector<16x16xf32>
    %693 = vector.extract_strided_slice %613 {offsets = [0, 48], sizes = [16, 16], strides = [1, 1]} : vector<16x64xf32> to vector<16x16xf32>
    %cst_266 = arith.constant dense<0.000000e+00> : vector<16x16xf32>
    %694 = tpu.matmul %692, %693, %cst_266 {dimension_numbers = #tpu.dot_dimension_numbers<[1], [1], [0], [0], [0, 0, 1, 0], [], []>} : vector<16x16xf32>, vector<16x16xf32>, vector<16x16xf32> -> vector<16x16xf32>
    %cst_267 = arith.constant 2.500000e-01 : f32
    %695 = vector.broadcast %cst_267 : f32 to vector<16x16xf32>
    %696 = arith.mulf %694, %695 : vector<16x16xf32>
    %cst_268 = arith.constant -1.000000e+30 : f32
    %697 = vector.broadcast %cst_268 : f32 to vector<16x16xf32>
    %698 = arith.select %5, %696, %697 : vector<16x16xi1>, vector<16x16xf32>
    %cst_269 = arith.constant dense<0xFF800000> : vector<16xf32>
    %699 = vector.multi_reduction <maximumf>, %698, %cst_269 [1] : vector<16x16xf32> to vector<16xf32>
    %700 = vector.shape_cast %699 : vector<16xf32> to vector<16x1xf32>
    %701 = vector.broadcast %700 : vector<16x1xf32> to vector<16x16xf32>
    %702 = arith.subf %698, %701 : vector<16x16xf32>
    %703 = math.exp %702 : vector<16x16xf32>
    %cst_270 = arith.constant 0.000000e+00 : f32
    %704 = vector.broadcast %cst_270 : f32 to vector<16x16xf32>
    %705 = arith.select %5, %703, %704 : vector<16x16xi1>, vector<16x16xf32>
    %cst_271 = arith.constant dense<0.000000e+00> : vector<16xf32>
    %706 = vector.multi_reduction <add>, %705, %cst_271 [1] : vector<16x16xf32> to vector<16xf32>
    %707 = vector.shape_cast %706 : vector<16xf32> to vector<16x1xf32>
    %708 = tpu.reciprocal %707 {approx = true} : vector<16x1xf32> -> vector<16x1xf32>
    %709 = vector.broadcast %708 : vector<16x1xf32> to vector<16x16xf32>
    %710 = arith.mulf %705, %709 : vector<16x16xf32>
    %711 = vector.extract_strided_slice %6 {offsets = [3, 0], sizes = [1, 64], strides = [1, 1]} : vector<4x64xf32> to vector<1x64xf32>
    %cst_272 = arith.constant dense<0.000000e+00> : vector<16x64xf32>
    %712 = tpu.matmul %710, %618, %cst_272 {dimension_numbers = #tpu.dot_dimension_numbers<[1], [0], [0], [1], [0, 0, 1, 1], [], []>} : vector<16x16xf32>, vector<16x64xf32>, vector<16x64xf32> -> vector<16x64xf32>
    %713 = vector.broadcast %711 : vector<1x64xf32> to vector<16x64xf32>
    %714 = arith.mulf %713, %712 : vector<16x64xf32>
    %715 = arith.addf %691, %714 : vector<16x64xf32>
    %c0_273 = arith.constant 0 : index
    %c0_274 = arith.constant 0 : index
    %716 = vector.load %arg19[%c0_273, %c0_274] : memref<64x64xf32, #tpu.memory_space<vmem>>, vector<64x64xf32>
    %cst_275 = arith.constant dense<0.000000e+00> : vector<16x64xf32>
    %717 = tpu.matmul %715, %716, %cst_275 {dimension_numbers = #tpu.dot_dimension_numbers<[1], [0], [0], [1], [0, 0, 1, 1], [], []>} : vector<16x64xf32>, vector<64x64xf32>, vector<16x64xf32> -> vector<16x64xf32>
    %c0_276 = arith.constant 0 : index
    %c0_277 = arith.constant 0 : index
    %718 = vector.load %arg20[%c0_276, %c0_277] : memref<1x64xf32, #tpu.memory_space<vmem>>, vector<1x64xf32>
    %719 = vector.broadcast %718 : vector<1x64xf32> to vector<16x64xf32>
    %720 = arith.addf %717, %719 : vector<16x64xf32>
    %c0_278 = arith.constant 0 : index
    %c0_279 = arith.constant 0 : index
    %721 = vector.load %arg21[%c0_278, %c0_279] : memref<64x4xf32, #tpu.memory_space<vmem>>, vector<64x4xf32>
    %cst_280 = arith.constant dense<0.000000e+00> : vector<16x4xf32>
    %722 = tpu.matmul %720, %721, %cst_280 {dimension_numbers = #tpu.dot_dimension_numbers<[1], [0], [0], [1], [0, 0, 1, 1], [], []>} : vector<16x64xf32>, vector<64x4xf32>, vector<16x4xf32> -> vector<16x4xf32>
    %c0_281 = arith.constant 0 : index
    %c0_282 = arith.constant 0 : index
    %723 = vector.load %arg22[%c0_281, %c0_282] : memref<1x4xf32, #tpu.memory_space<vmem>>, vector<1x4xf32>
    %724 = vector.broadcast %723 : vector<1x4xf32> to vector<16x4xf32>
    %725 = arith.addf %722, %724 : vector<16x4xf32>
    %c0_283 = arith.constant 0 : index
    %c0_284 = arith.constant 0 : index
    %726 = vector.load %arg23[%c0_283, %c0_284] : memref<4x64xf32, #tpu.memory_space<vmem>>, vector<4x64xf32>
    %cst_285 = arith.constant dense<0.000000e+00> : vector<16x64xf32>
    %727 = tpu.matmul %725, %726, %cst_285 {dimension_numbers = #tpu.dot_dimension_numbers<[1], [0], [0], [1], [0, 0, 1, 1], [], []>} : vector<16x4xf32>, vector<4x64xf32>, vector<16x64xf32> -> vector<16x64xf32>
    %c0_286 = arith.constant 0 : index
    %c0_287 = arith.constant 0 : index
    %728 = vector.load %arg24[%c0_286, %c0_287] : memref<16x64xf32, #tpu.memory_space<vmem>>, vector<16x64xf32>
    %729 = arith.mulf %727, %728 : vector<16x64xf32>
    %c0_288 = arith.constant 0 : index
    %c0_289 = arith.constant 0 : index
    %730 = vector.load %arg25[%c0_288, %c0_289] : memref<64x8xf32, #tpu.memory_space<vmem>>, vector<64x8xf32>
    %cst_290 = arith.constant dense<0.000000e+00> : vector<16x8xf32>
    %731 = tpu.matmul %729, %730, %cst_290 {dimension_numbers = #tpu.dot_dimension_numbers<[1], [0], [0], [1], [0, 0, 1, 1], [], []>} : vector<16x64xf32>, vector<64x8xf32>, vector<16x8xf32> -> vector<16x8xf32>
    %c0_291 = arith.constant 0 : index
    %c0_292 = arith.constant 0 : index
    %732 = vector.load %arg26[%c0_291, %c0_292] : memref<2x16xf32, #tpu.memory_space<vmem>>, vector<2x16xf32>
    %cst_293 = arith.constant dense<0.000000e+00> : vector<2x8xf32>
    %733 = tpu.matmul %732, %731, %cst_293 {dimension_numbers = #tpu.dot_dimension_numbers<[1], [0], [0], [1], [0, 0, 1, 1], [], []>} : vector<2x16xf32>, vector<16x8xf32>, vector<2x8xf32> -> vector<2x8xf32>
    %c0_294 = arith.constant 0 : index
    %c0_295 = arith.constant 0 : index
    %734 = vector.load %arg27[%c0_294, %c0_295] : memref<1x8xf32, #tpu.memory_space<vmem>>, vector<1x8xf32>
    %735 = vector.broadcast %734 : vector<1x8xf32> to vector<2x8xf32>
    %736 = arith.addf %733, %735 : vector<2x8xf32>
    %c0_296 = arith.constant 0 : index
    %c0_297 = arith.constant 0 : index
    %737 = vector.load %arg28[%c0_296, %c0_297] : memref<2x8xf32, #tpu.memory_space<vmem>>, vector<2x8xf32>
    tpu.vector_store %arg28[%c0_296, %c0_297], %736 {strides = array<i32>} : memref<2x8xf32, #tpu.memory_space<vmem>>, vector<2x8xf32>,
    return
  }
  func.func @transform_0(%arg0: i32) -> (i32, i32) {
    %c0_i32 = arith.constant 0 : i32
    %c0_i32_0 = arith.constant 0 : i32
    %c0_i32_1 = arith.constant 0 : i32
    return %c0_i32, %c0_i32_0 : i32, i32
  }
  func.func @transform_1(%arg0: i32) -> (i32, i32) {
    %c0_i32 = arith.constant 0 : i32
    %c0_i32_0 = arith.constant 0 : i32
    %c0_i32_1 = arith.constant 0 : i32
    return %c0_i32, %c0_i32_0 : i32, i32
  }
  func.func @transform_2(%arg0: i32) -> (i32, i32) {
    %c0_i32 = arith.constant 0 : i32
    %c0_i32_0 = arith.constant 0 : i32
    %c0_i32_1 = arith.constant 0 : i32
    return %c0_i32, %c0_i32_0 : i32, i32
  }
  func.func @transform_3(%arg0: i32) -> (i32, i32) {
    %c0_i32 = arith.constant 0 : i32
    %c0_i32_0 = arith.constant 0 : i32
    %c0_i32_1 = arith.constant 0 : i32
    return %c0_i32, %c0_i32_0 : i32, i32
  }
  func.func @transform_4(%arg0: i32) -> (i32, i32) {
    %c0_i32 = arith.constant 0 : i32
    %c0_i32_0 = arith.constant 0 : i32
    %c0_i32_1 = arith.constant 0 : i32
    return %c0_i32, %c0_i32_0 : i32, i32
  }
  func.func @transform_5(%arg0: i32) -> (i32, i32) {
    %c0_i32 = arith.constant 0 : i32
    %c0_i32_0 = arith.constant 0 : i32
    %c0_i32_1 = arith.constant 0 : i32
    return %c0_i32, %c0_i32_0 : i32, i32
  }
  func.func @transform_6(%arg0: i32) -> (i32, i32) {
    %c0_i32 = arith.constant 0 : i32
    %c0_i32_0 = arith.constant 0 : i32
    %c0_i32_1 = arith.constant 0 : i32
    return %c0_i32, %c0_i32_0 : i32, i32
  }
  func.func @transform_7(%arg0: i32) -> (i32, i32, i32) {
    %c0_i32 = arith.constant 0 : i32
    %c0_i32_0 = arith.constant 0 : i32
    %c0_i32_1 = arith.constant 0 : i32
    %c0_i32_2 = arith.constant 0 : i32
    return %c0_i32, %c0_i32_0, %c0_i32_1 : i32, i32, i32
  }
  func.func @transform_8(%arg0: i32) -> (i32, i32, i32) {
    %c0_i32 = arith.constant 0 : i32
    %c0_i32_0 = arith.constant 0 : i32
    %c0_i32_1 = arith.constant 0 : i32
    %c0_i32_2 = arith.constant 0 : i32
    return %c0_i32, %c0_i32_0, %c0_i32_1 : i32, i32, i32
  }
  func.func @transform_9(%arg0: i32) -> (i32, i32, i32) {
    %c0_i32 = arith.constant 0 : i32
    %c0_i32_0 = arith.constant 0 : i32
    %c0_i32_1 = arith.constant 0 : i32
    %c0_i32_2 = arith.constant 0 : i32
    return %c0_i32, %c0_i32_0, %c0_i32_1 : i32, i32, i32
  }
  func.func @transform_10(%arg0: i32) -> (i32, i32, i32) {
    %c0_i32 = arith.constant 0 : i32
    %c0_i32_0 = arith.constant 0 : i32
    %c0_i32_1 = arith.constant 0 : i32
    %c0_i32_2 = arith.constant 0 : i32
    return %c0_i32, %c0_i32_0, %c0_i32_1 : i32, i32, i32
  }
  func.func @transform_11(%arg0: i32) -> (i32, i32, i32) {
    %c0_i32 = arith.constant 0 : i32
    %c0_i32_0 = arith.constant 0 : i32
    %c0_i32_1 = arith.constant 0 : i32
    %c0_i32_2 = arith.constant 0 : i32
    return %c0_i32, %c0_i32_0, %c0_i32_1 : i32, i32, i32
  }
  func.func @transform_12(%arg0: i32) -> (i32, i32) {
    %c0_i32 = arith.constant 0 : i32
    %c0_i32_0 = arith.constant 0 : i32
    %c0_i32_1 = arith.constant 0 : i32
    return %c0_i32, %c0_i32_0 : i32, i32
  }
  func.func @transform_13(%arg0: i32) -> (i32, i32) {
    %c0_i32 = arith.constant 0 : i32
    %c0_i32_0 = arith.constant 0 : i32
    %c0_i32_1 = arith.constant 0 : i32
    return %c0_i32, %c0_i32_0 : i32, i32
  }
  func.func @transform_14(%arg0: i32) -> (i32, i32) {
    %c0_i32 = arith.constant 0 : i32
    %c0_i32_0 = arith.constant 0 : i32
    %c0_i32_1 = arith.constant 0 : i32
    return %c0_i32, %c0_i32_0 : i32, i32
  }
  func.func @transform_15(%arg0: i32) -> (i32, i32) {
    %c0_i32 = arith.constant 0 : i32
    %c0_i32_0 = arith.constant 0 : i32
    %c0_i32_1 = arith.constant 0 : i32
    return %c0_i32, %c0_i32_0 : i32, i32
  }
  func.func @transform_16(%arg0: i32) -> (i32, i32) {
    %c0_i32 = arith.constant 0 : i32
    %c0_i32_0 = arith.constant 0 : i32
    %c0_i32_1 = arith.constant 0 : i32
    return %c0_i32, %c0_i32_0 : i32, i32
  }
  func.func @transform_17(%arg0: i32) -> (i32, i32) {
    %c0_i32 = arith.constant 0 : i32
    %c0_i32_0 = arith.constant 0 : i32
    %c0_i32_1 = arith.constant 0 : i32
    return %c0_i32, %c0_i32_0 : i32, i32
  }
  func.func @transform_18(%arg0: i32) -> (i32, i32) {
    %c0_i32 = arith.constant 0 : i32
    %c0_i32_0 = arith.constant 0 : i32
    %c0_i32_1 = arith.constant 0 : i32
    return %c0_i32, %c0_i32_0 : i32, i32
  }
  func.func @transform_19(%arg0: i32) -> (i32, i32) {
    %c0_i32 = arith.constant 0 : i32
    %c0_i32_0 = arith.constant 0 : i32
    %c0_i32_1 = arith.constant 0 : i32
    return %c0_i32, %c0_i32_0 : i32, i32
  }
  func.func @transform_20(%arg0: i32) -> (i32, i32) {
    %c0_i32 = arith.constant 0 : i32
    %c0_i32_0 = arith.constant 0 : i32
    %c0_i32_1 = arith.constant 0 : i32
    return %c0_i32, %c0_i32_0 : i32, i32
  }
  func.func @transform_21(%arg0: i32) -> (i32, i32) {
    %c0_i32 = arith.constant 0 : i32
    %c0_i32_0 = arith.constant 0 : i32
    %c0_i32_1 = arith.constant 0 : i32
    return %c0_i32, %c0_i32_0 : i32, i32
  }
  func.func @transform_22(%arg0: i32) -> (i32, i32) {
    %c0_i32 = arith.constant 0 : i32
    %c0_i32_0 = arith.constant 0 : i32
    %c0_i32_1 = arith.constant 0 : i32
    return %c0_i32, %c0_i32_0 : i32, i32
  }
  func.func @transform_23(%arg0: i32) -> (i32, i32) {
    %c0_i32 = arith.constant 0 : i32
    %c0_i32_0 = arith.constant 0 : i32
    %c0_i32_1 = arith.constant 0 : i32
    return %c0_i32, %c0_i32_0 : i32, i32
  }
  func.func @transform_24(%arg0: i32) -> (i32, i32) {
    %c0_i32 = arith.constant 0 : i32
    %c0_i32_0 = arith.constant 0 : i32
    %c0_i32_1 = arith.constant 0 : i32
    return %c0_i32, %c0_i32_0 : i32, i32
  }
  func.func @transform_25(%arg0: i32) -> (i32, i32) {
    %c0_i32 = arith.constant 0 : i32
    %c0_i32_0 = arith.constant 0 : i32
    %c0_i32_1 = arith.constant 0 : i32
    return %c0_i32, %c0_i32_0 : i32, i32
  }
  func.func @transform_26(%arg0: i32) -> (i32, i32) {
    %c0_i32 = arith.constant 0 : i32
    %c0_i32_0 = arith.constant 0 : i32
    %c0_i32_1 = arith.constant 0 : i32
    return %c0_i32, %c0_i32_0 : i32, i32
  }
  func.func @transform_27(%arg0: i32) -> (i32, i32) {
    %c0_i32 = arith.constant 0 : i32
    %c0_i32_0 = arith.constant 0 : i32
    %c0_i32_1 = arith.constant 0 : i32
    return %c0_i32, %c0_i32_0 : i32, i32
  }
}

</mosaic_0001>

<bundles_post_ra>
// kernel: ti_tegnn_forward.1
= control target key start
LH: loop header
LB: loop body
LE: loop exit
PB: predicated region body
PF: predicated region fallthrough
CT: control target
= control target key end

     0   :  { %s4376_s0 = inlined_call_operand.vmem [shape: f32[16,10], index: 0, kind: input, shape index: {}]   ;;  %s4377_s1 = inlined_call_operand.vmem [shape: f32[16,16], index: 1, kind: input, shape index: {}]   ;;  %s4378_s2 = inlined_call_operand.vmem [shape: f32[16,16], index: 2, kind: input, shape index: {}]   ;;  %s4379_s3 = inlined_call_operand.vmem [shape: f32[4,64], index: 3, kind: input, shape index: {}]   ;;  %s4380_s4 = inlined_call_operand.vmem [shape: f32[10,12], index: 4, kind: input, shape index: {}]   ;;  %s4381_s5 = inlined_call_operand.vmem [shape: f32[1,12], index: 5, kind: input, shape index: {}]   ;;  %s4382_s6 = inlined_call_operand.vmem [shape: f32[12,64], index: 6, kind: input, shape index: {}]   ;;  %s4383_s7 = inlined_call_operand.vmem [shape: f32[3,64,64], index: 7, kind: input, shape index: {}]   ;;  %s4384_s8 = inlined_call_operand.vmem [shape: f32[4,64,4], index: 8, kind: input, shape index: {}]   ;;  %s4385_s9 = inlined_call_operand.vmem [shape: f32[4,64,4], index: 9, kind: input, shape index: {}]   ;;  %s4386_s10 = inlined_call_operand.vmem [shape: f32[4,1,64], index: 10, kind: input, shape index: {}]   ;;  %s4387_s11 = inlined_call_operand.vmem [shape: f32[16,16,16], index: 11, kind: input, shape index: {}]   ;;  %s4388_s12 = inlined_call_operand.vmem [shape: f32[64,64], index: 12, kind: input, shape index: {}]   ;;  %s4389_s13 = inlined_call_operand.vmem [shape: f32[64,64], index: 13, kind: input, shape index: {}]   ;;  %s4390_s14 = inlined_call_operand.vmem [shape: f32[64,64], index: 14, kind: input, shape index: {}]   ;;  %s4391_s15 = inlined_call_operand.vmem [shape: f32[1,64], index: 15, kind: input, shape index: {}]   ;;  %s4392_s16 = inlined_call_operand.vmem [shape: f32[1,64], index: 16, kind: input, shape index: {}]   ;;  %s4393_s17 = inlined_call_operand.vmem [shape: f32[1,64], index: 17, kind: input, shape index: {}]   ;;  %s4394_s18 = inlined_call_operand.vmem [shape: f32[64,64], index: 18, kind: input, shape index: {}]   ;;  %s4395_s19 = inlined_call_operand.vmem [shape: f32[1,64], index: 19, kind: input, shape index: {}]   ;;  %s4396_s20 = inlined_call_operand.vmem [shape: f32[64,4], index: 20, kind: input, shape index: {}]   ;;  %s4397_s21 = inlined_call_operand.vmem [shape: f32[1,4], index: 21, kind: input, shape index: {}]   ;;  %s4398_s22 = inlined_call_operand.vmem [shape: f32[4,64], index: 22, kind: input, shape index: {}]   ;;  %s4399_s23 = inlined_call_operand.vmem [shape: f32[16,64], index: 23, kind: input, shape index: {}]   ;;  %s4400_s24 = inlined_call_operand.vmem [shape: f32[64,8], index: 24, kind: input, shape index: {}]   ;;  %s4401_s25 = inlined_call_operand.vmem [shape: f32[2,16], index: 25, kind: input, shape index: {}]   ;;  %s4402_s26 = inlined_call_operand.vmem [shape: f32[1,8], index: 26, kind: input, shape index: {}]   ;;  %s4403_s27 = inlined_call_operand.hbm [shape: f32[2,8], index: 27, kind: output, shape index: {}]  }
   0x1   :  { %4414 = sst [smem:[#allocation5_spill]] %s4376_s0 }
   0x2   :  { %4415 = sst [smem:[#allocation6_spill]] %s4377_s1 }
   0x3   :  { %4416 = sst [smem:[#allocation7_spill]] %s4378_s2 }
   0x4   :  { %4417 = sst [smem:[#allocation8_spill]] %s4379_s3 }
   0x5   :  { %4418 = sst [smem:[#allocation9_spill]] %s4380_s4 }
   0x6   :  { %4419 = sst [smem:[#allocation10_spill]] %s4381_s5 }
   0x7   :  { %4420 = sst [smem:[#allocation11_spill]] %s4382_s6 }
   0x8   :  { %4421 = sst [smem:[#allocation12_spill]] %s4383_s7 }
   0x9   :  { %4422 = sst [smem:[#allocation13_spill]] %s4384_s8 }
   0xa   :  { %4423 = sst [smem:[#allocation14_spill]] %s4385_s9 }
   0xb   :  { %4424 = sst [smem:[#allocation15_spill]] %s4386_s10 }
   0xc   :  { %4425 = sst [smem:[#allocation16_spill]] %s4387_s11 }
   0xd   :  { %s4426_s8 = sld [smem:[#allocation9_spill]]  ;;  %vm111_vm0 = vcmask 1041408   ;;  %vm104_vm1 = vcmask 80896  }
   0xe   :  { %s4427_s0 = sld [smem:[#allocation5_spill]] }
  0x13   :  { %v99_v0 = vld [vmem:[%s4426_s8 + $0x8] sm:$0x3]  ;;  %v98_v1 = vld [vmem:[%s4426_s8] sm:$0xff] }
  0x14   :  { %2763 = vmatpush.msk.msra.mxu0 %vm111_vm0, %v99_v0  ;;  %v96_v2 = vld [vmem:[%s4427_s0] sm:$0xff] }
  0x16   :  { %130 = vmatpush.msra.mxu0 %v98_v1 }
  0x17   :  { %2764 = vmatmul.msk.f32.vlgmr.msra.gmra.mxu0 %vm104_vm1, %v96_v2 }
  0x18   :  { %32 = vsyncpa [#allocation3], 0  ;;  %v97_v3 = vld [vmem:[%s4427_s0 + $0x8] sm:$0xff]  ;;  %s4428_s11 = sld [smem:[#allocation11_spill]]  ;;  %vm147_vm2 = vcmask 1043456   ;;  %vm140_vm3 = vcmask 97280  }
  0x19   :  { %s4429_s8 = sld [smem:[#allocation14_spill]]  ;;  %v3203_v27 = vmov 2   ;;  %v3204_v28 = vmov 0   ;;  %vm182_vm4 = vcmask 523264   ;;  %v3205_v32 = vmov 1   ;;  %s3207_s4 = smov 112  }
  0x1a   :  { %s4430_s5 = sld [smem:[#allocation13_spill]]  ;;  %2977 = vset.pattern.permute.xlu0 %v3203_v27  ;;  %2979 = vset.pattern.permute.xlu1 %v3204_v28  ;;  %v3206_v33 = vmov 3   ;;  %vm300_vm5 = vcmask 130048  }
  0x1b   :  { %s4431_s28 = sld [smem:[#allocation10_spill]]  ;;  %2981 = vset.pattern.permute.xlu2 %v3203_v27 }
  0x1c   :  { %s4432_s2 = sld [smem:[#allocation16_spill]] }
  0x1d   :  { %s4433_s6 = sld [smem:[#allocation6_spill]] }
  0x1e   :  { %v139_v4 = vld [vmem:[%s4428_s11 + $0x8] sm:$0xf]  ;;  %v138_v5 = vld [vmem:[%s4428_s11] sm:$0xff]  ;;  %s4434_s1 = sld [smem:[#allocation12_spill]] }
  0x1f   :  { %2765 = vmatmul.msk.f32.gmra.mxu0 %vm104_vm1, %v97_v3  ;;  %2766 = vmatpush.msk.msra.mxu1 %vm147_vm2, %v139_v4  ;;  %v181_v6 = vld [vmem:[%s4429_s8 + $0x38] sm:$0xff]  ;;  %v180_v8 = vld [vmem:[%s4429_s8 + $0x30] sm:$0xff]  ;;  %v179_v10 = vld [vmem:[%s4429_s8 + $0x28] sm:$0xff]  ;;  %s4435_s30 = sld [smem:[#allocation8_spill]] }
  0x20   :  { %v219_v7 = vld [vmem:[%s4430_s5 + $0x38] sm:$0xff]  ;;  %v218_v9 = vld [vmem:[%s4430_s5 + $0x30] sm:$0xff]  ;;  %v217_v11 = vld [vmem:[%s4430_s5 + $0x28] sm:$0xff]  ;;  %2960 = vmatpush.msra.mxu2 %v181_v6  ;;  %s4436_s3 = sld [smem:[#allocation15_spill]] }
  0x21   :  { %166 = vmatpush.msra.mxu1 %v138_v5  ;;  %228 = vmatpush.msra.mxu3 %v219_v7  ;;  %v178_v12 = vld [vmem:[%s4429_s8 + $0x20] sm:$0xff]  ;;  %v177_v14 = vld [vmem:[%s4429_s8 + $0x18] sm:$0xff]  ;;  %v176_v16 = vld [vmem:[%s4429_s8 + $0x10] sm:$0xff] }
  0x22   :  { %v216_v13 = vld [vmem:[%s4430_s5 + $0x20] sm:$0xff]  ;;  %2961 = vmatpush.msra.mxu2 %v180_v8  ;;  %v215_v15 = vld [vmem:[%s4430_s5 + $0x18] sm:$0xff]  ;;  %v214_v17 = vld [vmem:[%s4430_s5 + $0x10] sm:$0xff] }
  0x23   :  { %197 = vmatpush.msrb.mxu1 %v181_v6  ;;  %229 = vmatpush.msra.mxu3 %v218_v9  ;;  %v175_v18 = vld [vmem:[%s4429_s8 + $0x8] sm:$0xff]  ;;  %v3006_v20 = vld [vmem:[%s4431_s28] ss:$0 sm:$0xff]  ;;  %v2775_v47 = vld [vmem:[%s4432_s2 + $0x10] sm:$0xff]  ;;  %s3210_s28 = smov [#allocation2]  }
  0x24   :  { %2962 = vmatpush.msra.mxu2 %v179_v10  ;;  %v213_v19 = vld [vmem:[%s4430_s5 + $0x8] sm:$0xff]  ;;  %v174_v25 = vld [vmem:[%s4429_s8] sm:$0xff]  ;;  %v2783_v51 = vld [vmem:[%s4432_s2 + $0x30] sm:$0xff] }
  0x25   :  { %198 = vmatpush.msrb.mxu1 %v180_v8  ;;  %230 = vmatpush.msra.mxu3 %v217_v11  ;;  %v212_v26 = vld [vmem:[%s4430_s5] sm:$0xff]  ;;  %v2780_v53 = vld [vmem:[%s4432_s2 + $0x28] sm:$0xff] }
  0x26   :  { %2963 = vmatpush.msra.mxu2 %v178_v12  ;;  %v288_v48 = vld [vmem:[%s4432_s2] sm:$0xff]  ;;  %v289_v8 = vld [vmem:[%s4432_s2 + $0x8] sm:$0xff] }
  0x27   :  { %199 = vmatpush.msrb.mxu1 %v179_v10  ;;  %231 = vmatpush.msra.mxu3 %v216_v13  ;;  %v2779_v52 = vld [vmem:[%s4432_s2 + $0x20] sm:$0xff] }
  0x28   :  { %2964 = vmatpush.msra.mxu2 %v177_v14  ;;  %v3453_v57 = vld [vmem:[%s4433_s6] sm:$0xff] }
  0x29   :  { %200 = vmatpush.msrb.mxu1 %v178_v12  ;;  %232 = vmatpush.msra.mxu3 %v215_v15  ;;  %vm89_vm6 = vcmp.gt.f32.partialorder %v3453_v57, 0.0  ;;  %v3464_v12 = vld [vmem:[%s4433_s6 + $0x8] sm:$0xff] }
  0x2a   :  { %2965 = vmatpush.msra.mxu2 %v176_v16  ;;  %vm90_vm12 = vcmp.gt.f32.partialorder %v3464_v12, 0.0 }
  0x2b   :  { %201 = vmatpush.msrb.mxu1 %v177_v14  ;;  %233 = vmatpush.msra.mxu3 %v214_v17  ;;  %v2784_v14 = vld [vmem:[%s4432_s2 + $0x38] sm:$0xff] }
  0x2c   :  { %2966 = vmatpush.msra.mxu2 %v175_v18 }
  0x2d   :  { %202 = vmatpush.msrb.mxu1 %v176_v16  ;;  %234 = vmatpush.msra.mxu3 %v213_v19 }
  0x2e   :  { %2967 = vmatpush.msra.mxu2 %v174_v25 }
  0x2f   :  { %203 = vmatpush.msrb.mxu1 %v175_v18  ;;  %235 = vmatpush.msra.mxu3 %v212_v26 }
  0x31   :  { %204 = vmatpush.msrb.mxu1 %v174_v25 }
  0x94   :  { %v132_v21 = vpop.f32.mrf.mxu0 }
  0x95   :  { %v133_v22 = vadd.f32 %v3006_v20, %v132_v21 }
  0x97   :  { %2767 = vmatmul.msk.f32.vlgmr.msra.gmra.mxu1 %vm140_vm3, %v133_v22 }
  0x9c   :  { %v135_v23 = vpop.f32.mrf.mxu0 }
  0x9d   :  { %v136_v24 = vadd.f32 %v3006_v20, %v135_v23 }
  0x9f   :  { %2768 = vmatmul.msk.f32.gmra.mxu1 %vm140_vm3, %v136_v24 }
 0x114   :  { %v168_v29 = vpop.f32.mrf.mxu1 }
 0x115   :  { %2769 = vmatmul.msk.f32.vlgmr.msrb.gmra.mxu1 %vm182_vm4, %v168_v29  ;;  %2771 = vmatmul.msk.f32.vlgmr.msra.gmra.mxu3 %vm182_vm4, %v168_v29 }
 0x11c   :  { %v171_v30 = vpop.f32.mrf.mxu1 }
 0x11d   :  { %345 = vmatpush.msrb.mxu0 %v171_v30  ;;  %427 = vmatpush.msra.mxu1 %v171_v30 }
 0x11e   :  { %509 = vmatpush.msrb.mxu2 %v171_v30  ;;  %591 = vmatpush.msrb.mxu3 %v171_v30 }
 0x11f   :  { %346 = vmatpush.msrb.mxu0 %v168_v29  ;;  %428 = vmatpush.msra.mxu1 %v168_v29 }
 0x120   :  { %510 = vmatpush.msrb.mxu2 %v168_v29  ;;  %592 = vmatpush.msrb.mxu3 %v168_v29 }
 0x121   :  { %2770 = vmatmul.msk.f32.vlgmr.msra.gmra.mxu2 %vm182_vm4, %v171_v30  ;;  %2772 = vmatmul.msk.f32.gmra.mxu3 %vm182_vm4, %v171_v30 }
 0x192   :  { %v206_v31 = vpop.f32.mrf.mxu1 }
 0x193   :  { %277 = vperm.xlu1 %2979, %v206_v31   ;;  %442 = vperm.xlu0 %2977, %v206_v31  }
 0x198   :  { %v237_v35 = vpop.f32.mrf.mxu3 }
 0x19b   :  { %2980 = vset.pattern.permute.xlu1 %v3205_v32  ;;  %2978 = vset.pattern.permute.xlu0 %v3206_v33 }
 0x19c   :  { %360 = vperm.xlu1 %2980, %v206_v31   ;;  %524 = vperm.xlu0 %2978, %v206_v31  }
 0x1a4   :  { %v209_v34 = vpop.f32.mrf.mxu2  ;;  %2983 = vset.pattern.permute.xlu1 %v3204_v28  ;;  %v240_v36 = vpop.f32.mrf.mxu3 }
 0x1a5   :  { %446 = vperm.xlu2 %2981, %v209_v34   ;;  %282 = vperm.xlu1 %2983, %v209_v34  }
 0x1ad   :  { %2982 = vset.pattern.permute.xlu2 %v3206_v33 }
 0x1ae   :  { %528 = vperm.xlu2 %2982, %v209_v34  }
 0x1b6   :  { %2984 = vset.pattern.permute.xlu2 %v3205_v32 }
 0x1b7   :  { %364 = vperm.xlu2 %2984, %v209_v34   ;;  %v2776_v34 = vld [vmem:[%s4432_s2 + $0x18] sm:$0xff] }
 0x1be   :  { %243 = vxpose.xlu0.b32.start [1/2] (short) (narrow) %v237_v35, 8 }
 0x1bf   :  { %2985 = vset.pattern.permute.xlu2 %v3206_v33 }
 0x1c6   :  { %244 = vxpose.xlu0.b32.end [2/2] (short) (narrow) %v240_v36, 8 }
 0x1ff   :  { %v447_v40 = vpop.permute.xlu2 %446 }
 0x205   :  { %v443_v37 = vpop.permute.xlu0 %442  ;;  %v278_v38 = vpop.permute.xlu1 %277 }
 0x208   :  { %v529_v0 = vpop.permute.xlu2 %528 }
 0x20e   :  { %v525_v39 = vpop.permute.xlu0 %524  ;;  %v361_v41 = vpop.permute.xlu1 %360 }
 0x211   :  { %v365_v24 = vpop.permute.xlu2 %364 }
 0x217   :  { %v283_v60 = vpop.permute.xlu1 %282 }
 0x22d   :  { %2993 = vset.pattern.permute.xlu0 %v3205_v32 }
 0x262   :  { %v259_v42 = vpop.trf.xlu0 }
 0x263   :  { %v285_v43 = vperm.slane %v259_v42, 0  ;;  %v367_v44 = vperm.slane %v259_v42, 1  ;;  %v449_v45 = vperm.slane %v259_v42, 2  ;;  %v531_v46 = vperm.slane %v259_v42, 3 }
 0x265   :  { %v286_v49 = vadd.f32 %v285_v43, %v278_v38  ;;  %v368_v50 = vadd.f32 %v367_v44, %v361_v41  ;;  %v450_v54 = vadd.f32 %v449_v45, %v443_v37  ;;  %v451_v55 = vadd.f32 %v449_v45, %v447_v40 }
 0x266   :  { %v532_v56 = vadd.f32 %v531_v46, %v525_v39  ;;  %v287_v1 = vadd.f32 %v285_v43, %v283_v60  ;;  %v533_v5 = vadd.f32 %v531_v46, %v529_v0  ;;  %v369_v29 = vadd.f32 %v367_v44, %v365_v24 }
 0x267   :  { %v373_v58 = vadd.f32 %v2775_v47, %v368_v50  ;;  %v290_v59 = vadd.f32 %v288_v48, %v286_v49  ;;  %v455_v62 = vadd.f32 %v2779_v52, %v450_v54  ;;  %v456_v63 = vadd.f32 %v2780_v53, %v451_v55 }
 0x268   :  { %v537_v61 = vadd.f32 %v2783_v51, %v532_v56  ;;  %v291_v22 = vadd.f32 %v289_v8, %v287_v1  ;;  %v538_v23 = vadd.f32 %v2784_v14, %v533_v5  ;;  %v374_v39 = vadd.f32 %v2776_v34, %v369_v29 }
 0x269   :  { %vm375_vm7 = vcmp.ge.f32.partialorder %v373_v58, 0.0  ;;  %v377_v2 = vmul.f32 0.2, %v373_v58  ;;  %vm457_vm9 = vcmp.ge.f32.partialorder %v455_v62, 0.0  ;;  %v459_v4 = vmul.f32 0.2, %v455_v62 }
 0x26a   :  { %vm539_vm8 = vcmp.ge.f32.partialorder %v537_v61, 0.0  ;;  %v541_v3 = vmul.f32 0.2, %v537_v61  ;;  %vm292_vm10 = vcmp.ge.f32.partialorder %v290_v59, 0.0  ;;  %v294_v7 = vmul.f32 0.2, %v290_v59 }
 0x26b   :  { %v379_v6 = vsel %vm375_vm7, %v373_v58, %v377_v2  ;;  %v461_v10 = vsel %vm457_vm9, %v455_v62, %v459_v4  ;;  %v460_v13 = vmul.f32 0.2, %v456_v63  ;;  %vm458_vm11 = vcmp.ge.f32.partialorder %v456_v63, 0.0 }
 0x26c   :  { %v543_v9 = vsel %vm539_vm8, %v537_v61, %v541_v3  ;;  %v381_v11 = vsel %vm89_vm6, %v379_v6, -1e+30  ;;  %v463_v16 = vsel %vm89_vm6, %v461_v10, -1e+30  ;;  %v296_v21 = vsel %vm292_vm10, %v290_v59, %v294_v7 }
 0x26d   :  { %v545_v15 = vsel %vm89_vm6, %v543_v9, -1e+30  ;;  %v383_v17 = vsel %vm300_vm5, %v381_v11, -inf  ;;  %v465_v19 = vsel %vm300_vm5, %v463_v16, -inf  ;;  %v462_v20 = vsel %vm458_vm11, %v456_v63, %v460_v13 }
 0x26e   :  { %v547_v18 = vsel %vm300_vm5, %v545_v15, -inf  ;;  %384 = vmax.xlane.f32.xlu0 %v383_v17  ;;  %466 = vmax.xlane.f32.xlu1 %v465_v19  ;;  %v464_v25 = vsel %vm90_vm12, %v462_v20, -1e+30  ;;  %v298_v26 = vsel %vm89_vm6, %v296_v21, -1e+30  ;;  %vm293_vm13 = vcmp.ge.f32.partialorder %v291_v22, 0.0 }
 0x26f   :  { %548 = vmax.xlane.f32.xlu2 %v547_v18  ;;  %v295_v30 = vmul.f32 0.2, %v291_v22  ;;  %v542_v31 = vmul.f32 0.2, %v538_v23  ;;  %vm540_vm14 = vcmp.ge.f32.partialorder %v538_v23, 0.0  ;;  %v468_v35 = vsel %vm300_vm5, %v464_v25, -inf }
 0x270   :  { %v301_v36 = vsel %vm300_vm5, %v298_v26, -inf  ;;  %v378_v42 = vmul.f32 0.2, %v374_v39  ;;  %vm376_vm15 = vcmp.ge.f32.partialorder %v374_v39, 0.0 }
 0x271   :  { %v297_v37 = vsel %vm293_vm13, %v291_v22, %v295_v30  ;;  %v544_v38 = vsel %vm540_vm14, %v538_v23, %v542_v31 }
 0x272   :  { %v299_v40 = vsel %vm90_vm12, %v297_v37, -1e+30  ;;  %v546_v41 = vsel %vm90_vm12, %v544_v38, -1e+30  ;;  %v380_v45 = vsel %vm376_vm15, %v374_v39, %v378_v42 }
 0x273   :  { %v304_v43 = vsel %vm300_vm5, %v299_v40, -inf  ;;  %v550_v44 = vsel %vm300_vm5, %v546_v41, -inf  ;;  %v382_v46 = vsel %vm90_vm12, %v380_v45, -1e+30 }
 0x274   :  { %v386_v47 = vsel %vm300_vm5, %v382_v46, -inf }
 0x276   :  { %469 = vmax.xlane.f32.xlu1 %v468_v35 }
 0x277   :  { %302 = vmax.xlane.f32.xlu2 %v301_v36 }
 0x27e   :  { %305 = vmax.xlane.f32.xlu1 %v304_v43 }
 0x27f   :  { %551 = vmax.xlane.f32.xlu2 %v550_v44 }
 0x287   :  { %387 = vmax.xlane.f32.xlu2 %v386_v47 }
 0x2e1   :  { %v385_v48 = vpop.xlane.xlu0 %384  ;;  %v467_v50 = vpop.xlane.xlu1 %466 }
 0x2e2   :  { %v549_v49 = vpop.xlane.xlu2 %548  ;;  %v471_v52 = vsub.f32 %v463_v16, %v467_v50  ;;  %v389_v53 = vsub.f32 %v381_v11, %v385_v48 }
 0x2e3   :  { %v553_v51 = vsub.f32 %v545_v15, %v549_v49 }
 0x2e4   :  { %v473_v55 = vmul.f32 1.442695, %v471_v52  ;;  %v391_v56 = vmul.f32 1.442695, %v389_v53 }
 0x2e5   :  { %v555_v54 = vmul.f32 1.442695, %v553_v51 }
 0x2e7   :  { %3017 = vpow2.f32 %v555_v54 }
 0x2e8   :  { %3019 = vpow2.f32 %v473_v55 }
 0x2e9   :  { %v470_v58 = vpop.xlane.xlu1 %469  ;;  %3021 = vpow2.f32 %v391_v56 }
 0x2ea   :  { %v303_v59 = vpop.xlane.xlu2 %302  ;;  %v472_v61 = vsub.f32 %v464_v25, %v470_v58 }
 0x2eb   :  { %v307_v60 = vsub.f32 %v298_v26, %v303_v59 }
 0x2ec   :  { %v475_v4 = vmul.f32 1.442695, %v472_v61 }
 0x2ed   :  { %v3018_v62 = vpop.eup %3017  ;;  %v309_v63 = vmul.f32 1.442695, %v307_v60 }
 0x2ee   :  { %v3020_v0 = vpop.eup %3019  ;;  %v559_v1 = vsel %vm89_vm6, %v3018_v62, 0.0 }
 0x2ef   :  { %v477_v2 = vsel %vm89_vm6, %v3020_v0, 0.0  ;;  %v561_v3 = vsel %vm300_vm5, %v559_v1, 0.0  ;;  %3023 = vpow2.f32 %v309_v63  ;;  %v3022_v6 = vpop.eup %3021  ;;  %v624_v63 = vld [vmem:[%s4434_s1 + $0x38] sm:$0xff]  ;;  %v623_v0 = vld [vmem:[%s4434_s1 + $0x30] sm:$0xff] }
 0x2f0   :  { %v479_v5 = vsel %vm300_vm5, %v477_v2, 0.0  ;;  %562 = vadd.xlane.f32.xlu2 %v561_v3  ;;  %3025 = vpow2.f32 %v475_v4  ;;  %v395_v11 = vsel %vm89_vm6, %v3022_v6, 0.0  ;;  %639 = vmatpush.msra.mxu0 %v624_v63  ;;  %v620_v3 = vld [vmem:[%s4434_s1 + $0x18] sm:$0xff]  ;;  %v619_v4 = vld [vmem:[%s4434_s1 + $0x10] sm:$0xff]  ;;  %v617_v6 = vld [vmem:[%s4434_s1] sm:$0xff] }
 0x2f1   :  { %480 = vadd.xlane.f32.xlu1 %v479_v5  ;;  %v306_v7 = vpop.xlane.xlu1 %305  ;;  %v397_v15 = vsel %vm300_vm5, %v395_v11, 0.0  ;;  %v618_v5 = vld [vmem:[%s4434_s1 + $0x8] sm:$0xff] }
 0x2f2   :  { %v552_v8 = vpop.xlane.xlu2 %551  ;;  %v308_v10 = vsub.f32 %v299_v40, %v306_v7  ;;  %640 = vmatpush.msra.mxu0 %v623_v0  ;;  %v95_v7 = vld [vmem:[%s4435_s30] sm:$0xf] }
 0x2f3   :  { %v554_v9 = vsub.f32 %v546_v41, %v552_v8  ;;  %v3555_v8 = vperm.slane %v95_v7, 1 }
 0x2f4   :  { %v311_v17 = vmul.f32 1.442695, %v308_v10  ;;  %v3559_v10 = vperm.slane %v95_v7, 2 }
 0x2f5   :  { %v557_v13 = vmul.f32 1.442695, %v554_v9  ;;  %v3024_v14 = vpop.eup %3023  ;;  %v3557_v9 = vperm.slane %v95_v7, 0 }
 0x2f6   :  { %v313_v16 = vsel %vm89_vm6, %v3024_v14, 0.0  ;;  %v3026_v19 = vpop.eup %3025  ;;  %v2806_v14 = vld [vmem:[%s4430_s5 + $0x78] sm:$0xff] }
 0x2f7   :  { %3027 = vpow2.f32 %v557_v13  ;;  %v315_v18 = vsel %vm300_vm5, %v313_v16, 0.0  ;;  %v478_v23 = vsel %vm90_vm12, %v3026_v19, 0.0  ;;  %v2796_v13 = vld [vmem:[%s4429_s8 + $0x78] sm:$0xff]  ;;  %709 = vmatpush.msra.mxu2 %v2806_v14  ;;  %v2805_v19 = vld [vmem:[%s4430_s5 + $0x70] sm:$0xff] }
 0x2f8   :  { %398 = vadd.xlane.f32.xlu2 %v397_v15  ;;  %3029 = vpow2.f32 %v311_v17  ;;  %v482_v26 = vsel %vm300_vm5, %v478_v23, 0.0  ;;  %v2795_v15 = vld [vmem:[%s4429_s8 + $0x70] sm:$0xff]  ;;  %677 = vmatpush.msrb.mxu1 %v2796_v13 }
 0x2f9   :  { %316 = vadd.xlane.f32.xlu1 %v315_v18  ;;  %710 = vmatpush.msra.mxu2 %v2805_v19 }
 0x2fa   :  { %v388_v20 = vpop.xlane.xlu2 %387  ;;  %678 = vmatpush.msrb.mxu1 %v2795_v15 }
 0x2fb   :  { %v390_v21 = vsub.f32 %v382_v46, %v388_v20  ;;  %v3574_v20 = vperm.slane %v95_v7, 3 }
 0x2fd   :  { %v393_v22 = vmul.f32 1.442695, %v390_v21  ;;  %v3028_v24 = vpop.eup %3027 }
 0x2fe   :  { %v560_v25 = vsel %vm90_vm12, %v3028_v24, 0.0  ;;  %v3030_v30 = vpop.eup %3029 }
 0x2ff   :  { %3031 = vpow2.f32 %v393_v22  ;;  %v564_v29 = vsel %vm300_vm5, %v560_v25, 0.0  ;;  %v314_v34 = vsel %vm90_vm12, %v3030_v30, 0.0  ;;  %v2794_v22 = vld [vmem:[%s4429_s8 + $0x68] sm:$0xff]  ;;  %v2803_v30 = vld [vmem:[%s4430_s5 + $0x60] sm:$0xff] }
 0x300   :  { %565 = vadd.xlane.f32.xlu2 %v564_v29  ;;  %v318_v37 = vsel %vm300_vm5, %v314_v34, 0.0  ;;  %v2793_v29 = vld [vmem:[%s4429_s8 + $0x60] sm:$0xff]  ;;  %679 = vmatpush.msrb.mxu1 %v2794_v22 }
 0x301   :  { %483 = vadd.xlane.f32.xlu1 %v482_v26 }
 0x302   :  { %680 = vmatpush.msrb.mxu1 %v2793_v29 }
 0x305   :  { %v3032_v31 = vpop.eup %3031 }
 0x306   :  { %v396_v35 = vsel %vm90_vm12, %v3032_v31, 0.0 }
 0x307   :  { %v400_v36 = vsel %vm300_vm5, %v396_v35, 0.0 }
 0x308   :  { %401 = vadd.xlane.f32.xlu2 %v400_v36  ;;  %v2792_v36 = vld [vmem:[%s4429_s8 + $0x58] sm:$0xff] }
 0x309   :  { %319 = vadd.xlane.f32.xlu1 %v318_v37  ;;  %v2802_v37 = vld [vmem:[%s4430_s5 + $0x58] sm:$0xff]  ;;  %681 = vmatpush.msrb.mxu1 %v2792_v36 }
 0x363   :  { %v563_v38 = vpop.xlane.xlu2 %562 }
 0x364   :  { %v481_v39 = vpop.xlane.xlu1 %480  ;;  %3033 = vrcp.f32 %v563_v38 }
 0x365   :  { %3035 = vrcp.f32 %v481_v39  ;;  %v2791_v39 = vld [vmem:[%s4429_s8 + $0x50] sm:$0xff] }
 0x366   :  { %682 = vmatpush.msrb.mxu1 %v2791_v39 }
 0x36a   :  { %v3034_v40 = vpop.eup %3033 }
 0x36b   :  { %v3036_v41 = vpop.eup %3035  ;;  %v399_v42 = vpop.xlane.xlu2 %398  ;;  %v569_v43 = vmul.f32 %v3034_v40, %v559_v1  ;;  %v622_v1 = vld [vmem:[%s4434_s1 + $0x28] sm:$0xff]  ;;  %v2801_v40 = vld [vmem:[%s4430_s5 + $0x50] sm:$0xff] }
 0x36c   :  { %v317_v44 = vpop.xlane.xlu1 %316  ;;  %3037 = vrcp.f32 %v399_v42  ;;  %v487_v45 = vmul.f32 %v3036_v41, %v477_v2  ;;  %641 = vmatpush.msra.mxu0 %v622_v1  ;;  %v621_v2 = vld [vmem:[%s4434_s1 + $0x20] sm:$0xff]  ;;  %v2790_v42 = vld [vmem:[%s4429_s8 + $0x48] sm:$0xff] }
 0x36d   :  { %3039 = vrcp.f32 %v317_v44  ;;  %2785 = vmatmul.msk.f32.vlgmr.msrb.gmra.mxu3 %vm300_vm5, %v569_v43  ;;  %v2800_v43 = vld [vmem:[%s4430_s5 + $0x48] sm:$0xff]  ;;  %683 = vmatpush.msrb.mxu1 %v2790_v42 }
 0x36e   :  { %2781 = vmatmul.msk.f32.vlgmr.msrb.gmra.mxu2 %vm300_vm5, %v487_v45  ;;  %642 = vmatpush.msra.mxu0 %v621_v2 }
 0x370   :  { %643 = vmatpush.msra.mxu0 %v620_v3 }
 0x372   :  { %v3038_v46 = vpop.eup %3037  ;;  %644 = vmatpush.msra.mxu0 %v619_v4 }
 0x373   :  { %v3040_v47 = vpop.eup %3039  ;;  %v405_v48 = vmul.f32 %v3038_v46, %v395_v11  ;;  %v566_v50 = vpop.xlane.xlu2 %565 }
 0x374   :  { %v484_v49 = vpop.xlane.xlu1 %483  ;;  %v323_v51 = vmul.f32 %v3040_v47, %v313_v16  ;;  %645 = vmatpush.msra.mxu0 %v618_v5 }
 0x375   :  { %3041 = vrcp.f32 %v484_v49  ;;  %2777 = vmatmul.msk.f32.vlgmr.msra.gmra.mxu1 %vm300_vm5, %v405_v48 }
 0x376   :  { %3043 = vrcp.f32 %v566_v50  ;;  %2773 = vmatmul.msk.f32.vlgmr.msrb.gmra.mxu0 %vm300_vm5, %v323_v51 }
 0x377   :  { %646 = vmatpush.msra.mxu0 %v617_v6 }
 0x37b   :  { %v3042_v52 = vpop.eup %3041  ;;  %v402_v55 = vpop.xlane.xlu2 %401 }
 0x37c   :  { %v3044_v53 = vpop.eup %3043  ;;  %v320_v54 = vpop.xlane.xlu1 %319  ;;  %v488_v56 = vmul.f32 %v3042_v52, %v478_v23  ;;  %v2804_v23 = vld [vmem:[%s4430_s5 + $0x68] sm:$0xff] }
 0x37d   :  { %3045 = vrcp.f32 %v320_v54  ;;  %v570_v58 = vmul.f32 %v3044_v53, %v560_v25  ;;  %711 = vmatpush.msra.mxu2 %v2804_v23 }
 0x37e   :  { %3047 = vrcp.f32 %v402_v55  ;;  %2782 = vmatmul.msk.f32.gmra.mxu2 %vm300_vm5, %v488_v56 }
 0x37f   :  { %2786 = vmatmul.msk.f32.gmra.mxu3 %vm300_vm5, %v570_v58  ;;  %712 = vmatpush.msra.mxu2 %v2803_v30 }
 0x381   :  { %713 = vmatpush.msra.mxu2 %v2802_v37 }
 0x383   :  { %v3046_v59 = vpop.eup %3045  ;;  %714 = vmatpush.msra.mxu2 %v2801_v40 }
 0x384   :  { %v3048_v60 = vpop.eup %3047  ;;  %v324_v61 = vmul.f32 %v3046_v59, %v314_v34 }
 0x385   :  { %v406_v62 = vmul.f32 %v3048_v60, %v396_v35  ;;  %v3007_v35 = vld [vmem:[%s4436_s3] ss:$0 sm:$0xff]  ;;  %715 = vmatpush.msra.mxu2 %v2800_v43 }
 0x386   :  { %2774 = vmatmul.msk.f32.gmra.mxu0 %vm300_vm5, %v324_v61  ;;  %v2789_v61 = vld [vmem:[%s4429_s8 + $0x40] sm:$0xff] }
 0x387   :  { %2778 = vmatmul.msk.f32.gmra.mxu1 %vm300_vm5, %v406_v62  ;;  %v2799_v62 = vld [vmem:[%s4430_s5 + $0x40] sm:$0xff] }
 0x388   :  { %684 = vmatpush.msrb.mxu1 %v2789_v61  ;;  %716 = vmatpush.msra.mxu2 %v2799_v62 }
 0x3f0   :  { %v594_v24 = vpop.f32.mrf.mxu3 }
 0x3f1   :  { %v512_v16 = vpop.f32.mrf.mxu2  ;;  %v601_v31 = vmul.f32 %v3574_v20, %v594_v24  ;;  %v2821_v24 = vld [vmem:[%s4432_s2 + $0x70] sm:$0xff] }
 0x3f2   :  { %v430_v11 = vpop.f32.mrf.mxu1  ;;  %v519_v25 = vmul.f32 %v3559_v10, %v512_v16 }
 0x3f3   :  { %v348_v17 = vpop.f32.mrf.mxu0  ;;  %v437_v18 = vmul.f32 %v3555_v8, %v430_v11 }
 0x3f4   :  { %v355_v21 = vmul.f32 %v3557_v9, %v348_v17 }
 0x3f6   :  { %v439_v26 = vadd.f32 %v437_v18, %v355_v21  ;;  %v2809_v21 = vld [vmem:[%s4432_s2 + $0x40] sm:$0xff] }
 0x3f8   :  { %v521_v34 = vadd.f32 %v519_v25, %v439_v26  ;;  %v2813_v25 = vld [vmem:[%s4432_s2 + $0x50] sm:$0xff]  ;;  %v2822_v26 = vld [vmem:[%s4432_s2 + $0x78] sm:$0xff] }
 0x3fa   :  { %v603_v38 = vadd.f32 %v601_v31, %v521_v34 }
 0x3fc   :  { %v609_v41 = vadd.f32 %v3007_v35, %v603_v38 }
 0x3fe   :  { %vm611_vm0 = vcmp.ge.f32.partialorder %v609_v41, 0.0  ;;  %v613_v44 = vmul.f32 0.01, %v609_v41 }
 0x400   :  { %v615_v45 = vsel %vm611_vm0, %v609_v41, %v613_v44 }
 0x401   :  { %2787 = vmatmul.msk.f32.vlgmr.msra.gmra.mxu0 %vm182_vm4, %v615_v45  ;;  %v515_v47 = vpop.f32.mrf.mxu2 }
 0x402   :  { %v597_v51 = vpop.f32.mrf.mxu3  ;;  %v520_v52 = vmul.f32 %v3559_v10, %v515_v47 }
 0x403   :  { %v351_v46 = vpop.f32.mrf.mxu0  ;;  %v602_v54 = vmul.f32 %v3574_v20, %v597_v51  ;;  %v2817_v51 = vld [vmem:[%s4432_s2 + $0x60] sm:$0xff] }
 0x404   :  { %v356_v48 = vmul.f32 %v3557_v9, %v351_v46  ;;  %v433_v49 = vpop.f32.mrf.mxu1 }
 0x405   :  { %v438_v50 = vmul.f32 %v3555_v8, %v433_v49 }
 0x407   :  { %v440_v53 = vadd.f32 %v438_v50, %v356_v48  ;;  %v2818_v48 = vld [vmem:[%s4432_s2 + $0x68] sm:$0xff] }
 0x409   :  { %v522_v55 = vadd.f32 %v520_v52, %v440_v53 }
 0x40b   :  { %v604_v56 = vadd.f32 %v602_v54, %v522_v55 }
 0x40d   :  { %v610_v58 = vadd.f32 %v3007_v35, %v604_v56 }
 0x40f   :  { %vm612_vm1 = vcmp.ge.f32.partialorder %v610_v58, 0.0  ;;  %v614_v59 = vmul.f32 0.01, %v610_v58 }
 0x411   :  { %v616_v60 = vsel %vm612_vm1, %v610_v58, %v614_v59 }
 0x412   :  { %2788 = vmatmul.msk.f32.gmra.mxu0 %vm182_vm4, %v616_v60 }
 0x47e   :  { %v648_v63 = vpop.f32.mrf.mxu0 }
 0x47f   :  { %2797 = vmatmul.msk.f32.vlgmr.msrb.gmra.mxu1 %vm182_vm4, %v648_v63  ;;  %2807 = vmatmul.msk.f32.vlgmr.msra.gmra.mxu2 %vm182_vm4, %v648_v63 }
 0x48f   :  { %v651_v0 = vpop.f32.mrf.mxu0 }
 0x490   :  { %2798 = vmatmul.msk.f32.gmra.mxu1 %vm182_vm4, %v651_v0  ;;  %2808 = vmatmul.msk.f32.gmra.mxu2 %vm182_vm4, %v651_v0 }
 0x491   :  { %826 = vmatpush.msra.mxu3 %v651_v0  ;;  %907 = vmatpush.msrb.mxu0 %v651_v0 }
 0x492   :  { %988 = vmatpush.msra.mxu1 %v651_v0  ;;  %1069 = vmatpush.msrb.mxu2 %v651_v0  ;;  %v2810_v0 = vld [vmem:[%s4432_s2 + $0x48] sm:$0xff] }
 0x493   :  { %827 = vmatpush.msra.mxu3 %v648_v63  ;;  %908 = vmatpush.msrb.mxu0 %v648_v63 }
 0x494   :  { %989 = vmatpush.msra.mxu1 %v648_v63  ;;  %1070 = vmatpush.msrb.mxu2 %v648_v63 }
 0x4fc   :  { %v686_v1 = vpop.f32.mrf.mxu1 }
 0x4fd   :  { %1002 = vperm.xlu2 %2985, %v686_v1   ;;  %758 = vperm.xlu1 %2983, %v686_v1  }
 0x502   :  { %v718_v3 = vpop.f32.mrf.mxu2 }
 0x505   :  { %2986 = vset.pattern.permute.xlu1 %v3205_v32  ;;  %2988 = vset.pattern.permute.xlu2 %v3204_v28 }
 0x506   :  { %840 = vperm.xlu1 %2986, %v686_v1  }
 0x50d   :  { %v689_v2 = vpop.f32.mrf.mxu1 }
 0x50e   :  { %763 = vperm.xlu2 %2988, %v689_v2   ;;  %2987 = vset.pattern.permute.xlu1 %v3203_v27 }
 0x50f   :  { %921 = vperm.xlu1 %2987, %v686_v1  }
 0x513   :  { %v721_v4 = vpop.f32.mrf.mxu2 }
 0x516   :  { %2989 = vset.pattern.permute.xlu2 %v3206_v33 }
 0x517   :  { %1006 = vperm.xlu2 %2989, %v689_v2   ;;  %2990 = vset.pattern.permute.xlu1 %v3205_v32 }
 0x518   :  { %844 = vperm.xlu1 %2990, %v689_v2  }
 0x51f   :  { %2991 = vset.pattern.permute.xlu2 %v3203_v27 }
 0x520   :  { %925 = vperm.xlu2 %2991, %v689_v2  }
 0x528   :  { %2992 = vset.pattern.permute.xlu2 %v3204_v28 }
 0x54d   :  { %724 = vxpose.xlu1.b32.start [1/2] (short) (narrow) %v718_v3, 8 }
 0x555   :  { %725 = vxpose.xlu1.b32.end [2/2] (short) (narrow) %v721_v4, 8 }
 0x557   :  { %v1003_v7 = vpop.permute.xlu2 %1002 }
 0x568   :  { %v764_v13 = vpop.permute.xlu2 %763 }
 0x56f   :  { %v759_v5 = vpop.permute.xlu1 %758 }
 0x571   :  { %v1007_v15 = vpop.permute.xlu2 %1006 }
 0x578   :  { %v841_v6 = vpop.permute.xlu1 %840 }
 0x57a   :  { %v926_v39 = vpop.permute.xlu2 %925 }
 0x581   :  { %v922_v11 = vpop.permute.xlu1 %921 }
 0x58a   :  { %v845_v14 = vpop.permute.xlu1 %844 }
 0x5f1   :  { %v740_v16 = vpop.trf.xlu1 }
 0x5f2   :  { %v766_v17 = vperm.slane %v740_v16, 0  ;;  %v847_v18 = vperm.slane %v740_v16, 1  ;;  %v1009_v19 = vperm.slane %v740_v16, 3  ;;  %v928_v31 = vperm.slane %v740_v16, 2 }
 0x5f4   :  { %v767_v22 = vadd.f32 %v766_v17, %v759_v5  ;;  %v848_v23 = vadd.f32 %v847_v18, %v841_v6  ;;  %v1010_v29 = vadd.f32 %v1009_v19, %v1003_v7  ;;  %v1011_v30 = vadd.f32 %v1009_v19, %v1007_v15  ;;  %v2814_v15 = vld [vmem:[%s4432_s2 + $0x58] sm:$0xff] }
 0x5f5   :  { %v929_v41 = vadd.f32 %v928_v31, %v922_v11  ;;  %v930_v42 = vadd.f32 %v928_v31, %v926_v39  ;;  %v768_v61 = vadd.f32 %v766_v17, %v764_v13  ;;  %v849_v7 = vadd.f32 %v847_v18, %v845_v14 }
 0x5f6   :  { %v772_v34 = vadd.f32 %v2809_v21, %v767_v22  ;;  %v1015_v35 = vadd.f32 %v2821_v24, %v1010_v29  ;;  %v853_v36 = vadd.f32 %v2813_v25, %v848_v23  ;;  %v1016_v37 = vadd.f32 %v2822_v26, %v1011_v30 }
 0x5f7   :  { %v935_v54 = vadd.f32 %v2818_v48, %v930_v42  ;;  %v934_v56 = vadd.f32 %v2817_v51, %v929_v41  ;;  %v773_v4 = vadd.f32 %v2810_v0, %v768_v61  ;;  %v854_v19 = vadd.f32 %v2814_v15, %v849_v7 }
 0x5f8   :  { %vm774_vm3 = vcmp.ge.f32.partialorder %v772_v34, 0.0  ;;  %v776_v38 = vmul.f32 0.2, %v772_v34  ;;  %vm1017_vm7 = vcmp.ge.f32.partialorder %v1015_v35, 0.0  ;;  %v1019_v40 = vmul.f32 0.2, %v1015_v35 }
 0x5f9   :  { %v1020_v44 = vmul.f32 0.2, %v1016_v37  ;;  %v857_v47 = vmul.f32 0.2, %v853_v36  ;;  %vm1018_vm8 = vcmp.ge.f32.partialorder %v1016_v37, 0.0  ;;  %vm855_vm9 = vcmp.ge.f32.partialorder %v853_v36, 0.0 }
 0x5fa   :  { %v778_v43 = vsel %vm774_vm3, %v772_v34, %v776_v38  ;;  %v1021_v45 = vsel %vm1017_vm7, %v1015_v35, %v1019_v40  ;;  %v939_v60 = vmul.f32 0.2, %v935_v54  ;;  %v938_v62 = vmul.f32 0.2, %v934_v56 }
 0x5fb   :  { %v780_v46 = vsel %vm89_vm6, %v778_v43, -1e+30  ;;  %v1023_v49 = vsel %vm89_vm6, %v1021_v45, -1e+30  ;;  %v1022_v53 = vsel %vm1018_vm8, %v1016_v37, %v1020_v44  ;;  %v859_v55 = vsel %vm855_vm9, %v853_v36, %v857_v47 }
 0x5fc   :  { %v782_v50 = vsel %vm300_vm5, %v780_v46, -inf  ;;  %v1025_v52 = vsel %vm300_vm5, %v1023_v49, -inf  ;;  %v3661_v58 = vsel %vm90_vm12, %v1022_v53, -1e+30  ;;  %v861_v59 = vsel %vm89_vm6, %v859_v55, -1e+30 }
 0x5fd   :  { %783 = vmax.xlane.f32.xlu2 %v782_v50  ;;  %1026 = vmax.xlane.f32.xlu0 %v1025_v52  ;;  %vm937_vm10 = vcmp.ge.f32.partialorder %v935_v54, 0.0  ;;  %v1028_v63 = vsel %vm300_vm5, %v3661_v58, -inf  ;;  %vm936_vm11 = vcmp.ge.f32.partialorder %v934_v56, 0.0  ;;  %v863_v1 = vsel %vm300_vm5, %v861_v59, -inf }
 0x5fe   :  { %v941_v2 = vsel %vm937_vm10, %v935_v54, %v939_v60  ;;  %v940_v3 = vsel %vm936_vm11, %v934_v56, %v938_v62  ;;  %v777_v11 = vmul.f32 0.2, %v773_v4  ;;  %vm775_vm13 = vcmp.ge.f32.partialorder %v773_v4, 0.0 }
 0x5ff   :  { %v3673_v5 = vsel %vm90_vm12, %v941_v2, -1e+30  ;;  %v942_v6 = vsel %vm89_vm6, %v940_v3, -1e+30  ;;  %v858_v22 = vmul.f32 0.2, %v854_v19 }
 0x600   :  { %v947_v13 = vsel %vm300_vm5, %v3673_v5, -inf  ;;  %v944_v16 = vsel %vm300_vm5, %v942_v6, -inf  ;;  %v779_v17 = vsel %vm775_vm13, %v773_v4, %v777_v11  ;;  %vm856_vm14 = vcmp.ge.f32.partialorder %v854_v19, 0.0 }
 0x601   :  { %v781_v21 = vsel %vm90_vm12, %v779_v17, -1e+30  ;;  %v860_v18 = vsel %vm856_vm14, %v854_v19, %v858_v22 }
 0x602   :  { %v785_v14 = vsel %vm300_vm5, %v781_v21, -inf  ;;  %v862_v23 = vsel %vm90_vm12, %v860_v18, -1e+30 }
 0x603   :  { %v866_v24 = vsel %vm300_vm5, %v862_v23, -inf }
 0x605   :  { %1029 = vmax.xlane.f32.xlu2 %v1028_v63  ;;  %864 = vmax.xlane.f32.xlu0 %v863_v1 }
 0x60d   :  { %948 = vmax.xlane.f32.xlu2 %v947_v13  ;;  %945 = vmax.xlane.f32.xlu0 %v944_v16 }
 0x615   :  { %786 = vmax.xlane.f32.xlu0 %v785_v14 }
 0x61d   :  { %867 = vmax.xlane.f32.xlu0 %v866_v24 }
 0x670   :  { %v784_v25 = vpop.xlane.xlu2 %783  ;;  %v1027_v26 = vpop.xlane.xlu0 %1026 }
 0x671   :  { %v788_v29 = vsub.f32 %v780_v46, %v784_v25  ;;  %v1031_v30 = vsub.f32 %v1023_v49, %v1027_v26 }
 0x673   :  { %v790_v31 = vmul.f32 1.442695, %v788_v29  ;;  %v1033_v34 = vmul.f32 1.442695, %v1031_v30 }
 0x675   :  { %3049 = vpow2.f32 %v790_v31 }
 0x676   :  { %3051 = vpow2.f32 %v1033_v34 }
 0x678   :  { %v865_v35 = vpop.xlane.xlu0 %864  ;;  %v1030_v48 = vpop.xlane.xlu2 %1029 }
 0x679   :  { %v869_v36 = vsub.f32 %v861_v59, %v865_v35  ;;  %v1032_v52 = vsub.f32 %v3661_v58, %v1030_v48  ;;  %v2832_v48 = vld [vmem:[%s4434_s1 + $0x70] sm:$0xff] }
 0x67b   :  { %v3050_v37 = vpop.eup %3049  ;;  %v871_v39 = vmul.f32 1.442695, %v869_v36  ;;  %v1035_v59 = vmul.f32 1.442695, %v1032_v52  ;;  %v2828_v52 = vld [vmem:[%s4434_s1 + $0x50] sm:$0xff] }
 0x67c   :  { %v3052_v38 = vpop.eup %3051  ;;  %v794_v40 = vsel %vm89_vm6, %v3050_v37, 0.0 }
 0x67d   :  { %v1037_v41 = vsel %vm89_vm6, %v3052_v38, 0.0  ;;  %v796_v42 = vsel %vm300_vm5, %v794_v40, 0.0  ;;  %3053 = vpow2.f32 %v871_v39 }
 0x67e   :  { %v1039_v43 = vsel %vm300_vm5, %v1037_v41, 0.0  ;;  %797 = vadd.xlane.f32.xlu0 %v796_v42 }
 0x67f   :  { %1040 = vadd.xlane.f32.xlu1 %v1039_v43 }
 0x680   :  { %v946_v44 = vpop.xlane.xlu0 %945  ;;  %v949_v61 = vpop.xlane.xlu2 %948 }
 0x681   :  { %v950_v45 = vsub.f32 %v942_v6, %v946_v44  ;;  %v951_v63 = vsub.f32 %v3673_v5, %v949_v61 }
 0x683   :  { %v3054_v46 = vpop.eup %3053  ;;  %v952_v47 = vmul.f32 1.442695, %v950_v45  ;;  %v954_v3 = vmul.f32 1.442695, %v951_v63 }
 0x684   :  { %v875_v49 = vsel %vm89_vm6, %v3054_v46, 0.0 }
 0x685   :  { %3055 = vpow2.f32 %v952_v47  ;;  %v877_v50 = vsel %vm300_vm5, %v875_v49, 0.0  ;;  %v2833_v47 = vld [vmem:[%s4434_s1 + $0x78] sm:$0xff] }
 0x686   :  { %878 = vadd.xlane.f32.xlu2 %v877_v50  ;;  %1118 = vmatpush.msrb.mxu3 %v2833_v47  ;;  %v2830_v50 = vld [vmem:[%s4434_s1 + $0x60] sm:$0xff] }
 0x688   :  { %v787_v51 = vpop.xlane.xlu0 %786  ;;  %1119 = vmatpush.msrb.mxu3 %v2832_v48 }
 0x689   :  { %v789_v53 = vsub.f32 %v781_v21, %v787_v51  ;;  %v2829_v51 = vld [vmem:[%s4434_s1 + $0x58] sm:$0xff] }
 0x68b   :  { %v3056_v54 = vpop.eup %3055  ;;  %v792_v55 = vmul.f32 1.442695, %v789_v53  ;;  %v2827_v53 = vld [vmem:[%s4434_s1 + $0x48] sm:$0xff] }
 0x68c   :  { %v956_v56 = vsel %vm89_vm6, %v3056_v54, 0.0  ;;  %v2826_v54 = vld [vmem:[%s4434_s1 + $0x40] sm:$0xff] }
 0x68d   :  { %3057 = vpow2.f32 %v792_v55  ;;  %v958_v60 = vsel %vm300_vm5, %v956_v56, 0.0 }
 0x68e   :  { %959 = vadd.xlane.f32.xlu2 %v958_v60  ;;  %3059 = vpow2.f32 %v1035_v59 }
 0x690   :  { %v868_v62 = vpop.xlane.xlu0 %867 }
 0x691   :  { %v870_v0 = vsub.f32 %v862_v23, %v868_v62 }
 0x693   :  { %v3058_v1 = vpop.eup %3057  ;;  %v873_v2 = vmul.f32 1.442695, %v870_v0 }
 0x694   :  { %v795_v58 = vsel %vm90_vm12, %v3058_v1, 0.0  ;;  %v3060_v6 = vpop.eup %3059 }
 0x695   :  { %3061 = vpow2.f32 %v873_v2  ;;  %v799_v4 = vsel %vm300_vm5, %v795_v58, 0.0  ;;  %v1038_v7 = vsel %vm90_vm12, %v3060_v6, 0.0  ;;  %v2842_v6 = vld [vmem:[%s4429_s8 + $0xb0] sm:$0xff] }
 0x696   :  { %800 = vadd.xlane.f32.xlu0 %v799_v4  ;;  %3063 = vpow2.f32 %v954_v3  ;;  %v1042_v15 = vsel %vm300_vm5, %v1038_v7, 0.0  ;;  %v2843_v3 = vld [vmem:[%s4429_s8 + $0xb8] sm:$0xff] }
 0x697   :  { %v2853_v4 = vld [vmem:[%s4430_s5 + $0xb8] sm:$0xff]  ;;  %1156 = vmatpush.msra.mxu0 %v2843_v3 }
 0x698   :  { %1188 = vmatpush.msrb.mxu1 %v2853_v4 }
 0x699   :  { %1157 = vmatpush.msra.mxu0 %v2842_v6 }
 0x69b   :  { %v3062_v11 = vpop.eup %3061 }
 0x69c   :  { %v876_v5 = vsel %vm90_vm12, %v3062_v11, 0.0  ;;  %v3064_v16 = vpop.eup %3063  ;;  %v2852_v11 = vld [vmem:[%s4430_s5 + $0xb0] sm:$0xff] }
 0x69d   :  { %v880_v13 = vsel %vm300_vm5, %v876_v5, 0.0  ;;  %v957_v17 = vsel %vm90_vm12, %v3064_v16, 0.0  ;;  %1189 = vmatpush.msrb.mxu1 %v2852_v11  ;;  %v2840_v16 = vld [vmem:[%s4429_s8 + $0xa0] sm:$0xff] }
 0x69e   :  { %881 = vadd.xlane.f32.xlu2 %v880_v13  ;;  %1043 = vadd.xlane.f32.xlu0 %v1042_v15  ;;  %v961_v19 = vsel %vm300_vm5, %v957_v17, 0.0  ;;  %v2851_v13 = vld [vmem:[%s4430_s5 + $0xa8] sm:$0xff]  ;;  %v2864_v11 = vld [vmem:[%s4432_s2 + $0xa0] sm:$0xff] }
 0x69f   :  { %1190 = vmatpush.msrb.mxu1 %v2851_v13 }
 0x6a6   :  { %962 = vadd.xlane.f32.xlu0 %v961_v19 }
 0x6f1   :  { %v798_v21 = vpop.xlane.xlu0 %797 }
 0x6f2   :  { %v1041_v22 = vpop.xlane.xlu1 %1040  ;;  %3065 = vrcp.f32 %v798_v21  ;;  %v2839_v21 = vld [vmem:[%s4429_s8 + $0x98] sm:$0xff] }
 0x6f3   :  { %3067 = vrcp.f32 %v1041_v22  ;;  %v2849_v22 = vld [vmem:[%s4430_s5 + $0x98] sm:$0xff] }
 0x6f8   :  { %v3066_v14 = vpop.eup %3065 }
 0x6f9   :  { %v3068_v18 = vpop.eup %3067  ;;  %v804_v23 = vmul.f32 %v3066_v14, %v794_v40  ;;  %v879_v25 = vpop.xlane.xlu2 %878 }
 0x6fa   :  { %v1047_v24 = vmul.f32 %v3068_v18, %v1037_v41  ;;  %3069 = vrcp.f32 %v879_v25  ;;  %v2838_v18 = vld [vmem:[%s4429_s8 + $0x90] sm:$0xff]  ;;  %v2847_v25 = vld [vmem:[%s4430_s5 + $0x88] sm:$0xff] }
 0x6fb   :  { %2811 = vmatmul.msk.f32.vlgmr.msra.gmra.mxu3 %vm300_vm5, %v804_v23  ;;  %v2848_v23 = vld [vmem:[%s4430_s5 + $0x90] sm:$0xff] }
 0x6fc   :  { %2823 = vmatmul.msk.f32.vlgmr.msrb.gmra.mxu2 %vm300_vm5, %v1047_v24  ;;  %v2837_v24 = vld [vmem:[%s4429_s8 + $0x88] sm:$0xff] }
 0x700   :  { %v3070_v26 = vpop.eup %3069 }
 0x701   :  { %v885_v29 = vmul.f32 %v3070_v26, %v875_v49  ;;  %v960_v30 = vpop.xlane.xlu2 %959  ;;  %v2831_v49 = vld [vmem:[%s4434_s1 + $0x68] sm:$0xff] }
 0x702   :  { %3071 = vrcp.f32 %v960_v30  ;;  %1120 = vmatpush.msrb.mxu3 %v2831_v49 }
 0x703   :  { %2815 = vmatmul.msk.f32.vlgmr.msrb.gmra.mxu0 %vm300_vm5, %v885_v29 }
 0x704   :  { %1121 = vmatpush.msrb.mxu3 %v2830_v50 }
 0x706   :  { %1122 = vmatpush.msrb.mxu3 %v2829_v51 }
 0x708   :  { %v3072_v31 = vpop.eup %3071  ;;  %1123 = vmatpush.msrb.mxu3 %v2828_v52 }
 0x709   :  { %v966_v34 = vmul.f32 %v3072_v31, %v956_v56  ;;  %v801_v35 = vpop.xlane.xlu0 %800 }
 0x70a   :  { %3073 = vrcp.f32 %v801_v35  ;;  %1124 = vmatpush.msrb.mxu3 %v2827_v53 }
 0x70b   :  { %2819 = vmatmul.msk.f32.vlgmr.msra.gmra.mxu1 %vm300_vm5, %v966_v34 }
 0x70c   :  { %1125 = vmatpush.msrb.mxu3 %v2826_v54 }
 0x710   :  { %v3074_v36 = vpop.eup %3073 }
 0x711   :  { %v1044_v37 = vpop.xlane.xlu0 %1043  ;;  %v882_v38 = vpop.xlane.xlu2 %881  ;;  %v805_v39 = vmul.f32 %v3074_v36, %v795_v58  ;;  %v3008_v58 = vld [vmem:[%s4436_s3 + $0x1] ss:$0 sm:$0xff] }
 0x712   :  { %3075 = vrcp.f32 %v1044_v37 }
 0x713   :  { %3077 = vrcp.f32 %v882_v38  ;;  %2812 = vmatmul.msk.f32.gmra.mxu3 %vm300_vm5, %v805_v39 }
 0x718   :  { %v3076_v40 = vpop.eup %3075 }
 0x719   :  { %v3078_v41 = vpop.eup %3077  ;;  %v963_v42 = vpop.xlane.xlu0 %962  ;;  %v1048_v43 = vmul.f32 %v3076_v40, %v1038_v7 }
 0x71a   :  { %3079 = vrcp.f32 %v963_v42  ;;  %v886_v44 = vmul.f32 %v3078_v41, %v876_v5  ;;  %v2841_v5 = vld [vmem:[%s4429_s8 + $0xa8] sm:$0xff] }
 0x71b   :  { %2824 = vmatmul.msk.f32.gmra.mxu2 %vm300_vm5, %v1048_v43  ;;  %1158 = vmatpush.msra.mxu0 %v2841_v5  ;;  %v2869_v5 = vld [vmem:[%s4432_s2 + $0xb8] sm:$0xff] }
 0x71c   :  { %2816 = vmatmul.msk.f32.gmra.mxu0 %vm300_vm5, %v886_v44  ;;  %v2836_v44 = vld [vmem:[%s4429_s8 + $0x80] sm:$0xff] }
 0x71d   :  { %1159 = vmatpush.msra.mxu0 %v2840_v16 }
 0x71f   :  { %1160 = vmatpush.msra.mxu0 %v2839_v21 }
 0x720   :  { %v3080_v45 = vpop.eup %3079 }
 0x721   :  { %v967_v46 = vmul.f32 %v3080_v45, %v957_v17  ;;  %v2850_v17 = vld [vmem:[%s4430_s5 + $0xa0] sm:$0xff]  ;;  %1161 = vmatpush.msra.mxu0 %v2838_v18 }
 0x722   :  { %1191 = vmatpush.msrb.mxu1 %v2850_v17  ;;  %v2846_v45 = vld [vmem:[%s4430_s5 + $0x80] sm:$0xff] }
 0x723   :  { %2820 = vmatmul.msk.f32.gmra.mxu1 %vm300_vm5, %v967_v46  ;;  %1162 = vmatpush.msra.mxu0 %v2837_v24 }
 0x724   :  { %1192 = vmatpush.msrb.mxu1 %v2849_v22 }
 0x725   :  { %1163 = vmatpush.msra.mxu0 %v2836_v44 }
 0x726   :  { %1193 = vmatpush.msrb.mxu1 %v2848_v23 }
 0x728   :  { %1194 = vmatpush.msrb.mxu1 %v2847_v25 }
 0x72a   :  { %1195 = vmatpush.msrb.mxu1 %v2846_v45 }
 0x77e   :  { %v829_v56 = vpop.f32.mrf.mxu3 }
 0x77f   :  { %v835_v60 = vmul.f32 %v829_v56, %v3557_v9  ;;  %v1072_v61 = vpop.f32.mrf.mxu2 }
 0x780   :  { %v910_v55 = vpop.f32.mrf.mxu0  ;;  %v1078_v1 = vmul.f32 %v1072_v61, %v3574_v20 }
 0x781   :  { %v916_v59 = vmul.f32 %v910_v55, %v3555_v8 }
 0x783   :  { %v918_v63 = vadd.f32 %v916_v59, %v835_v60 }
 0x788   :  { %v991_v62 = vpop.f32.mrf.mxu1 }
 0x789   :  { %v997_v0 = vmul.f32 %v991_v62, %v3559_v10 }
 0x78b   :  { %v999_v2 = vadd.f32 %v997_v0, %v918_v63 }
 0x78d   :  { %v1080_v7 = vadd.f32 %v1078_v1, %v999_v2  ;;  %v2860_v2 = vld [vmem:[%s4432_s2 + $0x90] sm:$0xff] }
 0x78f   :  { %v1087_v15 = vadd.f32 %v3008_v58, %v1080_v7  ;;  %v2868_v7 = vld [vmem:[%s4432_s2 + $0xb0] sm:$0xff] }
 0x791   :  { %vm1089_vm15 = vcmp.ge.f32.partialorder %v1087_v15, 0.0  ;;  %v1091_v19 = vmul.f32 0.01, %v1087_v15 }
 0x793   :  { %v1093_v14 = vsel %vm1089_vm15, %v1087_v15, %v1091_v19 }
 0x794   :  { %2834 = vmatmul.msk.f32.vlgmr.msrb.gmra.mxu3 %vm182_vm4, %v1093_v14 }
 0x796   :  { %v832_v29 = vpop.f32.mrf.mxu3 }
 0x797   :  { %v836_v31 = vmul.f32 %v832_v29, %v3557_v9 }
 0x799   :  { %v913_v26 = vpop.f32.mrf.mxu0 }
 0x79a   :  { %v917_v30 = vmul.f32 %v913_v26, %v3555_v8 }
 0x79c   :  { %v919_v36 = vadd.f32 %v917_v30, %v836_v31 }
 0x79e   :  { %v1075_v34 = vpop.f32.mrf.mxu2 }
 0x79f   :  { %v1079_v38 = vmul.f32 %v1075_v34, %v3574_v20 }
 0x7a0   :  { %v994_v35 = vpop.f32.mrf.mxu1 }
 0x7a1   :  { %v998_v37 = vmul.f32 %v994_v35, %v3559_v10 }
 0x7a3   :  { %v1000_v39 = vadd.f32 %v998_v37, %v919_v36  ;;  %v2857_v37 = vld [vmem:[%s4432_s2 + $0x88] sm:$0xff] }
 0x7a5   :  { %v1081_v40 = vadd.f32 %v1079_v38, %v1000_v39 }
 0x7a7   :  { %v1088_v41 = vadd.f32 %v3008_v58, %v1081_v40  ;;  %v2856_v58 = vld [vmem:[%s4432_s2 + $0x80] sm:$0xff] }
 0x7a9   :  { %vm1090_vm0 = vcmp.ge.f32.partialorder %v1088_v41, 0.0  ;;  %v1092_v42 = vmul.f32 0.01, %v1088_v41 }
 0x7ab   :  { %v1094_v43 = vsel %vm1090_vm0, %v1088_v41, %v1092_v42 }
 0x7ac   :  { %2835 = vmatmul.msk.f32.gmra.mxu3 %vm182_vm4, %v1094_v43 }
 0x817   :  { %v1127_v46 = vpop.f32.mrf.mxu3 }
 0x818   :  { %2844 = vmatmul.msk.f32.vlgmr.msra.gmra.mxu0 %vm182_vm4, %v1127_v46  ;;  %2854 = vmatmul.msk.f32.vlgmr.msrb.gmra.mxu1 %vm182_vm4, %v1127_v46 }
 0x82f   :  { %v1130_v47 = vpop.f32.mrf.mxu3 }
 0x830   :  { %2845 = vmatmul.msk.f32.gmra.mxu0 %vm182_vm4, %v1130_v47  ;;  %2855 = vmatmul.msk.f32.gmra.mxu1 %vm182_vm4, %v1130_v47 }
 0x831   :  { %1305 = vmatpush.msra.mxu2 %v1130_v47  ;;  %1386 = vmatpush.msra.mxu3 %v1130_v47 }
 0x832   :  { %1467 = vmatpush.msrb.mxu0 %v1130_v47  ;;  %1548 = vmatpush.msra.mxu1 %v1130_v47 }
 0x833   :  { %1306 = vmatpush.msra.mxu2 %v1127_v46  ;;  %1387 = vmatpush.msra.mxu3 %v1127_v46 }
 0x834   :  { %1468 = vmatpush.msrb.mxu0 %v1127_v46  ;;  %1549 = vmatpush.msra.mxu1 %v1127_v46 }
 0x895   :  { %v1165_v48 = vpop.f32.mrf.mxu0  ;;  %v1197_v50 = vpop.f32.mrf.mxu1 }
 0x896   :  { %1319 = vperm.xlu0 %2993, %v1165_v48   ;;  %1237 = vperm.xlu2 %2992, %v1165_v48  }
 0x89e   :  { %2995 = vset.pattern.permute.xlu0 %v3206_v33  ;;  %2994 = vset.pattern.permute.xlu2 %v3203_v27 }
 0x89f   :  { %1481 = vperm.xlu0 %2995, %v1165_v48   ;;  %1400 = vperm.xlu2 %2994, %v1165_v48  }
 0x8a7   :  { %2996 = vset.pattern.permute.xlu2 %v3204_v28 }
 0x8ad   :  { %v1168_v49 = vpop.f32.mrf.mxu0  ;;  %v1200_v51 = vpop.f32.mrf.mxu1 }
 0x8ae   :  { %1242 = vperm.xlu2 %2996, %v1168_v49  }
 0x8b6   :  { %2997 = vset.pattern.permute.xlu2 %v3205_v32 }
 0x8b7   :  { %1323 = vperm.xlu2 %2997, %v1168_v49  }
 0x8bf   :  { %2998 = vset.pattern.permute.xlu2 %v3203_v27 }
 0x8c0   :  { %1404 = vperm.xlu2 %2998, %v1168_v49  }
 0x8c1   :  { %1203 = vxpose.xlu0.b32.start [1/2] (short) (narrow) %v1197_v50, 8 }
 0x8c8   :  { %2999 = vset.pattern.permute.xlu2 %v3206_v33 }
 0x8c9   :  { %1204 = vxpose.xlu0.b32.end [2/2] (short) (narrow) %v1200_v51, 8  ;;  %1485 = vperm.xlu2 %2999, %v1168_v49   ;;  %v2861_v49 = vld [vmem:[%s4432_s2 + $0x98] sm:$0xff] }
 0x8d1   :  { %3000 = vset.pattern.permute.xlu2 %v3203_v27 }
 0x8f0   :  { %v1238_v52 = vpop.permute.xlu2 %1237 }
 0x8f9   :  { %v1401_v53 = vpop.permute.xlu2 %1400 }
 0x908   :  { %v1243_v54 = vpop.permute.xlu2 %1242  ;;  %v1320_v55 = vpop.permute.xlu0 %1319 }
 0x911   :  { %v1324_v56 = vpop.permute.xlu2 %1323  ;;  %v1482_v59 = vpop.permute.xlu0 %1481 }
 0x91a   :  { %v1405_v60 = vpop.permute.xlu2 %1404 }
 0x923   :  { %v1486_v3 = vpop.permute.xlu2 %1485 }
 0x965   :  { %v1219_v61 = vpop.trf.xlu0 }
 0x966   :  { %v1245_v62 = vperm.slane %v1219_v61, 0  ;;  %v1326_v63 = vperm.slane %v1219_v61, 1  ;;  %v1407_v0 = vperm.slane %v1219_v61, 2  ;;  %v1488_v1 = vperm.slane %v1219_v61, 3 }
 0x968   :  { %v1246_v4 = vadd.f32 %v1245_v62, %v1238_v52  ;;  %v1327_v6 = vadd.f32 %v1326_v63, %v1320_v55  ;;  %v1408_v13 = vadd.f32 %v1407_v0, %v1401_v53  ;;  %v1489_v15 = vadd.f32 %v1488_v1, %v1482_v59  ;;  %v2865_v59 = vld [vmem:[%s4432_s2 + $0xa8] sm:$0xff] }
 0x969   :  { %v1490_v16 = vadd.f32 %v1488_v1, %v1486_v3  ;;  %v1247_v24 = vadd.f32 %v1245_v62, %v1243_v54  ;;  %v1328_v47 = vadd.f32 %v1326_v63, %v1324_v56  ;;  %v1409_v55 = vadd.f32 %v1407_v0, %v1405_v60 }
 0x96a   :  { %v1332_v17 = vadd.f32 %v2860_v2, %v1327_v6  ;;  %v1251_v19 = vadd.f32 %v2856_v58, %v1246_v4  ;;  %v1494_v21 = vadd.f32 %v2868_v7, %v1489_v15  ;;  %v1413_v22 = vadd.f32 %v2864_v11, %v1408_v13 }
 0x96b   :  { %v1495_v14 = vadd.f32 %v2869_v5, %v1490_v16  ;;  %v1252_v44 = vadd.f32 %v2857_v37, %v1247_v24  ;;  %v1333_v53 = vadd.f32 %v2861_v49, %v1328_v47  ;;  %v1414_v63 = vadd.f32 %v2865_v59, %v1409_v55 }
 0x96c   :  { %vm1334_vm1 = vcmp.ge.f32.partialorder %v1332_v17, 0.0  ;;  %v1336_v18 = vmul.f32 0.2, %v1332_v17  ;;  %vm1253_vm3 = vcmp.ge.f32.partialorder %v1251_v19, 0.0  ;;  %v1255_v23 = vmul.f32 0.2, %v1251_v19 }
 0x96d   :  { %vm1496_vm7 = vcmp.ge.f32.partialorder %v1494_v21, 0.0  ;;  %v1498_v25 = vmul.f32 0.2, %v1494_v21  ;;  %vm1415_vm8 = vcmp.ge.f32.partialorder %v1413_v22, 0.0  ;;  %v1417_v30 = vmul.f32 0.2, %v1413_v22 }
 0x96e   :  { %v1338_v26 = vsel %vm1334_vm1, %v1332_v17, %v1336_v18  ;;  %v1257_v29 = vsel %vm1253_vm3, %v1251_v19, %v1255_v23  ;;  %v1499_v31 = vmul.f32 0.2, %v1495_v14  ;;  %vm1497_vm9 = vcmp.ge.f32.partialorder %v1495_v14, 0.0 }
 0x96f   :  { %v1500_v34 = vsel %vm1496_vm7, %v1494_v21, %v1498_v25  ;;  %v1340_v35 = vsel %vm89_vm6, %v1338_v26, -1e+30  ;;  %v1259_v36 = vsel %vm89_vm6, %v1257_v29, -1e+30  ;;  %v1419_v42 = vsel %vm1415_vm8, %v1413_v22, %v1417_v30 }
 0x970   :  { %v3843_v38 = vsel %vm89_vm6, %v1500_v34, -1e+30  ;;  %v1342_v39 = vsel %vm300_vm5, %v1340_v35, -inf  ;;  %v1261_v40 = vsel %vm300_vm5, %v1259_v36, -inf  ;;  %v1501_v43 = vsel %vm1497_vm9, %v1495_v14, %v1499_v31 }
 0x971   :  { %v1504_v41 = vsel %vm300_vm5, %v3843_v38, -inf  ;;  %1343 = vmax.xlane.f32.xlu1 %v1342_v39  ;;  %1262 = vmax.xlane.f32.xlu2 %v1261_v40  ;;  %v1421_v45 = vsel %vm89_vm6, %v1419_v42, -1e+30  ;;  %v3854_v46 = vsel %vm90_vm12, %v1501_v43, -1e+30  ;;  %vm1254_vm10 = vcmp.ge.f32.partialorder %v1252_v44, 0.0 }
 0x972   :  { %1505 = vmax.xlane.f32.xlu0 %v1504_v41  ;;  %v1256_v48 = vmul.f32 0.2, %v1252_v44  ;;  %v1423_v50 = vsel %vm300_vm5, %v1421_v45, -inf  ;;  %v1507_v51 = vsel %vm300_vm5, %v3854_v46, -inf  ;;  %v1337_v56 = vmul.f32 0.2, %v1333_v53 }
 0x973   :  { %vm1335_vm11 = vcmp.ge.f32.partialorder %v1333_v53, 0.0  ;;  %v1418_v2 = vmul.f32 0.2, %v1414_v63  ;;  %vm1416_vm13 = vcmp.ge.f32.partialorder %v1414_v63, 0.0 }
 0x974   :  { %v1258_v52 = vsel %vm1254_vm10, %v1252_v44, %v1256_v48  ;;  %v1339_v62 = vsel %vm1335_vm11, %v1333_v53, %v1337_v56 }
 0x975   :  { %v1260_v54 = vsel %vm90_vm12, %v1258_v52, -1e+30  ;;  %v1341_v1 = vsel %vm90_vm12, %v1339_v62, -1e+30  ;;  %v1420_v60 = vsel %vm1416_vm13, %v1414_v63, %v1418_v2 }
 0x976   :  { %v1264_v61 = vsel %vm300_vm5, %v1260_v54, -inf  ;;  %v1345_v58 = vsel %vm300_vm5, %v1341_v1, -inf  ;;  %v1422_v0 = vsel %vm90_vm12, %v1420_v60, -1e+30 }
 0x977   :  { %v1426_v3 = vsel %vm300_vm5, %v1422_v0, -inf }
 0x979   :  { %1424 = vmax.xlane.f32.xlu1 %v1423_v50  ;;  %1508 = vmax.xlane.f32.xlu2 %v1507_v51 }
 0x981   :  { %1265 = vmax.xlane.f32.xlu1 %v1264_v61 }
 0x989   :  { %1346 = vmax.xlane.f32.xlu1 %v1345_v58 }
 0x991   :  { %1427 = vmax.xlane.f32.xlu1 %v1426_v3 }
 0x9e4   :  { %v1344_v4 = vpop.xlane.xlu1 %1343  ;;  %v1263_v6 = vpop.xlane.xlu2 %1262 }
 0x9e5   :  { %v1348_v7 = vsub.f32 %v1340_v35, %v1344_v4  ;;  %v1267_v11 = vsub.f32 %v1259_v36, %v1263_v6  ;;  %v1506_v34 = vpop.xlane.xlu0 %1505 }
 0x9e6   :  { %v1510_v36 = vsub.f32 %v3843_v38, %v1506_v34  ;;  %v2877_v34 = vld [vmem:[%s4434_s1 + $0xa0] sm:$0xff] }
 0x9e7   :  { %v1350_v5 = vmul.f32 1.442695, %v1348_v7  ;;  %v1269_v13 = vmul.f32 1.442695, %v1267_v11 }
 0x9e8   :  { %v1512_v42 = vmul.f32 1.442695, %v1510_v36  ;;  %v2875_v36 = vld [vmem:[%s4434_s1 + $0x90] sm:$0xff] }
 0x9e9   :  { %3081 = vpow2.f32 %v1350_v5 }
 0x9ea   :  { %3083 = vpow2.f32 %v1269_v13 }
 0x9ec   :  { %v1425_v15 = vpop.xlane.xlu1 %1424  ;;  %v1509_v44 = vpop.xlane.xlu2 %1508 }
 0x9ed   :  { %v1429_v16 = vsub.f32 %v1421_v45, %v1425_v15  ;;  %v1511_v47 = vsub.f32 %v3854_v46, %v1509_v44  ;;  %v2888_v44 = vld [vmem:[%s4429_s8 + $0xe8] sm:$0xff] }
 0x9ef   :  { %v3082_v17 = vpop.eup %3081  ;;  %v1431_v19 = vmul.f32 1.442695, %v1429_v16  ;;  %v1514_v51 = vmul.f32 1.442695, %v1511_v47 }
 0x9f0   :  { %v1354_v21 = vsel %vm89_vm6, %v3082_v17, 0.0  ;;  %v3084_v22 = vpop.eup %3083 }
 0x9f1   :  { %3085 = vpow2.f32 %v1431_v19  ;;  %v1356_v14 = vsel %vm300_vm5, %v1354_v21, 0.0  ;;  %v1273_v18 = vsel %vm89_vm6, %v3084_v22, 0.0 }
 0x9f2   :  { %1357 = vadd.xlane.f32.xlu2 %v1356_v14  ;;  %v1275_v23 = vsel %vm300_vm5, %v1273_v18, 0.0 }
 0x9f3   :  { %1276 = vadd.xlane.f32.xlu1 %v1275_v23 }
 0x9f4   :  { %v1266_v24 = vpop.xlane.xlu1 %1265 }
 0x9f5   :  { %v1268_v25 = vsub.f32 %v1260_v54, %v1266_v24 }
 0x9f7   :  { %v3086_v26 = vpop.eup %3085  ;;  %v1271_v29 = vmul.f32 1.442695, %v1268_v25 }
 0x9f8   :  { %v1435_v30 = vsel %vm89_vm6, %v3086_v26, 0.0 }
 0x9f9   :  { %3087 = vpow2.f32 %v1271_v29  ;;  %v1437_v31 = vsel %vm300_vm5, %v1435_v30, 0.0  ;;  %v2880_v29 = vld [vmem:[%s4434_s1 + $0xb8] sm:$0xff] }
 0x9fa   :  { %1597 = vmatpush.msrb.mxu2 %v2880_v29 }
 0x9fb   :  { %1438 = vadd.xlane.f32.xlu1 %v1437_v31  ;;  %v2878_v31 = vld [vmem:[%s4434_s1 + $0xa8] sm:$0xff] }
 0x9fc   :  { %v1347_v35 = vpop.xlane.xlu1 %1346 }
 0x9fd   :  { %v1349_v37 = vsub.f32 %v1341_v1, %v1347_v35  ;;  %v2876_v35 = vld [vmem:[%s4434_s1 + $0x98] sm:$0xff] }
 0x9ff   :  { %v3088_v39 = vpop.eup %3087  ;;  %v1352_v40 = vmul.f32 1.442695, %v1349_v37  ;;  %v2874_v37 = vld [vmem:[%s4434_s1 + $0x88] sm:$0xff] }
 0xa00   :  { %v1274_v41 = vsel %vm90_vm12, %v3088_v39, 0.0  ;;  %v2873_v39 = vld [vmem:[%s4434_s1 + $0x80] sm:$0xff] }
 0xa01   :  { %3089 = vpow2.f32 %v1352_v40  ;;  %v1278_v43 = vsel %vm300_vm5, %v1274_v41, 0.0  ;;  %v2890_v40 = vld [vmem:[%s4429_s8 + $0xf8] sm:$0xff] }
 0xa02   :  { %3091 = vpow2.f32 %v1512_v42  ;;  %v2889_v42 = vld [vmem:[%s4429_s8 + $0xf0] sm:$0xff]  ;;  %1635 = vmatpush.msrb.mxu3 %v2890_v40 }
 0xa03   :  { %1279 = vadd.xlane.f32.xlu1 %v1278_v43  ;;  %v2899_v43 = vld [vmem:[%s4430_s5 + $0xf0] sm:$0xff] }
 0xa04   :  { %v1428_v45 = vpop.xlane.xlu1 %1427  ;;  %1636 = vmatpush.msrb.mxu3 %v2889_v42 }
 0xa05   :  { %v1430_v48 = vsub.f32 %v1422_v0, %v1428_v45  ;;  %v2898_v45 = vld [vmem:[%s4430_s5 + $0xe8] sm:$0xff] }
 0xa06   :  { %1637 = vmatpush.msrb.mxu3 %v2888_v44 }
 0xa07   :  { %v3090_v49 = vpop.eup %3089  ;;  %v1433_v50 = vmul.f32 1.442695, %v1430_v48 }
 0xa08   :  { %v1355_v38 = vsel %vm90_vm12, %v3090_v49, 0.0  ;;  %v3092_v53 = vpop.eup %3091  ;;  %v2887_v49 = vld [vmem:[%s4429_s8 + $0xe0] sm:$0xff] }
 0xa09   :  { %3093 = vpow2.f32 %v1433_v50  ;;  %v1359_v52 = vsel %vm300_vm5, %v1355_v38, 0.0  ;;  %v1516_v54 = vsel %vm89_vm6, %v3092_v53, 0.0  ;;  %v2897_v50 = vld [vmem:[%s4430_s5 + $0xe0] sm:$0xff]  ;;  %1638 = vmatpush.msrb.mxu3 %v2887_v49 }
 0xa0a   :  { %1360 = vadd.xlane.f32.xlu2 %v1359_v52  ;;  %3095 = vpow2.f32 %v1514_v51  ;;  %v1518_v56 = vsel %vm300_vm5, %v1516_v54, 0.0  ;;  %v2896_v51 = vld [vmem:[%s4430_s5 + $0xd8] sm:$0xff] }
 0xa0f   :  { %v3094_v55 = vpop.eup %3093 }
 0xa10   :  { %v1436_v46 = vsel %vm90_vm12, %v3094_v55, 0.0  ;;  %v3096_v61 = vpop.eup %3095  ;;  %v2885_v55 = vld [vmem:[%s4429_s8 + $0xd0] sm:$0xff] }
 0xa11   :  { %v1440_v59 = vsel %vm300_vm5, %v1436_v46, 0.0  ;;  %v1517_v62 = vsel %vm90_vm12, %v3096_v61, 0.0 }
 0xa12   :  { %1519 = vadd.xlane.f32.xlu2 %v1518_v56  ;;  %1441 = vadd.xlane.f32.xlu1 %v1440_v59  ;;  %v1521_v63 = vsel %vm300_vm5, %v1517_v62, 0.0  ;;  %v2884_v56 = vld [vmem:[%s4429_s8 + $0xc8] sm:$0xff] }
 0xa13   :  { %v2894_v59 = vld [vmem:[%s4430_s5 + $0xc8] sm:$0xff] }
 0xa1a   :  { %1522 = vadd.xlane.f32.xlu2 %v1521_v63 }
 0xa65   :  { %v1358_v1 = vpop.xlane.xlu2 %1357 }
 0xa66   :  { %3097 = vrcp.f32 %v1358_v1  ;;  %v1277_v2 = vpop.xlane.xlu1 %1276 }
 0xa67   :  { %3099 = vrcp.f32 %v1277_v2 }
 0xa6c   :  { %v3098_v58 = vpop.eup %3097 }
 0xa6d   :  { %v1364_v60 = vmul.f32 %v3098_v58, %v1354_v21  ;;  %v3100_v0 = vpop.eup %3099 }
 0xa6e   :  { %v1283_v3 = vmul.f32 %v3100_v0, %v1273_v18  ;;  %v1439_v4 = vpop.xlane.xlu1 %1438 }
 0xa6f   :  { %2862 = vmatmul.msk.f32.vlgmr.msra.gmra.mxu3 %vm300_vm5, %v1364_v60  ;;  %3101 = vrcp.f32 %v1439_v4 }
 0xa70   :  { %2858 = vmatmul.msk.f32.vlgmr.msra.gmra.mxu2 %vm300_vm5, %v1283_v3  ;;  %v3009_v3 = vld [vmem:[%s4436_s3 + $0x2] ss:$0 sm:$0xff] }
 0xa75   :  { %v3102_v6 = vpop.eup %3101 }
 0xa76   :  { %v1445_v7 = vmul.f32 %v3102_v6, %v1435_v30  ;;  %v1280_v11 = vpop.xlane.xlu1 %1279  ;;  %v2879_v30 = vld [vmem:[%s4434_s1 + $0xb0] sm:$0xff] }
 0xa77   :  { %3103 = vrcp.f32 %v1280_v11  ;;  %1598 = vmatpush.msrb.mxu2 %v2879_v30 }
 0xa78   :  { %2866 = vmatmul.msk.f32.vlgmr.msrb.gmra.mxu0 %vm300_vm5, %v1445_v7 }
 0xa79   :  { %1599 = vmatpush.msrb.mxu2 %v2878_v31 }
 0xa7b   :  { %1600 = vmatpush.msrb.mxu2 %v2877_v34 }
 0xa7d   :  { %v1361_v5 = vpop.xlane.xlu2 %1360  ;;  %v3104_v13 = vpop.eup %3103  ;;  %1601 = vmatpush.msrb.mxu2 %v2876_v35 }
 0xa7e   :  { %3105 = vrcp.f32 %v1361_v5  ;;  %v1284_v15 = vmul.f32 %v3104_v13, %v1274_v41  ;;  %v2900_v41 = vld [vmem:[%s4430_s5 + $0xf8] sm:$0xff] }
 0xa7f   :  { %1602 = vmatpush.msrb.mxu2 %v2875_v36  ;;  %1667 = vmatpush.msra.mxu0 %v2900_v41 }
 0xa80   :  { %2859 = vmatmul.msk.f32.gmra.mxu2 %vm300_vm5, %v1284_v15 }
 0xa81   :  { %1603 = vmatpush.msrb.mxu2 %v2874_v37  ;;  %1668 = vmatpush.msra.mxu0 %v2899_v43 }
 0xa83   :  { %1604 = vmatpush.msrb.mxu2 %v2873_v39  ;;  %1669 = vmatpush.msra.mxu0 %v2898_v45  ;;  %v2911_v45 = vld [vmem:[%s4432_s2 + $0xe0] sm:$0xff] }
 0xa84   :  { %v3106_v16 = vpop.eup %3105 }
 0xa85   :  { %v1442_v17 = vpop.xlane.xlu1 %1441  ;;  %v1520_v19 = vpop.xlane.xlu2 %1519  ;;  %v1365_v21 = vmul.f32 %v3106_v16, %v1355_v38  ;;  %v2886_v38 = vld [vmem:[%s4429_s8 + $0xd8] sm:$0xff]  ;;  %1670 = vmatpush.msra.mxu0 %v2897_v50 }
 0xa86   :  { %3107 = vrcp.f32 %v1442_v17  ;;  %1639 = vmatpush.msrb.mxu3 %v2886_v38 }
 0xa87   :  { %3109 = vrcp.f32 %v1520_v19  ;;  %2863 = vmatmul.msk.f32.gmra.mxu3 %vm300_vm5, %v1365_v21  ;;  %1671 = vmatpush.msra.mxu0 %v2896_v51 }
 0xa88   :  { %1640 = vmatpush.msrb.mxu3 %v2885_v55 }
 0xa8a   :  { %1641 = vmatpush.msrb.mxu3 %v2884_v56 }
 0xa8c   :  { %v3108_v22 = vpop.eup %3107 }
 0xa8d   :  { %v3110_v14 = vpop.eup %3109  ;;  %v1523_v18 = vpop.xlane.xlu2 %1522  ;;  %v1446_v23 = vmul.f32 %v3108_v22, %v1436_v46  ;;  %v2895_v46 = vld [vmem:[%s4430_s5 + $0xd0] sm:$0xff] }
 0xa8e   :  { %v1526_v24 = vmul.f32 %v3110_v14, %v1516_v54  ;;  %3111 = vrcp.f32 %v1523_v18  ;;  %1672 = vmatpush.msra.mxu0 %v2895_v46 }
 0xa8f   :  { %2867 = vmatmul.msk.f32.gmra.mxu0 %vm300_vm5, %v1446_v23 }
 0xa90   :  { %2870 = vmatmul.msk.f32.vlgmr.msra.gmra.mxu1 %vm300_vm5, %v1526_v24  ;;  %1673 = vmatpush.msra.mxu0 %v2894_v59  ;;  %v2883_v24 = vld [vmem:[%s4429_s8 + $0xc0] sm:$0xff] }
 0xa91   :  { %1642 = vmatpush.msrb.mxu3 %v2883_v24 }
 0xa94   :  { %v3112_v25 = vpop.eup %3111 }
 0xa95   :  { %v1527_v26 = vmul.f32 %v3112_v25, %v1517_v62  ;;  %v2893_v25 = vld [vmem:[%s4430_s5 + $0xc0] sm:$0xff]  ;;  %s4437_s5 = sld [smem:[#allocation7_spill]] }
 0xa96   :  { %1674 = vmatpush.msra.mxu0 %v2893_v25 }
 0xa98   :  { %2871 = vmatmul.msk.f32.gmra.mxu1 %vm300_vm5, %v1527_v26 }
 0xaf2   :  { %v1389_v48 = vpop.f32.mrf.mxu3 }
 0xaf3   :  { %v1308_v47 = vpop.f32.mrf.mxu2  ;;  %v1395_v53 = vmul.f32 %v1389_v48, %v3555_v8  ;;  %v2903_v48 = vld [vmem:[%s4432_s2 + $0xc0] sm:$0xff] }
 0xaf4   :  { %v1314_v52 = vmul.f32 %v1308_v47, %v3557_v9  ;;  %v2912_v47 = vld [vmem:[%s4432_s2 + $0xe8] sm:$0xff] }
 0xaf5   :  { %v1470_v54 = vpop.f32.mrf.mxu0 }
 0xaf6   :  { %v1397_v61 = vadd.f32 %v1395_v53, %v1314_v52  ;;  %v1476_v62 = vmul.f32 %v1470_v54, %v3559_v10 }
 0xaf8   :  { %v1478_v58 = vadd.f32 %v1476_v62, %v1397_v61 }
 0xb03   :  { %v1311_v1 = vpop.f32.mrf.mxu2 }
 0xb04   :  { %v1315_v6 = vmul.f32 %v1311_v1, %v3557_v9 }
 0xb0a   :  { %v1392_v63 = vpop.f32.mrf.mxu3 }
 0xb0b   :  { %v1396_v60 = vmul.f32 %v1392_v63, %v3555_v8 }
 0xb0c   :  { %v1473_v4 = vpop.f32.mrf.mxu0 }
 0xb0d   :  { %v1551_v2 = vpop.f32.mrf.mxu1  ;;  %v1398_v11 = vadd.f32 %v1396_v60, %v1315_v6  ;;  %v1477_v5 = vmul.f32 %v1473_v4, %v3559_v10 }
 0xb0e   :  { %v1557_v0 = vmul.f32 %v1551_v2, %v3574_v20 }
 0xb0f   :  { %v1479_v17 = vadd.f32 %v1477_v5, %v1398_v11 }
 0xb10   :  { %v1559_v7 = vadd.f32 %v1557_v0, %v1478_v58  ;;  %v2904_v58 = vld [vmem:[%s4432_s2 + $0xc8] sm:$0xff] }
 0xb12   :  { %v1566_v13 = vadd.f32 %v3009_v3, %v1559_v7 }
 0xb14   :  { %v1570_v15 = vmul.f32 0.01, %v1566_v13  ;;  %vm1568_vm14 = vcmp.ge.f32.partialorder %v1566_v13, 0.0 }
 0xb15   :  { %v1554_v16 = vpop.f32.mrf.mxu1 }
 0xb16   :  { %v1558_v19 = vmul.f32 %v1554_v16, %v3574_v20  ;;  %v1572_v21 = vsel %vm1568_vm14, %v1566_v13, %v1570_v15 }
 0xb17   :  { %2881 = vmatmul.msk.f32.vlgmr.msrb.gmra.mxu2 %vm182_vm4, %v1572_v21 }
 0xb18   :  { %v1560_v22 = vadd.f32 %v1558_v19, %v1479_v17 }
 0xb1a   :  { %v1567_v14 = vadd.f32 %v3009_v3, %v1560_v22  ;;  %v2908_v3 = vld [vmem:[%s4432_s2 + $0xd8] sm:$0xff] }
 0xb1c   :  { %vm1569_vm15 = vcmp.ge.f32.partialorder %v1567_v14, 0.0  ;;  %v1571_v18 = vmul.f32 0.01, %v1567_v14 }
 0xb1e   :  { %v1573_v23 = vsel %vm1569_vm15, %v1567_v14, %v1571_v18  ;;  %v2915_v18 = vld [vmem:[%s4432_s2 + $0xf0] sm:$0xff] }
 0xb1f   :  { %2882 = vmatmul.msk.f32.gmra.mxu2 %vm182_vm4, %v1573_v23 }
 0xb9a   :  { %v1606_v26 = vpop.f32.mrf.mxu2 }
 0xb9b   :  { %2891 = vmatmul.msk.f32.vlgmr.msrb.gmra.mxu3 %vm182_vm4, %v1606_v26  ;;  %2901 = vmatmul.msk.f32.vlgmr.msra.gmra.mxu0 %vm182_vm4, %v1606_v26 }
 0xba2   :  { %v1609_v29 = vpop.f32.mrf.mxu2 }
 0xba3   :  { %2892 = vmatmul.msk.f32.gmra.mxu3 %vm182_vm4, %v1609_v29  ;;  %2902 = vmatmul.msk.f32.gmra.mxu0 %vm182_vm4, %v1609_v29 }
 0xba4   :  { %1784 = vmatpush.msrb.mxu1 %v1609_v29  ;;  %1865 = vmatpush.msra.mxu2 %v1609_v29 }
 0xba5   :  { %1946 = vmatpush.msra.mxu3 %v1609_v29  ;;  %2027 = vmatpush.msrb.mxu0 %v1609_v29 }
 0xba6   :  { %1785 = vmatpush.msrb.mxu1 %v1606_v26  ;;  %1866 = vmatpush.msra.mxu2 %v1606_v26 }
 0xba7   :  { %1947 = vmatpush.msra.mxu3 %v1606_v26  ;;  %2028 = vmatpush.msrb.mxu0 %v1606_v26 }
 0xc18   :  { %v1676_v34 = vpop.f32.mrf.mxu0 }
 0xc1e   :  { %v1644_v30 = vpop.f32.mrf.mxu3 }
 0xc1f   :  { %1879 = vperm.xlu2 %3000, %v1644_v30   ;;  %1798 = vperm.xlu1 %2990, %v1644_v30  }
 0xc20   :  { %v1679_v35 = vpop.f32.mrf.mxu0 }
 0xc26   :  { %v1647_v31 = vpop.f32.mrf.mxu3 }
 0xc27   :  { %3002 = vset.pattern.permute.xlu2 %v3205_v32  ;;  %3001 = vset.pattern.permute.xlu1 %v3204_v28 }
 0xc28   :  { %1716 = vperm.xlu1 %3001, %v1644_v30   ;;  %1802 = vperm.xlu2 %3002, %v1647_v31  }
 0xc30   :  { %3004 = vset.pattern.permute.xlu1 %v3203_v27  ;;  %3003 = vset.pattern.permute.xlu2 %v3206_v33  ;;  %v2907_v33 = vld [vmem:[%s4432_s2 + $0xd0] sm:$0xff] }
 0xc31   :  { %1883 = vperm.xlu1 %3004, %v1647_v31   ;;  %1960 = vperm.xlu2 %3003, %v1644_v30  }
 0xc39   :  { %3005 = vset.pattern.permute.xlu1 %v3204_v28  ;;  %1964 = vperm.xlu2 %3003, %v1647_v31  }
 0xc3a   :  { %1721 = vperm.xlu1 %3005, %v1647_v31  }
 0xc6f   :  { %1682 = vxpose.xlu1.b32.start [1/2] (short) (narrow) %v1676_v34, 8 }
 0xc77   :  { %1683 = vxpose.xlu1.b32.end [2/2] (short) (narrow) %v1679_v35, 8 }
 0xc79   :  { %v1880_v40 = vpop.permute.xlu2 %1879 }
 0xc82   :  { %v1803_v38 = vpop.permute.xlu2 %1802 }
 0xc8b   :  { %v1961_v15 = vpop.permute.xlu2 %1960 }
 0xc91   :  { %v1799_v36 = vpop.permute.xlu1 %1798 }
 0xc93   :  { %v1965_v30 = vpop.permute.xlu2 %1964 }
 0xc9a   :  { %v1717_v32 = vpop.permute.xlu1 %1716 }
 0xca3   :  { %v1884_v37 = vpop.permute.xlu1 %1883 }
 0xcac   :  { %v1722_v39 = vpop.permute.xlu1 %1721 }
 0xd13   :  { %v1698_v41 = vpop.trf.xlu1 }
 0xd14   :  { %v1724_v42 = vperm.slane %v1698_v41, 0  ;;  %v1805_v27 = vperm.slane %v1698_v41, 1  ;;  %v1886_v43 = vperm.slane %v1698_v41, 2  ;;  %v1967_v11 = vperm.slane %v1698_v41, 3 }
 0xd16   :  { %v1725_v28 = vadd.f32 %v1724_v42, %v1717_v32  ;;  %v1806_v44 = vadd.f32 %v1805_v27, %v1799_v36  ;;  %v1887_v49 = vadd.f32 %v1886_v43, %v1880_v40  ;;  %v1888_v50 = vadd.f32 %v1886_v43, %v1884_v37  ;;  %v2916_v32 = vld [vmem:[%s4432_s2 + $0xf8] sm:$0xff] }
 0xd17   :  { %v1726_v56 = vadd.f32 %v1724_v42, %v1722_v39  ;;  %v1807_v59 = vadd.f32 %v1805_v27, %v1803_v38  ;;  %v1968_v21 = vadd.f32 %v1967_v11, %v1961_v15  ;;  %v1969_v34 = vadd.f32 %v1967_v11, %v1965_v30 }
 0xd18   :  { %v1811_v51 = vadd.f32 %v2907_v33, %v1806_v44  ;;  %v1892_v52 = vadd.f32 %v2911_v45, %v1887_v49  ;;  %v1893_v53 = vadd.f32 %v2912_v47, %v1888_v50  ;;  %v1730_v54 = vadd.f32 %v2903_v48, %v1725_v28 }
 0xd19   :  { %v1731_v7 = vadd.f32 %v2904_v58, %v1726_v56  ;;  %v1812_v13 = vadd.f32 %v2908_v3, %v1807_v59  ;;  %v1973_v26 = vadd.f32 %v2915_v18, %v1968_v21  ;;  %v1974_v40 = vadd.f32 %v2916_v32, %v1969_v34 }
 0xd1a   :  { %vm1813_vm0 = vcmp.ge.f32.partialorder %v1811_v51, 0.0  ;;  %v1815_v55 = vmul.f32 0.2, %v1811_v51  ;;  %vm1894_vm1 = vcmp.ge.f32.partialorder %v1892_v52, 0.0  ;;  %v1896_v46 = vmul.f32 0.2, %v1892_v52 }
 0xd1b   :  { %v1897_v62 = vmul.f32 0.2, %v1893_v53  ;;  %vm1895_vm3 = vcmp.ge.f32.partialorder %v1893_v53, 0.0  ;;  %v1734_v2 = vmul.f32 0.2, %v1730_v54  ;;  %vm1732_vm7 = vcmp.ge.f32.partialorder %v1730_v54, 0.0 }
 0xd1c   :  { %v1817_v61 = vsel %vm1813_vm0, %v1811_v51, %v1815_v55  ;;  %v1898_v1 = vsel %vm1894_vm1, %v1892_v52, %v1896_v46  ;;  %v1735_v19 = vmul.f32 0.2, %v1731_v7  ;;  %vm1733_vm8 = vcmp.ge.f32.partialorder %v1731_v7, 0.0 }
 0xd1d   :  { %v1819_v63 = vsel %vm89_vm6, %v1817_v61, -1e+30  ;;  %v1900_v0 = vsel %vm89_vm6, %v1898_v1, -1e+30  ;;  %v1899_v6 = vsel %vm1895_vm3, %v1893_v53, %v1897_v62  ;;  %v1736_v5 = vsel %vm1732_vm7, %v1730_v54, %v1734_v2 }
 0xd1e   :  { %v1821_v60 = vsel %vm300_vm5, %v1819_v63, -inf  ;;  %v1902_v4 = vsel %vm300_vm5, %v1900_v0, -inf  ;;  %v1901_v16 = vsel %vm90_vm12, %v1899_v6, -1e+30  ;;  %v1738_v17 = vsel %vm89_vm6, %v1736_v5, -1e+30 }
 0xd1f   :  { %1822 = vmax.xlane.f32.xlu2 %v1821_v60  ;;  %1903 = vmax.xlane.f32.xlu0 %v1902_v4  ;;  %v1816_v22 = vmul.f32 0.2, %v1812_v13  ;;  %v1905_v14 = vsel %vm300_vm5, %v1901_v16, -inf  ;;  %vm1814_vm9 = vcmp.ge.f32.partialorder %v1812_v13, 0.0  ;;  %v1740_v23 = vsel %vm300_vm5, %v1738_v17, -inf }
 0xd20   :  { %v1737_v24 = vsel %vm1733_vm8, %v1731_v7, %v1735_v19  ;;  %v1977_v35 = vmul.f32 0.2, %v1973_v26  ;;  %vm1975_vm10 = vcmp.ge.f32.partialorder %v1973_v26, 0.0  ;;  %v1978_v42 = vmul.f32 0.2, %v1974_v40 }
 0xd21   :  { %v1818_v25 = vsel %vm1814_vm9, %v1812_v13, %v1816_v22  ;;  %v1739_v29 = vsel %vm90_vm12, %v1737_v24, -1e+30  ;;  %vm1976_vm11 = vcmp.ge.f32.partialorder %v1974_v40, 0.0 }
 0xd22   :  { %v1820_v31 = vsel %vm90_vm12, %v1818_v25, -1e+30  ;;  %v1743_v36 = vsel %vm300_vm5, %v1739_v29, -inf  ;;  %v1979_v39 = vsel %vm1975_vm10, %v1973_v26, %v1977_v35  ;;  %v1980_v43 = vsel %vm1976_vm11, %v1974_v40, %v1978_v42 }
 0xd23   :  { %v1824_v37 = vsel %vm300_vm5, %v1820_v31, -inf  ;;  %v1981_v41 = vsel %vm89_vm6, %v1979_v39, -1e+30  ;;  %v1982_v33 = vsel %vm90_vm12, %v1980_v43, -1e+30 }
 0xd24   :  { %v1983_v27 = vsel %vm300_vm5, %v1981_v41, -inf  ;;  %v1986_v28 = vsel %vm300_vm5, %v1982_v33, -inf }
 0xd27   :  { %1906 = vmax.xlane.f32.xlu2 %v1905_v14  ;;  %1741 = vmax.xlane.f32.xlu0 %v1740_v23 }
 0xd2f   :  { %1744 = vmax.xlane.f32.xlu2 %v1743_v36  ;;  %1825 = vmax.xlane.f32.xlu0 %v1824_v37 }
 0xd37   :  { %1984 = vmax.xlane.f32.xlu0 %v1983_v27 }
 0xd3f   :  { %1987 = vmax.xlane.f32.xlu0 %v1986_v28 }
 0xd92   :  { %v1823_v44 = vpop.xlane.xlu2 %1822  ;;  %v1904_v45 = vpop.xlane.xlu0 %1903 }
 0xd93   :  { %v1827_v47 = vsub.f32 %v1819_v63, %v1823_v44  ;;  %v1908_v48 = vsub.f32 %v1900_v0, %v1904_v45 }
 0xd95   :  { %v1829_v49 = vmul.f32 1.442695, %v1827_v47  ;;  %v1910_v50 = vmul.f32 1.442695, %v1908_v48 }
 0xd97   :  { %3113 = vpow2.f32 %v1829_v49 }
 0xd98   :  { %3115 = vpow2.f32 %v1910_v50 }
 0xd9a   :  { %v1907_v38 = vpop.xlane.xlu2 %1906  ;;  %v1742_v51 = vpop.xlane.xlu0 %1741 }
 0xd9b   :  { %v1909_v52 = vsub.f32 %v1901_v16, %v1907_v38  ;;  %v1746_v53 = vsub.f32 %v1738_v17, %v1742_v51 }
 0xd9d   :  { %v3114_v54 = vpop.eup %3113  ;;  %v1912_v55 = vmul.f32 1.442695, %v1909_v52  ;;  %v1748_v56 = vmul.f32 1.442695, %v1746_v53 }
 0xd9e   :  { %v3116_v46 = vpop.eup %3115  ;;  %v1833_v59 = vsel %vm89_vm6, %v3114_v54, 0.0 }
 0xd9f   :  { %3117 = vpow2.f32 %v1912_v55  ;;  %v1914_v61 = vsel %vm89_vm6, %v3116_v46, 0.0  ;;  %v1835_v62 = vsel %vm300_vm5, %v1833_v59, 0.0  ;;  %v2060_v46 = vld [vmem:[%s4388_s12 + $0x38] sm:$0xff] }
 0xda0   :  { %3119 = vpow2.f32 %v1748_v56  ;;  %v1916_v63 = vsel %vm300_vm5, %v1914_v61, 0.0  ;;  %1836 = vadd.xlane.f32.xlu2 %v1835_v62  ;;  %v2101_v56 = vld [vmem:[%s4389_s13 + $0x38] sm:$0xff]  ;;  %2079 = vmatpush.msra.mxu1 %v2060_v46  ;;  %v2100_v62 = vld [vmem:[%s4389_s13 + $0x30] sm:$0xff]  ;;  %v3013_v46 = vld [vmem:[%s4393_s17] ss:$0 sm:$0xff] }
 0xda1   :  { %1917 = vadd.xlane.f32.xlu0 %v1916_v63  ;;  %2114 = vmatpush.msrb.mxu2 %v2101_v56  ;;  %v2135_v63 = vld [vmem:[%s4390_s14 + $0x30] sm:$0xff] }
 0xda2   :  { %v1745_v1 = vpop.xlane.xlu2 %1744  ;;  %v1826_v2 = vpop.xlane.xlu0 %1825 }
 0xda3   :  { %v1747_v58 = vsub.f32 %v1739_v29, %v1745_v1  ;;  %v1828_v60 = vsub.f32 %v1820_v31, %v1826_v2  ;;  %2115 = vmatpush.msrb.mxu2 %v2100_v62  ;;  %v2058_v1 = vld [vmem:[%s4388_s12 + $0x28] sm:$0xff] }
 0xda4   :  { %v2099_v2 = vld [vmem:[%s4389_s13 + $0x28] sm:$0xff] }
 0xda5   :  { %v3118_v0 = vpop.eup %3117  ;;  %v1750_v3 = vmul.f32 1.442695, %v1747_v58  ;;  %v1831_v6 = vmul.f32 1.442695, %v1828_v60  ;;  %v2134_v58 = vld [vmem:[%s4390_s14 + $0x28] sm:$0xff]  ;;  %2116 = vmatpush.msrb.mxu2 %v2099_v2  ;;  %v2057_v60 = vld [vmem:[%s4388_s12 + $0x20] sm:$0xff] }
 0xda6   :  { %v3120_v4 = vpop.eup %3119  ;;  %v1915_v7 = vsel %vm90_vm12, %v3118_v0, 0.0  ;;  %v2098_v0 = vld [vmem:[%s4389_s13 + $0x20] sm:$0xff] }
 0xda7   :  { %3121 = vpow2.f32 %v1750_v3  ;;  %v1752_v11 = vsel %vm89_vm6, %v3120_v4, 0.0  ;;  %v1919_v5 = vsel %vm300_vm5, %v1915_v7, 0.0  ;;  %v2133_v3 = vld [vmem:[%s4390_s14 + $0x20] sm:$0xff]  ;;  %2117 = vmatpush.msrb.mxu2 %v2098_v0  ;;  %v2056_v4 = vld [vmem:[%s4388_s12 + $0x18] sm:$0xff] }
 0xda8   :  { %3123 = vpow2.f32 %v1831_v6  ;;  %v1754_v13 = vsel %vm300_vm5, %v1752_v11, 0.0  ;;  %v2097_v6 = vld [vmem:[%s4389_s13 + $0x18] sm:$0xff] }
 0xda9   :  { %1755 = vadd.xlane.f32.xlu1 %v1754_v13  ;;  %1920 = vadd.xlane.f32.xlu0 %v1919_v5  ;;  %v2096_v5 = vld [vmem:[%s4389_s13 + $0x10] sm:$0xff] }
 0xdaa   :  { %v1985_v15 = vpop.xlane.xlu0 %1984  ;;  %2118 = vmatpush.msrb.mxu2 %v2097_v6  ;;  %v2131_v13 = vld [vmem:[%s4390_s14 + $0x10] sm:$0xff] }
 0xdab   :  { %v1989_v16 = vsub.f32 %v1981_v41, %v1985_v15  ;;  %v2054_v15 = vld [vmem:[%s4388_s12 + $0x8] sm:$0xff] }
 0xdac   :  { %2119 = vmatpush.msrb.mxu2 %v2096_v5 }
 0xdad   :  { %v3122_v17 = vpop.eup %3121  ;;  %v1991_v21 = vmul.f32 1.442695, %v1989_v16  ;;  %v2095_v16 = vld [vmem:[%s4389_s13 + $0x8] sm:$0xff] }
 0xdae   :  { %v3124_v19 = vpop.eup %3123  ;;  %v1753_v22 = vsel %vm90_vm12, %v3122_v17, 0.0  ;;  %v2130_v17 = vld [vmem:[%s4390_s14 + $0x8] sm:$0xff]  ;;  %2120 = vmatpush.msrb.mxu2 %v2095_v16 }
 0xdaf   :  { %v1834_v14 = vsel %vm90_vm12, %v3124_v19, 0.0  ;;  %v1757_v18 = vsel %vm300_vm5, %v1753_v22, 0.0  ;;  %3125 = vpow2.f32 %v1991_v21  ;;  %v2053_v19 = vld [vmem:[%s4388_s12] sm:$0xff] }
 0xdb0   :  { %v1838_v23 = vsel %vm300_vm5, %v1834_v14, 0.0  ;;  %v2094_v21 = vld [vmem:[%s4389_s13] sm:$0xff] }
 0xdb1   :  { %1839 = vadd.xlane.f32.xlu2 %v1838_v23  ;;  %1758 = vadd.xlane.f32.xlu0 %v1757_v18 }
 0xdb2   :  { %v1988_v24 = vpop.xlane.xlu0 %1987  ;;  %2121 = vmatpush.msrb.mxu2 %v2094_v21  ;;  %v4204_v21 = vld [vmem:[%s4437_s5 + $0x8] sm:$0xff] }
 0xdb3   :  { %v1990_v25 = vsub.f32 %v1982_v33, %v1988_v24  ;;  %vm94_vm14 = vcmp.gt.f32.partialorder %v4204_v21, 0.0 }
 0xdb5   :  { %v3126_v26 = vpop.eup %3125  ;;  %v1993_v29 = vmul.f32 1.442695, %v1990_v25 }
 0xdb6   :  { %v1995_v30 = vsel %vm89_vm6, %v3126_v26, 0.0 }
 0xdb7   :  { %3127 = vpow2.f32 %v1993_v29  ;;  %v1997_v31 = vsel %vm300_vm5, %v1995_v30, 0.0 }
 0xdb9   :  { %1998 = vadd.xlane.f32.xlu2 %v1997_v31 }
 0xdbd   :  { %v3128_v34 = vpop.eup %3127 }
 0xdbe   :  { %v1996_v35 = vsel %vm90_vm12, %v3128_v34, 0.0 }
 0xdbf   :  { %v2000_v36 = vsel %vm300_vm5, %v1996_v35, 0.0 }
 0xdc1   :  { %2001 = vadd.xlane.f32.xlu2 %v2000_v36 }
 0xe13   :  { %v1837_v32 = vpop.xlane.xlu2 %1836 }
 0xe14   :  { %v1918_v37 = vpop.xlane.xlu0 %1917  ;;  %3129 = vrcp.f32 %v1837_v32 }
 0xe15   :  { %3131 = vrcp.f32 %v1918_v37  ;;  %v3010_v37 = vld [vmem:[%s4436_s3 + $0x3] ss:$0 sm:$0xff] }
 0xe1a   :  { %v3130_v39 = vpop.eup %3129 }
 0xe1b   :  { %v3132_v40 = vpop.eup %3131  ;;  %v1843_v41 = vmul.f32 %v3130_v39, %v1833_v59  ;;  %v2136_v59 = vld [vmem:[%s4390_s14 + $0x38] sm:$0xff] }
 0xe1c   :  { %v1924_v57 = vmul.f32 %v3132_v40, %v1914_v61  ;;  %v1756_v42 = vpop.xlane.xlu1 %1755  ;;  %v1921_v27 = vpop.xlane.xlu0 %1920  ;;  %v2059_v61 = vld [vmem:[%s4388_s12 + $0x30] sm:$0xff]  ;;  %2149 = vmatpush.msrb.mxu3 %v2136_v59 }
 0xe1d   :  { %3133 = vrcp.f32 %v1756_v42  ;;  %2909 = vmatmul.msk.f32.vlgmr.msra.gmra.mxu2 %vm300_vm5, %v1843_v41  ;;  %2080 = vmatpush.msra.mxu1 %v2059_v61 }
 0xe1e   :  { %3135 = vrcp.f32 %v1921_v27  ;;  %2913 = vmatmul.msk.f32.vlgmr.msra.gmra.mxu3 %vm300_vm5, %v1924_v57 }
 0xe1f   :  { %2150 = vmatpush.msrb.mxu3 %v2135_v63  ;;  %2081 = vmatpush.msra.mxu1 %v2058_v1 }
 0xe21   :  { %2151 = vmatpush.msrb.mxu3 %v2134_v58  ;;  %2082 = vmatpush.msra.mxu1 %v2057_v60 }
 0xe23   :  { %v3134_v12 = vpop.eup %3133  ;;  %2152 = vmatpush.msrb.mxu3 %v2133_v3  ;;  %2083 = vmatpush.msra.mxu1 %v2056_v4 }
 0xe24   :  { %v3136_v43 = vpop.eup %3135  ;;  %v1762_v33 = vmul.f32 %v3134_v12, %v1752_v11  ;;  %v1759_v28 = vpop.xlane.xlu0 %1758  ;;  %v2055_v11 = vld [vmem:[%s4388_s12 + $0x10] sm:$0xff] }
 0xe25   :  { %v1840_v44 = vpop.xlane.xlu2 %1839  ;;  %3137 = vrcp.f32 %v1759_v28  ;;  %v1925_v45 = vmul.f32 %v3136_v43, %v1915_v7  ;;  %v2132_v7 = vld [vmem:[%s4390_s14 + $0x18] sm:$0xff]  ;;  %2084 = vmatpush.msra.mxu1 %v2055_v11  ;;  %v4193_v11 = vld [vmem:[%s4437_s5] sm:$0xff] }
 0xe26   :  { %3139 = vrcp.f32 %v1840_v44  ;;  %2905 = vmatmul.msk.f32.vlgmr.msrb.gmra.mxu1 %vm300_vm5, %v1762_v33  ;;  %2153 = vmatpush.msrb.mxu3 %v2132_v7  ;;  %vm93_vm13 = vcmp.gt.f32.partialorder %v4193_v11, 0.0 }
 0xe27   :  { %2914 = vmatmul.msk.f32.gmra.mxu3 %vm300_vm5, %v1925_v45  ;;  %2085 = vmatpush.msra.mxu1 %v2054_v15 }
 0xe28   :  { %2154 = vmatpush.msrb.mxu3 %v2131_v13 }
 0xe29   :  { %2086 = vmatpush.msra.mxu1 %v2053_v19 }
 0xe2a   :  { %2155 = vmatpush.msrb.mxu3 %v2130_v17 }
 0xe2b   :  { %v3138_v47 = vpop.eup %3137 }
 0xe2c   :  { %v3140_v48 = vpop.eup %3139  ;;  %v1763_v50 = vmul.f32 %v3138_v47, %v1753_v22  ;;  %v2129_v22 = vld [vmem:[%s4390_s14] sm:$0xff] }
 0xe2d   :  { %v1999_v49 = vpop.xlane.xlu2 %1998  ;;  %v1844_v38 = vmul.f32 %v3140_v48, %v1834_v14  ;;  %2156 = vmatpush.msrb.mxu3 %v2129_v22 }
 0xe2e   :  { %3141 = vrcp.f32 %v1999_v49  ;;  %2906 = vmatmul.msk.f32.gmra.mxu1 %vm300_vm5, %v1763_v50  ;;  %v3011_v50 = vld [vmem:[%s4391_s15] ss:$0 sm:$0xff]  ;;  %s3208_s15 = smov 80  }
 0xe2f   :  { %2910 = vmatmul.msk.f32.gmra.mxu2 %vm300_vm5, %v1844_v38 }
 0xe34   :  { %v3142_v51 = vpop.eup %3141 }
 0xe35   :  { %v2005_v52 = vmul.f32 %v3142_v51, %v1995_v30  ;;  %v2002_v53 = vpop.xlane.xlu2 %2001 }
 0xe36   :  { %3143 = vrcp.f32 %v2002_v53 }
 0xe37   :  { %2917 = vmatmul.msk.f32.vlgmr.msrb.gmra.mxu0 %vm300_vm5, %v2005_v52  ;;  %v3012_v52 = vld [vmem:[%s4392_s16] ss:$0 sm:$0xff]  ;;  %s3209_s16 = smov 96  }
 0xe3c   :  { %v3144_v54 = vpop.eup %3143 }
 0xe3d   :  { %v2006_v55 = vmul.f32 %v3144_v54, %v1996_v35 }
 0xe3f   :  { %2918 = vmatmul.msk.f32.gmra.mxu0 %vm300_vm5, %v2006_v55 }
 0xea0   :  { %v1868_v18 = vpop.f32.mrf.mxu2 }
 0xea1   :  { %v1949_v24 = vpop.f32.mrf.mxu3  ;;  %v1874_v25 = vmul.f32 %v1868_v18, %v3555_v8 }
 0xea2   :  { %v1955_v29 = vmul.f32 %v1949_v24, %v3559_v10 }
 0xea3   :  { %v1787_v14 = vpop.f32.mrf.mxu1 }
 0xea4   :  { %v1793_v23 = vmul.f32 %v1787_v14, %v3557_v9 }
 0xea6   :  { %v1876_v26 = vadd.f32 %v1874_v25, %v1793_v23 }
 0xea8   :  { %v1957_v36 = vadd.f32 %v1955_v29, %v1876_v26 }
 0xeaa   :  { %v1952_v41 = vpop.f32.mrf.mxu3 }
 0xeab   :  { %v1790_v31 = vpop.f32.mrf.mxu1  ;;  %v1956_v27 = vmul.f32 %v1952_v41, %v3559_v10 }
 0xeac   :  { %v1794_v39 = vmul.f32 %v1790_v31, %v3557_v9 }
 0xeb2   :  { %v1871_v30 = vpop.f32.mrf.mxu2 }
 0xeb3   :  { %v1875_v35 = vmul.f32 %v1871_v30, %v3555_v8 }
 0xeb4   :  { %v2030_v34 = vpop.f32.mrf.mxu0 }
 0xeb5   :  { %v2036_v32 = vmul.f32 %v2030_v34, %v3574_v20  ;;  %v1877_v57 = vadd.f32 %v1875_v35, %v1794_v39 }
 0xeb7   :  { %v2038_v40 = vadd.f32 %v2036_v32, %v1957_v36  ;;  %v1958_v33 = vadd.f32 %v1956_v27, %v1877_v57 }
 0xeb9   :  { %v2045_v42 = vadd.f32 %v3010_v37, %v2038_v40 }
 0xebb   :  { %v2049_v12 = vmul.f32 0.01, %v2045_v42  ;;  %vm2047_vm6 = vcmp.ge.f32.partialorder %v2045_v42, 0.0 }
 0xebc   :  { %v2033_v43 = vpop.f32.mrf.mxu0 }
 0xebd   :  { %v2037_v28 = vmul.f32 %v2033_v43, %v3574_v20  ;;  %v2051_v44 = vsel %vm2047_vm6, %v2045_v42, %v2049_v12 }
 0xebe   :  { %2920 = vmatmul.msk.f32.vlgmr.msra.gmra.mxu1 %vm182_vm4, %v2051_v44  ;;  %2922 = vmatmul.msk.f32.vlgmr.msrb.gmra.mxu2 %vm182_vm4, %v2051_v44 }
 0xebf   :  { %v2039_v45 = vadd.f32 %v2037_v28, %v1958_v33  ;;  %2924 = vmatmul.msk.f32.vlgmr.msrb.gmra.mxu3 %vm182_vm4, %v2051_v44 }
 0xec1   :  { %v2046_v47 = vadd.f32 %v3010_v37, %v2039_v45 }
 0xec3   :  { %vm2048_vm12 = vcmp.ge.f32.partialorder %v2046_v47, 0.0  ;;  %v2050_v48 = vmul.f32 0.01, %v2046_v47 }
 0xec5   :  { %v2052_v49 = vsel %vm2048_vm12, %v2046_v47, %v2050_v48 }
 0xec6   :  { %2921 = vmatmul.msk.f32.gmra.mxu1 %vm182_vm4, %v2052_v49  ;;  %2923 = vmatmul.msk.f32.gmra.mxu2 %vm182_vm4, %v2052_v49 }
 0xec7   :  { %2925 = vmatmul.msk.f32.gmra.mxu3 %vm182_vm4, %v2052_v49 }
 0xf3b   :  { %v2088_v38 = vpop.f32.mrf.mxu1 }
 0xf3c   :  { %v2089_v51 = vadd.f32 %v3011_v50, %v2088_v38 }
 0xf3e   :  { %2260 = vrot.lane.b32.xlu0 %v2089_v51, %s3207_s4 }
 0xf41   :  { %v2123_v53 = vpop.f32.mrf.mxu2 }
 0xf42   :  { %v2124_v54 = vadd.f32 %v3012_v52, %v2123_v53  ;;  %v2158_v55 = vpop.f32.mrf.mxu3 }
 0xf43   :  { %v2159_v63 = vadd.f32 %v3013_v46, %v2158_v55  ;;  %v2091_v1 = vpop.f32.mrf.mxu1 }
 0xf44   :  { %2264 = vrot.lane.b32.xlu2 %v2124_v54, %s3207_s4  ;;  %v2092_v2 = vadd.f32 %v3011_v50, %v2091_v1 }
 0xf49   :  { %v2126_v56 = vpop.f32.mrf.mxu2 }
 0xf4a   :  { %v2127_v59 = vadd.f32 %v3012_v52, %v2126_v56  ;;  %v2161_v61 = vpop.f32.mrf.mxu3 }
 0xf4b   :  { %v2162_v62 = vadd.f32 %v3013_v46, %v2161_v61 }
 0xf4c   :  { %2466 = vrot.lane.b32.xlu2 %v2127_v59, %s3208_s15  ;;  %2266 = vrot.lane.b32.xlu0 %v2127_v59, %s3207_s4 }
 0xf4d   :  { %2247 = vmatpush.msrb.mxu1 %v2162_v62  ;;  %2347 = vmatpush.msra.mxu3 %v2162_v62 }
 0xf4e   :  { %2926 = vmatpush.xpose.msk.msra.mxu0 %vm300_vm5, %v2127_v59 }
 0xf4f   :  { %2248 = vmatpush.msrb.mxu1 %v2159_v63  ;;  %2348 = vmatpush.msra.mxu3 %v2159_v63 }
 0xf51   :  { %2447 = vmatpush.msra.mxu1 %v2162_v62  ;;  %2547 = vmatpush.msrb.mxu3 %v2162_v62 }
 0xf52   :  { %2927 = vmatpush.xpose.msk.msra.mxu0 %vm300_vm5, %v2124_v54 }
 0xf53   :  { %2448 = vmatpush.msra.mxu1 %v2159_v63  ;;  %2548 = vmatpush.msrb.mxu3 %v2159_v63 }
 0xf54   :  { %2460 = vrot.lane.b32.xlu2 %v2089_v51, %s3208_s15  ;;  %2262 = vrot.lane.b32.xlu0 %v2092_v2, %s3207_s4 }
 0xf55   :  { %2928 = vmatmul.msk.f32.vlgmr.msra.gmra.mxu0 %vm300_vm5, %v2089_v51 }
 0xf5c   :  { %2364 = vrot.lane.b32.xlu2 %v2124_v54, %s3209_s16  ;;  %2464 = vrot.lane.b32.xlu0 %v2124_v54, %s3208_s15 }
 0xf5d   :  { %2929 = vmatmul.msk.f32.gmra.mxu0 %vm300_vm5, %v2092_v2 }
 0xf64   :  { %2360 = vrot.lane.b32.xlu2 %v2089_v51, %s3209_s16  ;;  %2366 = vrot.lane.b32.xlu0 %v2127_v59, %s3209_s16 }
 0xf6c   :  { %2462 = vrot.lane.b32.xlu0 %v2092_v2, %s3208_s15 }
 0xf74   :  { %2362 = vrot.lane.b32.xlu0 %v2092_v2, %s3209_s16  ;;  %s2754_s16 = sshll.u32 %s4403_s27, 4  ;;  %s2755_s16 = int_to_ptr.hbm [resolvable:$true] %s2754_s16 }
 0xf9e   :  { %v2265_v58 = vpop.permute.xlu2 %2264 }
 0xfa6   :  { %v2467_v3 = vpop.permute.xlu2 %2466 }
 0xfae   :  { %v2461_v6 = vpop.permute.xlu2 %2460 }
 0xfb0   :  { %v2261_v60 = vpop.permute.xlu0 %2260 }
 0xfb6   :  { %v2365_v13 = vpop.permute.xlu2 %2364 }
 0xfbe   :  { %v2267_v0 = vpop.permute.xlu0 %2266  ;;  %v2361_v18 = vpop.permute.xlu2 %2360 }
 0xfbf   :  { %2932 = vmatpush.xpose.msk.msra.mxu2 %vm300_vm5, %v2267_v0 }
 0xfc3   :  { %2933 = vmatpush.xpose.msk.msra.mxu2 %vm300_vm5, %v2265_v58 }
 0xfc6   :  { %v2263_v4 = vpop.permute.xlu0 %2262  ;;  %2934 = vmatmul.msk.f32.vlgmr.msra.gmra.mxu2 %vm300_vm5, %v2261_v60 }
 0xfc7   :  { %2944 = vmatpush.xpose.msk.msrb.mxu2 %vm300_vm5, %v2467_v3 }
 0xfce   :  { %v2465_v7 = vpop.permute.xlu0 %2464  ;;  %2935 = vmatmul.msk.f32.gmra.mxu2 %vm300_vm5, %v2263_v4 }
 0xfcf   :  { %2945 = vmatpush.xpose.msk.msrb.mxu2 %vm300_vm5, %v2465_v7 }
 0xfd2   :  { %v2193_v5 = vpop.f32.mrf.mxu0 }
 0xfd3   :  { %v2199_v15 = vmul.f32 0.25, %v2193_v5 }
 0xfd5   :  { %v2201_v16 = vsel %vm93_vm13, %v2199_v15, -1e+30 }
 0xfd6   :  { %v2203_v17 = vsel %vm300_vm5, %v2201_v16, -inf  ;;  %v2367_v19 = vpop.permute.xlu0 %2366  ;;  %2946 = vmatmul.msk.f32.vlgmr.msrb.gmra.mxu2 %vm300_vm5, %v2461_v6 }
 0xfd7   :  { %2204 = vmax.xlane.f32.xlu0 %v2203_v17  ;;  %2938 = vmatpush.xpose.msk.msrb.mxu0 %vm300_vm5, %v2367_v19 }
 0xfda   :  { %v2196_v22 = vpop.f32.mrf.mxu0 }
 0xfdb   :  { %v2200_v14 = vmul.f32 0.25, %v2196_v22  ;;  %2939 = vmatpush.xpose.msk.msrb.mxu0 %vm300_vm5, %v2365_v13 }
 0xfdd   :  { %v2202_v23 = vsel %vm94_vm14, %v2200_v14, -1e+30 }
 0xfde   :  { %v2206_v24 = vsel %vm300_vm5, %v2202_v23, -inf  ;;  %v2463_v25 = vpop.permute.xlu0 %2462  ;;  %2940 = vmatmul.msk.f32.vlgmr.msrb.gmra.mxu0 %vm300_vm5, %v2361_v18 }
 0xfdf   :  { %2207 = vmax.xlane.f32.xlu1 %v2206_v24  ;;  %2947 = vmatmul.msk.f32.gmra.mxu2 %vm300_vm5, %v2463_v25 }
 0xfe6   :  { %v2363_v26 = vpop.permute.xlu0 %2362 }
 0xfe7   :  { %2941 = vmatmul.msk.f32.gmra.mxu0 %vm300_vm5, %v2363_v26 }
0x1049   :  { %v2293_v29 = vpop.f32.mrf.mxu2 }
0x104a   :  { %v2299_v30 = vmul.f32 0.25, %v2293_v29  ;;  %v2205_v39 = vpop.xlane.xlu0 %2204 }
0x104b   :  { %v2209_v41 = vsub.f32 %v2201_v16, %v2205_v39 }
0x104c   :  { %v2301_v31 = vsel %vm93_vm13, %v2299_v30, -1e+30 }
0x104d   :  { %v2303_v34 = vsel %vm300_vm5, %v2301_v31, -inf  ;;  %v2211_v43 = vmul.f32 1.442695, %v2209_v41 }
0x104e   :  { %2304 = vmax.xlane.f32.xlu2 %v2303_v34 }
0x104f   :  { %3145 = vpow2.f32 %v2211_v43 }
0x1051   :  { %v2296_v35 = vpop.f32.mrf.mxu2 }
0x1052   :  { %v2300_v36 = vmul.f32 0.25, %v2296_v35  ;;  %v2208_v46 = vpop.xlane.xlu1 %2207 }
0x1053   :  { %v2210_v59 = vsub.f32 %v2202_v23, %v2208_v46 }
0x1054   :  { %v2302_v32 = vsel %vm94_vm14, %v2300_v36, -1e+30 }
0x1055   :  { %v2306_v37 = vsel %vm300_vm5, %v2302_v32, -inf  ;;  %v3146_v51 = vpop.eup %3145  ;;  %v2213_v63 = vmul.f32 1.442695, %v2210_v59 }
0x1056   :  { %2307 = vmax.xlane.f32.xlu1 %v2306_v37  ;;  %v2215_v53 = vsel %vm93_vm13, %v3146_v51, 0.0 }
0x1057   :  { %v2217_v55 = vsel %vm300_vm5, %v2215_v53, 0.0 }
0x1059   :  { %v2493_v40 = vpop.f32.mrf.mxu2 }
0x105a   :  { %v2499_v57 = vmul.f32 0.25, %v2493_v40 }
0x105b   :  { %v2393_v42 = vpop.f32.mrf.mxu0 }
0x105c   :  { %v2501_v27 = vsel %vm93_vm13, %v2499_v57, -1e+30  ;;  %v2399_v33 = vmul.f32 0.25, %v2393_v42 }
0x105d   :  { %v2503_v12 = vsel %vm300_vm5, %v2501_v27, -inf }
0x105e   :  { %2504 = vmax.xlane.f32.xlu1 %v2503_v12  ;;  %v2401_v44 = vsel %vm93_vm13, %v2399_v33, -1e+30 }
0x105f   :  { %v2403_v49 = vsel %vm300_vm5, %v2401_v44, -inf }
0x1062   :  { %v2496_v28 = vpop.f32.mrf.mxu2 }
0x1063   :  { %v2500_v45 = vmul.f32 0.25, %v2496_v28 }
0x1064   :  { %v2396_v47 = vpop.f32.mrf.mxu0 }
0x1065   :  { %v2502_v48 = vsel %vm94_vm14, %v2500_v45, -1e+30  ;;  %v2400_v50 = vmul.f32 0.25, %v2396_v47 }
0x1066   :  { %2404 = vmax.xlane.f32.xlu1 %v2403_v49  ;;  %v2506_v38 = vsel %vm300_vm5, %v2502_v48, -inf }
0x1067   :  { %2507 = vmax.xlane.f32.xlu2 %v2506_v38  ;;  %v2402_v52 = vsel %vm94_vm14, %v2400_v50, -1e+30 }
0x1068   :  { %v2406_v54 = vsel %vm300_vm5, %v2402_v52, -inf }
0x106e   :  { %2407 = vmax.xlane.f32.xlu1 %v2406_v54 }
0x106f   :  { %2218 = vadd.xlane.f32.xlu2 %v2217_v55 }
0x10c1   :  { %v2305_v56 = vpop.xlane.xlu2 %2304 }
0x10c2   :  { %v2309_v61 = vsub.f32 %v2301_v31, %v2305_v56 }
0x10c4   :  { %v2311_v62 = vmul.f32 1.442695, %v2309_v61 }
0x10c6   :  { %3147 = vpow2.f32 %v2311_v62 }
0x10c7   :  { %3149 = vpow2.f32 %v2213_v63 }
0x10c9   :  { %v2308_v1 = vpop.xlane.xlu1 %2307 }
0x10ca   :  { %v2310_v2 = vsub.f32 %v2302_v32, %v2308_v1  ;;  %v2567_v1 = vld [vmem:[%s4394_s18 + $0x38] sm:$0xff] }
0x10cb   :  { %2586 = vmatpush.msra.mxu0 %v2567_v1 }
0x10cc   :  { %v3148_v58 = vpop.eup %3147  ;;  %v2313_v60 = vmul.f32 1.442695, %v2310_v2  ;;  %v2566_v2 = vld [vmem:[%s4394_s18 + $0x30] sm:$0xff] }
0x10cd   :  { %v2315_v0 = vsel %vm93_vm13, %v3148_v58, 0.0  ;;  %v3150_v4 = vpop.eup %3149  ;;  %v2565_v58 = vld [vmem:[%s4394_s18 + $0x28] sm:$0xff]  ;;  %2587 = vmatpush.msra.mxu0 %v2566_v2  ;;  %v2717_v2 = vld [vmem:[%s4401_s25] sm:$0x3] }
0x10ce   :  { %3151 = vpow2.f32 %v2313_v60  ;;  %v2317_v3 = vsel %vm300_vm5, %v2315_v0, 0.0  ;;  %v2216_v5 = vsel %vm94_vm14, %v3150_v4, 0.0  ;;  %v2564_v60 = vld [vmem:[%s4394_s18 + $0x20] sm:$0xff]  ;;  %v2561_v4 = vld [vmem:[%s4394_s18 + $0x8] sm:$0xff] }
0x10cf   :  { %2318 = vadd.xlane.f32.xlu0 %v2317_v3  ;;  %v2220_v19 = vsel %vm300_vm5, %v2216_v5, 0.0  ;;  %2588 = vmatpush.msra.mxu0 %v2565_v58  ;;  %v2562_v3 = vld [vmem:[%s4394_s18 + $0x10] sm:$0xff]  ;;  %v3016_v58 = vld [vmem:[%s4402_s26] ss:$0 sm:$0xff] }
0x10d1   :  { %v2505_v6 = vpop.xlane.xlu1 %2504  ;;  %2589 = vmatpush.msra.mxu0 %v2564_v60 }
0x10d2   :  { %v2509_v7 = vsub.f32 %v2501_v27, %v2505_v6  ;;  %v2560_v6 = vld [vmem:[%s4394_s18] sm:$0xff] }
0x10d4   :  { %v3152_v13 = vpop.eup %3151  ;;  %v2511_v15 = vmul.f32 1.442695, %v2509_v7 }
0x10d5   :  { %v2316_v16 = vsel %vm94_vm14, %v3152_v13, 0.0  ;;  %v2607_v13 = vld [vmem:[%s4396_s20 + $0x30] sm:$0xff] }
0x10d6   :  { %3153 = vpow2.f32 %v2511_v15  ;;  %v2320_v17 = vsel %vm300_vm5, %v2316_v16, 0.0 }
0x10d7   :  { %2321 = vadd.xlane.f32.xlu1 %v2320_v17  ;;  %2221 = vadd.xlane.f32.xlu0 %v2220_v19  ;;  %v2605_v17 = vld [vmem:[%s4396_s20 + $0x20] sm:$0xff]  ;;  %v2604_v19 = vld [vmem:[%s4396_s20 + $0x18] sm:$0xff] }
0x10d9   :  { %v2405_v22 = vpop.xlane.xlu1 %2404 }
0x10da   :  { %v2409_v14 = vsub.f32 %v2401_v44, %v2405_v22  ;;  %v2508_v18 = vpop.xlane.xlu2 %2507 }
0x10db   :  { %v2510_v23 = vsub.f32 %v2502_v48, %v2508_v18 }
0x10dc   :  { %v3154_v24 = vpop.eup %3153  ;;  %v2411_v25 = vmul.f32 1.442695, %v2409_v14  ;;  %v2603_v14 = vld [vmem:[%s4396_s20 + $0x10] sm:$0xff] }
0x10dd   :  { %v2513_v26 = vmul.f32 1.442695, %v2510_v23  ;;  %v2515_v29 = vsel %vm93_vm13, %v3154_v24, 0.0 }
0x10de   :  { %3155 = vpow2.f32 %v2411_v25  ;;  %v2517_v30 = vsel %vm300_vm5, %v2515_v29, 0.0 }
0x10df   :  { %3157 = vpow2.f32 %v2513_v26  ;;  %2518 = vadd.xlane.f32.xlu2 %v2517_v30 }
0x10e1   :  { %v2408_v31 = vpop.xlane.xlu1 %2407 }
0x10e2   :  { %v2410_v34 = vsub.f32 %v2402_v52, %v2408_v31  ;;  %v2219_v35 = vpop.xlane.xlu2 %2218 }
0x10e3   :  { %3159 = vrcp.f32 %v2219_v35 }
0x10e4   :  { %v3156_v36 = vpop.eup %3155  ;;  %v2413_v32 = vmul.f32 1.442695, %v2410_v34 }
0x10e5   :  { %v3158_v37 = vpop.eup %3157  ;;  %v2415_v39 = vsel %vm93_vm13, %v3156_v36, 0.0 }
0x10e6   :  { %3161 = vpow2.f32 %v2413_v32  ;;  %v2417_v40 = vsel %vm300_vm5, %v2415_v39, 0.0  ;;  %v2516_v41 = vsel %vm94_vm14, %v3158_v37, 0.0 }
0x10e7   :  { %2418 = vadd.xlane.f32.xlu1 %v2417_v40  ;;  %v2520_v57 = vsel %vm300_vm5, %v2516_v41, 0.0 }
0x10e8   :  { %2521 = vadd.xlane.f32.xlu0 %v2520_v57 }
0x10e9   :  { %v3160_v42 = vpop.eup %3159 }
0x10ea   :  { %v2225_v27 = vmul.f32 %v3160_v42, %v2215_v53 }
0x10ec   :  { %v3162_v12 = vpop.eup %3161  ;;  %2930 = vmatmul.msk.f32.vlgmr.msrb.gmra.mxu1 %vm300_vm5, %v2225_v27 }
0x10ed   :  { %v2416_v43 = vsel %vm94_vm14, %v3162_v12, 0.0 }
0x10ee   :  { %v2420_v11 = vsel %vm300_vm5, %v2416_v43, 0.0 }
0x10ef   :  { %2421 = vadd.xlane.f32.xlu2 %v2420_v11 }
0x1142   :  { %v2319_v33 = vpop.xlane.xlu0 %2318 }
0x1143   :  { %3163 = vrcp.f32 %v2319_v33  ;;  %v2642_v33 = vld [vmem:[%s4398_s22] sm:$0xf] }
0x1144   :  { %2954 = vmatpush.msk.msra.mxu2 %vm147_vm2, %v2642_v33  ;;  %vm2643_vm2 = vcmask 31744  }
0x1149   :  { %v3164_v28 = vpop.eup %3163 }
0x114a   :  { %v2325_v44 = vmul.f32 %v3164_v28, %v2315_v0  ;;  %v2322_v45 = vpop.xlane.xlu1 %2321  ;;  %v2222_v47 = vpop.xlane.xlu0 %2221  ;;  %v2563_v0 = vld [vmem:[%s4394_s18 + $0x18] sm:$0xff] }
0x114b   :  { %3165 = vrcp.f32 %v2322_v45  ;;  %2590 = vmatpush.msra.mxu0 %v2563_v0  ;;  %v2687_v28 = vld [vmem:[%s4400_s24 + $0x38] sm:$0xff]  ;;  %v2685_v45 = vld [vmem:[%s4400_s24 + $0x28] sm:$0xff] }
0x114c   :  { %3167 = vrcp.f32 %v2222_v47  ;;  %2936 = vmatmul.msk.f32.vlgmr.msra.gmra.mxu3 %vm300_vm5, %v2325_v44  ;;  %v2686_v44 = vld [vmem:[%s4400_s24 + $0x30] sm:$0xff]  ;;  %v2684_v47 = vld [vmem:[%s4400_s24 + $0x20] sm:$0xff] }
0x114d   :  { %2591 = vmatpush.msra.mxu0 %v2562_v3  ;;  %2702 = vmatpush.msra.mxu3 %v2687_v28 }
0x114f   :  { %2592 = vmatpush.msra.mxu0 %v2561_v4  ;;  %2703 = vmatpush.msra.mxu3 %v2686_v44 }
0x1151   :  { %v3166_v48 = vpop.eup %3165  ;;  %2593 = vmatpush.msra.mxu0 %v2560_v6  ;;  %2704 = vmatpush.msra.mxu3 %v2685_v45 }
0x1152   :  { %v3168_v49 = vpop.eup %3167  ;;  %v2519_v50 = vpop.xlane.xlu2 %2518  ;;  %v2326_v38 = vmul.f32 %v3166_v48, %v2316_v16  ;;  %v2606_v16 = vld [vmem:[%s4396_s20 + $0x28] sm:$0xff]  ;;  %v2683_v48 = vld [vmem:[%s4400_s24 + $0x18] sm:$0xff] }
0x1153   :  { %3169 = vrcp.f32 %v2519_v50  ;;  %v2226_v21 = vmul.f32 %v3168_v49, %v2216_v5  ;;  %v2608_v5 = vld [vmem:[%s4396_s20 + $0x38] sm:$0xff]  ;;  %2705 = vmatpush.msra.mxu3 %v2684_v47  ;;  %v2682_v49 = vld [vmem:[%s4400_s24 + $0x10] sm:$0xff]  ;;  %v3015_v50 = vld [vmem:[%s4397_s21] ss:$0 sm:$0xff] }
0x1154   :  { %2937 = vmatmul.msk.f32.gmra.mxu3 %vm300_vm5, %v2326_v38  ;;  %2627 = vmatpush.msrb.mxu1 %v2608_v5 }
0x1155   :  { %2931 = vmatmul.msk.f32.gmra.mxu1 %vm300_vm5, %v2226_v21  ;;  %2706 = vmatpush.msra.mxu3 %v2683_v48 }
0x1156   :  { %2628 = vmatpush.msrb.mxu1 %v2607_v13 }
0x1157   :  { %2707 = vmatpush.msra.mxu3 %v2682_v49 }
0x1158   :  { %2629 = vmatpush.msrb.mxu1 %v2606_v16 }
0x1159   :  { %v3170_v51 = vpop.eup %3169 }
0x115a   :  { %v2525_v52 = vmul.f32 %v3170_v51, %v2515_v29  ;;  %v2419_v53 = vpop.xlane.xlu1 %2418  ;;  %2630 = vmatpush.msrb.mxu1 %v2605_v17 }
0x115b   :  { %3171 = vrcp.f32 %v2419_v53  ;;  %v2522_v54 = vpop.xlane.xlu0 %2521  ;;  %v2681_v53 = vld [vmem:[%s4400_s24 + $0x8] sm:$0xff] }
0x115c   :  { %3173 = vrcp.f32 %v2522_v54  ;;  %2948 = vmatmul.msk.f32.vlgmr.msrb.gmra.mxu3 %vm300_vm5, %v2525_v52  ;;  %2631 = vmatpush.msrb.mxu1 %v2604_v19  ;;  %v2680_v54 = vld [vmem:[%s4400_s24] sm:$0xff] }
0x115d   :  { %2708 = vmatpush.msra.mxu3 %v2681_v53 }
0x115e   :  { %2632 = vmatpush.msrb.mxu1 %v2603_v14 }
0x115f   :  { %2709 = vmatpush.msra.mxu3 %v2680_v54 }
0x1161   :  { %v3172_v55 = vpop.eup %3171 }
0x1162   :  { %v3174_v46 = vpop.eup %3173  ;;  %v2425_v56 = vmul.f32 %v3172_v55, %v2415_v39  ;;  %v2422_v59 = vpop.xlane.xlu2 %2421  ;;  %v2676_v55 = vld [vmem:[%s4399_s23] sm:$0xff] }
0x1163   :  { %3175 = vrcp.f32 %v2422_v59  ;;  %v2526_v61 = vmul.f32 %v3174_v46, %v2516_v41  ;;  %v2677_v59 = vld [vmem:[%s4399_s23 + $0x8] sm:$0xff]  ;;  %s2752_s23 = sshll.u32 %s3210_s28, 4  ;;  %s2753_s23 = int_to_ptr.vmem [resolvable:$true] %s2752_s23 }
0x1164   :  { %2942 = vmatmul.msk.f32.vlgmr.msra.gmra.mxu1 %vm300_vm5, %v2425_v56 }
0x1165   :  { %2949 = vmatmul.msk.f32.gmra.mxu3 %vm300_vm5, %v2526_v61 }
0x1169   :  { %v3176_v62 = vpop.eup %3175  ;;  %v2250_v15 = vpop.f32.mrf.mxu1 }
0x116a   :  { %v2426_v63 = vmul.f32 %v3176_v62, %v2416_v43  ;;  %v2256_v25 = vmul.f32 %v2250_v15, %v3557_v9 }
0x116c   :  { %2943 = vmatmul.msk.f32.gmra.mxu1 %vm300_vm5, %v2426_v63 }
0x11cf   :  { %v2350_v7 = vpop.f32.mrf.mxu3 }
0x11d0   :  { %v2356_v23 = vmul.f32 %v2350_v7, %v3555_v8 }
0x11d2   :  { %v2253_v18 = vpop.f32.mrf.mxu1  ;;  %v2358_v29 = vadd.f32 %v2356_v23, %v2256_v25 }
0x11d3   :  { %v2257_v32 = vmul.f32 %v2253_v18, %v3557_v9  ;;  %v2601_v9 = vld [vmem:[%s4396_s20] sm:$0xff] }
0x11d7   :  { %v2353_v22 = vpop.f32.mrf.mxu3 }
0x11d8   :  { %v2357_v35 = vmul.f32 %v2353_v22, %v3555_v8  ;;  %v2602_v8 = vld [vmem:[%s4396_s20 + $0x8] sm:$0xff] }
0x11d9   :  { %2633 = vmatpush.msrb.mxu1 %v2602_v8 }
0x11da   :  { %v2359_v40 = vadd.f32 %v2357_v35, %v2257_v32 }
0x11db   :  { %2634 = vmatpush.msrb.mxu1 %v2601_v9 }
0x11df   :  { %v2550_v24 = vpop.f32.mrf.mxu3 }
0x11e0   :  { %v2556_v31 = vmul.f32 %v2550_v24, %v3574_v20 }
0x11e1   :  { %v2450_v26 = vpop.f32.mrf.mxu1 }
0x11e2   :  { %v2456_v30 = vmul.f32 %v2450_v26, %v3559_v10 }
0x11e4   :  { %v2458_v34 = vadd.f32 %v2456_v30, %v2358_v29 }
0x11e6   :  { %v2558_v36 = vadd.f32 %v2556_v31, %v2458_v34 }
0x11e8   :  { %2950 = vmatmul.msk.f32.vlgmr.msra.gmra.mxu0 %vm182_vm4, %v2558_v36  ;;  %v2553_v37 = vpop.f32.mrf.mxu3 }
0x11e9   :  { %v2453_v39 = vpop.f32.mrf.mxu1  ;;  %v2557_v57 = vmul.f32 %v2553_v37, %v3574_v20 }
0x11ea   :  { %v2457_v41 = vmul.f32 %v2453_v39, %v3559_v10  ;;  %v3014_v10 = vld [vmem:[%s4395_s19] ss:$0 sm:$0xff] }
0x11ec   :  { %v2459_v42 = vadd.f32 %v2457_v41, %v2359_v40 }
0x11ee   :  { %v2559_v27 = vadd.f32 %v2557_v57, %v2459_v42 }
0x11f0   :  { %2951 = vmatmul.msk.f32.gmra.mxu0 %vm182_vm4, %v2559_v27 }
0x1265   :  { %v2595_v12 = vpop.f32.mrf.mxu0 }
0x1266   :  { %v2596_v20 = vadd.f32 %v3014_v10, %v2595_v12 }
0x1268   :  { %2952 = vmatmul.msk.f32.vlgmr.msrb.gmra.mxu1 %vm182_vm4, %v2596_v20 }
0x126d   :  { %v2598_v43 = vpop.f32.mrf.mxu0 }
0x126e   :  { %v2599_v11 = vadd.f32 %v3014_v10, %v2598_v43 }
0x1270   :  { %2953 = vmatmul.msk.f32.gmra.mxu1 %vm182_vm4, %v2599_v11 }
0x12e5   :  { %v2636_v38 = vpop.f32.mrf.mxu1 }
0x12e6   :  { %v2637_v21 = vadd.f32 %v3015_v50, %v2636_v38 }
0x12e8   :  { %2955 = vmatmul.msk.f32.vlgmr.msra.gmra.mxu2 %vm2643_vm2, %v2637_v21 }
0x12ed   :  { %v2639_v51 = vpop.f32.mrf.mxu1 }
0x12ee   :  { %v2640_v52 = vadd.f32 %v3015_v50, %v2639_v51 }
0x12f0   :  { %2956 = vmatmul.msk.f32.gmra.mxu2 %vm2643_vm2, %v2640_v52 }
0x136b   :  { %v2670_v46 = vpop.f32.mrf.mxu2 }
0x136c   :  { %v2678_v56 = vmul.f32 %v2676_v55, %v2670_v46 }
0x136e   :  { %2957 = vmatmul.msk.f32.vlgmr.msra.gmra.mxu3 %vm182_vm4, %v2678_v56 }
0x1373   :  { %v2673_v61 = vpop.f32.mrf.mxu2 }
0x1374   :  { %v2679_v62 = vmul.f32 %v2677_v59, %v2673_v61 }
0x1376   :  { %2958 = vmatmul.msk.f32.gmra.mxu3 %vm182_vm4, %v2679_v62  ;;  %vm2745_vm4 = vcmask 58368  }
0x13f1   :  { %v2711_v63 = vpop.f32.mrf.mxu3 }
0x13f9   :  { %v2714_v1 = vpop.f32.mrf.mxu3 }
0x13fa   :  { %2739 = vmatpush.msrb.mxu0 %v2714_v1 }
0x13fc   :  { %2740 = vmatpush.msrb.mxu0 %v2711_v63 }
0x13fd   :  { %2959 = vmatmul.msk.f32.vlgmr.msrb.gmra.mxu0 %vm300_vm5, %v2717_v2 }
0x147a   :  { %v2742_v60 = vpop.f32.mrf.mxu0 }
0x147b   :  { %v2743_v0 = vadd.f32 %v3016_v58, %v2742_v60 }
0x147d   :  { %2746 = vst.msk [vmem:[#allocation2] sm:$0x3] %vm2745_vm4, %v2743_v0 }
0x147e   :  { %2757 = dma.vmem_to_hbm [thread:$0]  %s2753_s23, 32, %s2755_s16, [#allocation3]  }
0x147f   :  { %3201 = dma.done.wait [#allocation3], 32  }
0x1480   :  { %3202 = vsyncadd [#allocation3], 4294967264 }
0x1481   :  { %2762 = vsyncpa [#allocation3], 1 }

</bundles_post_ra>
